<compile_context>
chip_gen: v6e
topology: v6e:2x2x1
jax: 0.10.0
libtpu: 0.0.40
codegen_flags: <defaults>
</compile_context>

<pallas_src>
import jax
import jax.numpy as jnp
from jax import lax
from jax.experimental import pallas as pl
from jax.experimental.pallas import tpu as pltpu


def _round_up(x, m):
    return ((x + m - 1) // m) * m


def gru_bidir_kernel(emb_ref,                 # (T, bt, Hp)   embedded tokens (mxu dtype)
                     w_in_ref,                # (Hp, 6*Hp)    fused pre-transposed W_ih (fwd|bwd), mxu dtype
                     b_in_ref,                # (1, 6*Hp)     f32 b_ih (+ b_hh folded for r,z gates)
                     whh_f_ref, whh_b_ref,    # (Hp, 3*Hp)    pre-transposed W_hh per direction, mxu dtype
                     bhh_nf_ref, bhh_nb_ref,  # (1, Hp)       f32 n-gate hidden bias per direction
                     wout_ref,                # (2*Hp, Hp)    fused output Linear (fwd rows | bwd rows), mxu dtype
                     bout_ref,                # (1, Hp)       f32
                     out_ref,                 # (T, bt, Hp)   f32 output after Linear
                     hid_ref,                 # (2, bt, Hp)   f32 GRU final hidden [fwd, bwd]
                     xproj_ref,               # scratch (T, bt, 6*Hp) f32 input projections
                     seq_ref):                # scratch (T, bt, 2*Hp) mxu dtype, fwd|bwd hidden states
    T, bt, Hp2 = seq_ref.shape
    Hp = Hp2 // 2
    H3 = 3 * Hp

    # ---- Whole-sequence input projection: one big MXU call (both directions,
    # all three gates fused along the lane dim).  (T,bt,Hp) collapses to
    # (T*bt,Hp) for free since (bt,Hp) = (8k,128m) is tile aligned.
    x2d = emb_ref[...].reshape(T * bt, Hp)
    gi_all = jnp.dot(x2d, w_in_ref[...],
                     preferred_element_type=jnp.float32) + b_in_ref[...]
    xproj_ref[...] = gi_all.reshape(T, bt, 6 * Hp)

    whh_f = whh_f_ref[...]
    whh_b = whh_b_ref[...]
    mxu_dt = whh_f.dtype
    # Hoist bias broadcasts out of the recurrence loop (no CSE for broadcasts).
    bhn_f = jnp.broadcast_to(bhh_nf_ref[...], (bt, Hp))
    bhn_b = jnp.broadcast_to(bhh_nb_ref[...], (bt, Hp))

    def gru_step(gi, h_prev, whh, bhn):
        # gi: (bt, 3*Hp) f32, gates [r, z, n] at 128-aligned lane offsets.
        # MXU operands in mxu_dt (bf16 fast path), accumulation + gate math f32.
        gh = jnp.dot(h_prev.astype(mxu_dt), whh,
                     preferred_element_type=jnp.float32)
        r = jax.nn.sigmoid(gi[:, 0:Hp] + gh[:, 0:Hp])
        z = jax.nn.sigmoid(gi[:, Hp:2 * Hp] + gh[:, Hp:2 * Hp])
        n = jnp.tanh(gi[:, 2 * Hp:3 * Hp] + r * (gh[:, 2 * Hp:3 * Hp] + bhn))
        return n + z * (h_prev - n)          # == (1-z)*n + z*h_prev

    h0 = jnp.zeros((bt, Hp), jnp.float32)

    # ---- Merged fwd/bwd recurrence: iteration i does fwd step i and bwd step
    # T-1-i (two independent dot chains interleave on the MXU/VPU/EUP).
    # Unroll capped at 8 to keep LLO scheduling visibility without spilling
    # the 64-vreg file at large Hp.
    def body(i, carry):
        h_f, h_b = carry
        tb = T - 1 - i
        gi_f = xproj_ref[i, :, 0:H3]
        gi_b = xproj_ref[tb, :, H3:2 * H3]
        h_f_new = gru_step(gi_f, h_f, whh_f, bhn_f)
        h_b_new = gru_step(gi_b, h_b, whh_b, bhn_b)
        seq_ref[i, :, 0:Hp] = h_f_new.astype(mxu_dt)
        seq_ref[tb, :, Hp:2 * Hp] = h_b_new.astype(mxu_dt)
        return (h_f_new, h_b_new)

    h_f_last, h_b_last = lax.fori_loop(0, T, body, (h0, h0),
                                       unroll=min(T, 8))

    hid_ref[0] = h_f_last
    hid_ref[1] = h_b_last

    # ---- Output Linear over the whole sequence: ONE MXU call with K = 2*Hp
    # (concat([fwd,bwd],-1) is already materialized lane-fused in seq_ref).
    seq2d = seq_ref[...].reshape(T * bt, 2 * Hp)
    out2d = jnp.dot(seq2d, wout_ref[...],
                    preferred_element_type=jnp.float32) + bout_ref[...]
    out_ref[...] = out2d.reshape(T, bt, Hp)


def pack_params(p, Hp, mxu_dtype):
    """Pad / pre-transpose / fuse the PyTorch-shaped weights for the kernel."""
    H = p['embedding'].shape[1]
    f32 = jnp.float32

    # Fused input-projection weight (Hp, 6*Hp): lane blocks [r_f,z_f,n_f,r_b,z_b,n_b].
    w_in = jnp.zeros((Hp, 6 * Hp), f32)
    for d, w_ih in enumerate((p['w_ih_f'], p['w_ih_b'])):
        for k in range(3):
            j = (3 * d + k) * Hp
            w_in = w_in.at[:H, j:j + H].set(w_ih[k * H:(k + 1) * H, :].T)

    # Fused input bias; fold the r/z hidden biases in (the n-gate hidden bias
    # cannot be folded because it sits inside r * (...)).  Biases stay f32.
    b_in = jnp.zeros((1, 6 * Hp), f32)
    for d, (b_ih, b_hh) in enumerate(((p['b_ih_f'], p['b_hh_f']),
                                      (p['b_ih_b'], p['b_hh_b']))):
        for k in range(3):
            b = b_ih[k * H:(k + 1) * H]
            if k < 2:
                b = b + b_hh[k * H:(k + 1) * H]
            j = (3 * d + k) * Hp
            b_in = b_in.at[0, j:j + H].set(b)

    def pack_whh(w_hh):
        out = jnp.zeros((Hp, 3 * Hp), f32)
        for k in range(3):
            out = out.at[:H, k * Hp:k * Hp + H].set(w_hh[k * H:(k + 1) * H, :].T)
        return out

    whh_f = pack_whh(p['w_hh_f'])
    whh_b = pack_whh(p['w_hh_b'])

    bhh_nf = jnp.zeros((1, Hp), f32).at[0, :H].set(p['b_hh_f'][2 * H:3 * H])
    bhh_nb = jnp.zeros((1, Hp), f32).at[0, :H].set(p['b_hh_b'][2 * H:3 * H])

    # Fused output Linear (2*Hp, Hp): rows [0:Hp] multiply the fwd hidden,
    # rows [Hp:2Hp] the bwd hidden -> single K=2*Hp dot in the kernel.
    wout = jnp.zeros((2 * Hp, Hp), f32)
    wout = wout.at[:H, :H].set(p['w_out'][:, :H].T)
    wout = wout.at[Hp:Hp + H, :H].set(p['w_out'][:, H:].T)
    bout = jnp.zeros((1, Hp), f32).at[0, :H].set(p['b_out'])

    # MXU operands in mxu_dtype (bf16 fast path on v5e/v6e/v7x); biases f32.
    cast = lambda a: a.astype(mxu_dtype)
    return (cast(w_in), b_in, cast(whh_f), cast(whh_b), bhh_nf, bhh_nb,
            cast(wout), bout)


def encoder_rnn_forward(input_ids, params, *, batch_tile=None,
                        mxu_dtype=jnp.float32):
    """input_ids: (B, T) int32 token ids. Returns (output (B,T,H), hidden (2,B,H))."""
    B, T = input_ids.shape
    H = params['embedding'].shape[1]
    Hp = _round_up(H, 128)            # lane dim: pad hidden to 128 multiple
    if batch_tile is None:
        # Fill the MXU M dim (up to 128 rows). Larger batches form multiple
        # tiles -> the "parallel" grid axis shards across v7x's two TCs.
        batch_tile = min(_round_up(B, 8), 128)
    bt = batch_tile
    assert bt % 8 == 0
    Bp = _round_up(max(B, bt), bt)    # pad batch to a multiple of the tile
    nbt = Bp // bt

    # Embedding lookup (gather) is glue in plain JAX; build time-major directly
    # (no separate transpose pass over the activations), then pad.
    emb = params['embedding'][input_ids.T].astype(mxu_dtype)     # (T, B, H)
    emb = jnp.pad(emb, ((0, 0), (0, Bp - B), (0, Hp - H)))       # (T, Bp, Hp)

    packed = pack_params(params, Hp, mxu_dtype)

    seq_map = lambda i: (0, i, 0)     # batch-tiled arrays
    rep = lambda i: (0, 0)            # replicated weights
    # Replicated weights: constant index_map -> single-buffer them (halves
    # their VMEM footprint; matters on v7x's 64 MiB).
    wspec = lambda shape: pl.BlockSpec(shape, rep, pipeline_mode=pl.Buffered(1))

    out_tm, hid = pl.pallas_call(
        gru_bidir_kernel,
        out_shape=(jax.ShapeDtypeStruct((T, Bp, Hp), jnp.float32),
                   jax.ShapeDtypeStruct((2, Bp, Hp), jnp.float32)),
        grid=(nbt,),
        in_specs=[pl.BlockSpec((T, bt, Hp), seq_map),       # embedded sequence
                  wspec((Hp, 6 * Hp)),                      # fused W_ih
                  wspec((1, 6 * Hp)),                       # fused b_in
                  wspec((Hp, 3 * Hp)),                      # W_hh fwd
                  wspec((Hp, 3 * Hp)),                      # W_hh bwd
                  wspec((1, Hp)),                           # b_hh_n fwd
                  wspec((1, Hp)),                           # b_hh_n bwd
                  wspec((2 * Hp, Hp)),                      # fused W_out
                  wspec((1, Hp))],                          # b_out
        out_specs=(pl.BlockSpec((T, bt, Hp), seq_map),
                   pl.BlockSpec((2, bt, Hp), seq_map)),
        scratch_shapes=[pltpu.VMEM((T, bt, 6 * Hp), jnp.float32),
                        pltpu.VMEM((T, bt, 2 * Hp), mxu_dtype)],
        compiler_params=pltpu.CompilerParams(
            dimension_semantics=("parallel",),
            # Default scoped VMEM limit (16/32 MiB) is far below physical;
            # 56 MiB is safe on every generation (v7x physical = 64 MiB).
            vmem_limit_bytes=56 * 1024 * 1024),
    )(emb, *packed)

    output = jnp.transpose(out_tm[:, :B, :H], (1, 0, 2))         # (B, T, H)
    hidden = hid[:, :B, :H]                                      # (2, B, H)
    return output, hidden


def reference_forward(input_ids, params):
    """Pure-JAX reference matching torch.nn semantics (for validation)."""
    emb = params['embedding'][input_ids].astype(jnp.float32)     # (B, T, H)
    B, T, H = emb.shape

    def gru_dir(x_seq, w_ih, w_hh, b_ih, b_hh):
        h = jnp.zeros((B, H), jnp.float32)
        outs = []
        for t in range(T):
            x = x_seq[:, t, :]
            gi = x @ w_ih.T + b_ih
            gh = h @ w_hh.T + b_hh
            r = jax.nn.sigmoid(gi[:, :H] + gh[:, :H])
            z = jax.nn.sigmoid(gi[:, H:2 * H] + gh[:, H:2 * H])
            n = jnp.tanh(gi[:, 2 * H:] + r * gh[:, 2 * H:])
            h = (1.0 - z) * n + z * h
            outs.append(h)
        return jnp.stack(outs, axis=1), h

    f_out, h_f = gru_dir(emb, params['w_ih_f'], params['w_hh_f'],
                         params['b_ih_f'], params['b_hh_f'])
    b_out, h_b = gru_dir(emb[:, ::-1, :], params['w_ih_b'], params['w_hh_b'],
                         params['b_ih_b'], params['b_hh_b'])
    b_out = b_out[:, ::-1, :]
    gru_out = jnp.concatenate([f_out, b_out], axis=-1)           # (B, T, 2H)
    hidden = jnp.stack([h_f, h_b], axis=0)                       # (2, B, H)
    output = gru_out @ params['w_out'].T + params['b_out']
    return output, hidden


def init_params(key, vocab, H):
    keys = jax.random.split(key, 12)
    s = 1.0 / (H ** 0.5)
    u = lambda k, shape: jax.random.uniform(k, shape, jnp.float32, -s, s)
    return {
        'embedding': jax.random.normal(keys[0], (vocab, H), jnp.float32),
        'w_ih_f': u(keys[1], (3 * H, H)),
        'w_hh_f': u(keys[2], (3 * H, H)),
        'b_ih_f': u(keys[3], (3 * H,)),
        'b_hh_f': u(keys[4], (3 * H,)),
        'w_ih_b': u(keys[5], (3 * H, H)),
        'w_hh_b': u(keys[6], (3 * H, H)),
        'b_ih_b': u(keys[7], (3 * H,)),
        'b_hh_b': u(keys[8], (3 * H,)),
        'w_out': u(keys[9], (H, 2 * H)),
        'b_out': u(keys[10], (H,)),
    }


if __name__ == "__main__":
    vocab, hidden_size, batch, seq = 16, 32, 2, 8

    key = jax.random.PRNGKey(0)
    pkey, ikey = jax.random.split(key)
    params = init_params(pkey, vocab, hidden_size)
    input_ids = jax.random.randint(ikey, (batch, seq), 0, vocab, dtype=jnp.int32)

    ref_out, ref_hid = reference_forward(input_ids, params)

    # f32 MXU path: exact-ish vs the f32 reference.
    output, hidden = encoder_rnn_forward(input_ids, params, mxu_dtype=jnp.float32)
    jax.block_until_ready((output, hidden))
    assert output.shape == (batch, seq, hidden_size)
    assert hidden.shape == (2, batch, hidden_size)
    assert jnp.allclose(output, ref_out, atol=1e-4), "f32 output mismatch vs reference"
    assert jnp.allclose(hidden, ref_hid, atol=1e-4), "f32 hidden mismatch vs reference"

    # bf16 MXU fast path (f32 accumulation / gate math): loose tolerance check.
    out_bf, hid_bf = encoder_rnn_forward(input_ids, params, mxu_dtype=jnp.bfloat16)
    jax.block_until_ready((out_bf, hid_bf))
    assert jnp.all(jnp.isfinite(out_bf)) and jnp.all(jnp.isfinite(hid_bf))
    assert jnp.allclose(out_bf, ref_out, atol=1e-1), "bf16 output drifted vs reference"
    assert jnp.allclose(hid_bf, ref_hid, atol=1e-1), "bf16 hidden drifted vs reference"

    print("KERNEL_OK")
</pallas_src>

<mosaic_0001>
module attributes {stable_mosaic.version = 11 : i64} {
  func.func @gru_bidir_kernel(%arg0: i32, %arg1: memref<8x8x128xf32, #tpu.memory_space<vmem>>, %arg2: memref<128x768xf32, #tpu.memory_space<vmem>>, %arg3: memref<1x768xf32, #tpu.memory_space<vmem>>, %arg4: memref<128x384xf32, #tpu.memory_space<vmem>>, %arg5: memref<128x384xf32, #tpu.memory_space<vmem>>, %arg6: memref<1x128xf32, #tpu.memory_space<vmem>>, %arg7: memref<1x128xf32, #tpu.memory_space<vmem>>, %arg8: memref<256x128xf32, #tpu.memory_space<vmem>>, %arg9: memref<1x128xf32, #tpu.memory_space<vmem>>, %arg10: memref<8x8x128xf32, #tpu.memory_space<vmem>>, %arg11: memref<2x8x128xf32, #tpu.memory_space<vmem>>, %arg12: memref<8x8x768xf32, #tpu.memory_space<vmem>>, %arg13: memref<8x8x256xf32, #tpu.memory_space<vmem>>) attributes {dimension_semantics = [#tpu.dimension_semantics<parallel>], iteration_bounds = array<i64: 1>, scalar_prefetch = 0 : i64, scratch_operands = 2 : i64, tpu.core_type = #tpu.core_type<tc>, window_params = [{transform_indices = @transform_0, window_bounds = array<i64: 8, 8, 128>}, {pipeline_mode = #tpu.pipeline_mode<synchronous>, transform_indices = @transform_1, window_bounds = array<i64: 128, 768>}, {pipeline_mode = #tpu.pipeline_mode<synchronous>, transform_indices = @transform_2, window_bounds = array<i64: 1, 768>}, {pipeline_mode = #tpu.pipeline_mode<synchronous>, transform_indices = @transform_3, window_bounds = array<i64: 128, 384>}, {pipeline_mode = #tpu.pipeline_mode<synchronous>, transform_indices = @transform_4, window_bounds = array<i64: 128, 384>}, {pipeline_mode = #tpu.pipeline_mode<synchronous>, transform_indices = @transform_5, window_bounds = array<i64: 1, 128>}, {pipeline_mode = #tpu.pipeline_mode<synchronous>, transform_indices = @transform_6, window_bounds = array<i64: 1, 128>}, {pipeline_mode = #tpu.pipeline_mode<synchronous>, transform_indices = @transform_7, window_bounds = array<i64: 256, 128>}, {pipeline_mode = #tpu.pipeline_mode<synchronous>, transform_indices = @transform_8, window_bounds = array<i64: 1, 128>}, {transform_indices = @transform_9, window_bounds = array<i64: 8, 8, 128>}, {transform_indices = @transform_10, window_bounds = array<i64: 2, 8, 128>}]} {
    %c0 = arith.constant 0 : index
    %c0_0 = arith.constant 0 : index
    %c0_1 = arith.constant 0 : index
    %0 = vector.load %arg1[%c0, %c0_0, %c0_1] : memref<8x8x128xf32, #tpu.memory_space<vmem>>, vector<8x8x128xf32>
    %1 = vector.shape_cast %0 : vector<8x8x128xf32> to vector<64x128xf32>
    %c0_2 = arith.constant 0 : index
    %c0_3 = arith.constant 0 : index
    %2 = vector.load %arg2[%c0_2, %c0_3] : memref<128x768xf32, #tpu.memory_space<vmem>>, vector<128x768xf32>
    %cst = arith.constant dense<0.000000e+00> : vector<64x768xf32>
    %3 = tpu.matmul %1, %2, %cst {dimension_numbers = #tpu.dot_dimension_numbers<[1], [0], [0], [1], [0, 0, 1, 1], [], []>} : vector<64x128xf32>, vector<128x768xf32>, vector<64x768xf32> -> vector<64x768xf32>
    %c0_4 = arith.constant 0 : index
    %c0_5 = arith.constant 0 : index
    %4 = vector.load %arg3[%c0_4, %c0_5] : memref<1x768xf32, #tpu.memory_space<vmem>>, vector<1x768xf32>
    %5 = vector.broadcast %4 : vector<1x768xf32> to vector<64x768xf32>
    %6 = arith.addf %3, %5 : vector<64x768xf32>
    %7 = vector.shape_cast %6 : vector<64x768xf32> to vector<8x8x768xf32>
    %c0_6 = arith.constant 0 : index
    %c0_7 = arith.constant 0 : index
    %c0_8 = arith.constant 0 : index
    %8 = vector.load %arg12[%c0_6, %c0_7, %c0_8] : memref<8x8x768xf32, #tpu.memory_space<vmem>>, vector<8x8x768xf32>
    tpu.vector_store %arg12[%c0_6, %c0_7, %c0_8], %7 {strides = array<i32>} : memref<8x8x768xf32, #tpu.memory_space<vmem>>, vector<8x8x768xf32>,
    %c0_9 = arith.constant 0 : index
    %c0_10 = arith.constant 0 : index
    %9 = vector.load %arg4[%c0_9, %c0_10] : memref<128x384xf32, #tpu.memory_space<vmem>>, vector<128x384xf32>
    %c0_11 = arith.constant 0 : index
    %c0_12 = arith.constant 0 : index
    %10 = vector.load %arg5[%c0_11, %c0_12] : memref<128x384xf32, #tpu.memory_space<vmem>>, vector<128x384xf32>
    %c0_13 = arith.constant 0 : index
    %c0_14 = arith.constant 0 : index
    %11 = vector.load %arg6[%c0_13, %c0_14] : memref<1x128xf32, #tpu.memory_space<vmem>>, vector<1x128xf32>
    %12 = vector.shape_cast %11 : vector<1x128xf32> to vector<1x128xf32>
    %13 = vector.broadcast %12 : vector<1x128xf32> to vector<8x128xf32>
    %c0_15 = arith.constant 0 : index
    %c0_16 = arith.constant 0 : index
    %14 = vector.load %arg7[%c0_15, %c0_16] : memref<1x128xf32, #tpu.memory_space<vmem>>, vector<1x128xf32>
    %15 = vector.shape_cast %14 : vector<1x128xf32> to vector<1x128xf32>
    %16 = vector.broadcast %15 : vector<1x128xf32> to vector<8x128xf32>
    %cst_17 = arith.constant 0.000000e+00 : f32
    %17 = vector.broadcast %cst_17 : f32 to vector<8x128xf32>
    %c0_i32 = arith.constant 0 : i32
    %c7_i32 = arith.constant 7 : i32
    %18 = arith.subi %c7_i32, %c0_i32 : i32
    %19 = arith.index_cast %c0_i32 : i32 to index
    %c0_18 = arith.constant 0 : index
    %c0_19 = arith.constant 0 : index
    %20 = vector.load %arg12[%19, %c0_18, %c0_19] : memref<8x8x768xf32, #tpu.memory_space<vmem>>, vector<1x8x384xf32>
    %21 = vector.shape_cast %20 : vector<1x8x384xf32> to vector<8x384xf32>
    %22 = arith.index_cast %18 : i32 to index
    %c0_20 = arith.constant 0 : index
    %c384 = arith.constant 384 : index
    %23 = vector.load %arg12[%22, %c0_20, %c384] : memref<8x8x768xf32, #tpu.memory_space<vmem>>, vector<1x8x384xf32>
    %24 = vector.shape_cast %23 : vector<1x8x384xf32> to vector<8x384xf32>
    %cst_21 = arith.constant dense<0.000000e+00> : vector<8x384xf32>
    %25 = tpu.matmul %17, %9, %cst_21 {dimension_numbers = #tpu.dot_dimension_numbers<[1], [0], [0], [1], [0, 0, 1, 1], [], []>} : vector<8x128xf32>, vector<128x384xf32>, vector<8x384xf32> -> vector<8x384xf32>
    %26 = vector.extract_strided_slice %21 {offsets = [0, 0], sizes = [8, 128], strides = [1, 1]} : vector<8x384xf32> to vector<8x128xf32>
    %27 = vector.extract_strided_slice %25 {offsets = [0, 0], sizes = [8, 128], strides = [1, 1]} : vector<8x384xf32> to vector<8x128xf32>
    %28 = arith.addf %26, %27 : vector<8x128xf32>
    %29 = arith.negf %28 : vector<8x128xf32>
    %30 = math.exp %29 : vector<8x128xf32>
    %cst_22 = arith.constant 1.000000e+00 : f32
    %31 = vector.broadcast %cst_22 : f32 to vector<8x128xf32>
    %32 = arith.addf %31, %30 : vector<8x128xf32>
    %33 = arith.divf %31, %32 : vector<8x128xf32>
    %34 = vector.extract_strided_slice %21 {offsets = [0, 128], sizes = [8, 128], strides = [1, 1]} : vector<8x384xf32> to vector<8x128xf32>
    %35 = vector.extract_strided_slice %25 {offsets = [0, 128], sizes = [8, 128], strides = [1, 1]} : vector<8x384xf32> to vector<8x128xf32>
    %36 = arith.addf %34, %35 : vector<8x128xf32>
    %37 = arith.negf %36 : vector<8x128xf32>
    %38 = math.exp %37 : vector<8x128xf32>
    %cst_23 = arith.constant 1.000000e+00 : f32
    %39 = vector.broadcast %cst_23 : f32 to vector<8x128xf32>
    %40 = arith.addf %39, %38 : vector<8x128xf32>
    %41 = arith.divf %39, %40 : vector<8x128xf32>
    %42 = vector.extract_strided_slice %21 {offsets = [0, 256], sizes = [8, 128], strides = [1, 1]} : vector<8x384xf32> to vector<8x128xf32>
    %43 = vector.extract_strided_slice %25 {offsets = [0, 256], sizes = [8, 128], strides = [1, 1]} : vector<8x384xf32> to vector<8x128xf32>
    %44 = arith.addf %43, %13 : vector<8x128xf32>
    %45 = arith.mulf %33, %44 : vector<8x128xf32>
    %46 = arith.addf %42, %45 : vector<8x128xf32>
    %47 = math.tanh %46 : vector<8x128xf32>
    %48 = arith.subf %17, %47 : vector<8x128xf32>
    %49 = arith.mulf %41, %48 : vector<8x128xf32>
    %50 = arith.addf %47, %49 : vector<8x128xf32>
    %cst_24 = arith.constant dense<0.000000e+00> : vector<8x384xf32>
    %51 = tpu.matmul %17, %10, %cst_24 {dimension_numbers = #tpu.dot_dimension_numbers<[1], [0], [0], [1], [0, 0, 1, 1], [], []>} : vector<8x128xf32>, vector<128x384xf32>, vector<8x384xf32> -> vector<8x384xf32>
    %52 = vector.extract_strided_slice %24 {offsets = [0, 0], sizes = [8, 128], strides = [1, 1]} : vector<8x384xf32> to vector<8x128xf32>
    %53 = vector.extract_strided_slice %51 {offsets = [0, 0], sizes = [8, 128], strides = [1, 1]} : vector<8x384xf32> to vector<8x128xf32>
    %54 = arith.addf %52, %53 : vector<8x128xf32>
    %55 = arith.negf %54 : vector<8x128xf32>
    %56 = math.exp %55 : vector<8x128xf32>
    %cst_25 = arith.constant 1.000000e+00 : f32
    %57 = vector.broadcast %cst_25 : f32 to vector<8x128xf32>
    %58 = arith.addf %57, %56 : vector<8x128xf32>
    %59 = arith.divf %57, %58 : vector<8x128xf32>
    %60 = vector.extract_strided_slice %24 {offsets = [0, 128], sizes = [8, 128], strides = [1, 1]} : vector<8x384xf32> to vector<8x128xf32>
    %61 = vector.extract_strided_slice %51 {offsets = [0, 128], sizes = [8, 128], strides = [1, 1]} : vector<8x384xf32> to vector<8x128xf32>
    %62 = arith.addf %60, %61 : vector<8x128xf32>
    %63 = arith.negf %62 : vector<8x128xf32>
    %64 = math.exp %63 : vector<8x128xf32>
    %cst_26 = arith.constant 1.000000e+00 : f32
    %65 = vector.broadcast %cst_26 : f32 to vector<8x128xf32>
    %66 = arith.addf %65, %64 : vector<8x128xf32>
    %67 = arith.divf %65, %66 : vector<8x128xf32>
    %68 = vector.extract_strided_slice %24 {offsets = [0, 256], sizes = [8, 128], strides = [1, 1]} : vector<8x384xf32> to vector<8x128xf32>
    %69 = vector.extract_strided_slice %51 {offsets = [0, 256], sizes = [8, 128], strides = [1, 1]} : vector<8x384xf32> to vector<8x128xf32>
    %70 = arith.addf %69, %16 : vector<8x128xf32>
    %71 = arith.mulf %59, %70 : vector<8x128xf32>
    %72 = arith.addf %68, %71 : vector<8x128xf32>
    %73 = math.tanh %72 : vector<8x128xf32>
    %74 = arith.subf %17, %73 : vector<8x128xf32>
    %75 = arith.mulf %67, %74 : vector<8x128xf32>
    %76 = arith.addf %73, %75 : vector<8x128xf32>
    %77 = arith.index_cast %c0_i32 : i32 to index
    %c0_27 = arith.constant 0 : index
    %c0_28 = arith.constant 0 : index
    %78 = vector.load %arg13[%77, %c0_27, %c0_28] : memref<8x8x256xf32, #tpu.memory_space<vmem>>, vector<1x8x128xf32>
    %79 = vector.shape_cast %78 : vector<1x8x128xf32> to vector<8x128xf32>
    %80 = vector.shape_cast %50 : vector<8x128xf32> to vector<1x8x128xf32>
    tpu.vector_store %arg13[%77, %c0_27, %c0_28], %80 {strides = array<i32>} : memref<8x8x256xf32, #tpu.memory_space<vmem>>, vector<1x8x128xf32>,
    %81 = arith.index_cast %18 : i32 to index
    %c0_29 = arith.constant 0 : index
    %c128 = arith.constant 128 : index
    %82 = vector.load %arg13[%81, %c0_29, %c128] : memref<8x8x256xf32, #tpu.memory_space<vmem>>, vector<1x8x128xf32>
    %83 = vector.shape_cast %82 : vector<1x8x128xf32> to vector<8x128xf32>
    %84 = vector.shape_cast %76 : vector<8x128xf32> to vector<1x8x128xf32>
    tpu.vector_store %arg13[%81, %c0_29, %c128], %84 {strides = array<i32>} : memref<8x8x256xf32, #tpu.memory_space<vmem>>, vector<1x8x128xf32>,
    %c1_i32 = arith.constant 1 : i32
    %c7_i32_30 = arith.constant 7 : i32
    %85 = arith.subi %c7_i32_30, %c1_i32 : i32
    %86 = arith.index_cast %c1_i32 : i32 to index
    %c0_31 = arith.constant 0 : index
    %c0_32 = arith.constant 0 : index
    %87 = vector.load %arg12[%86, %c0_31, %c0_32] : memref<8x8x768xf32, #tpu.memory_space<vmem>>, vector<1x8x384xf32>
    %88 = vector.shape_cast %87 : vector<1x8x384xf32> to vector<8x384xf32>
    %89 = arith.index_cast %85 : i32 to index
    %c0_33 = arith.constant 0 : index
    %c384_34 = arith.constant 384 : index
    %90 = vector.load %arg12[%89, %c0_33, %c384_34] : memref<8x8x768xf32, #tpu.memory_space<vmem>>, vector<1x8x384xf32>
    %91 = vector.shape_cast %90 : vector<1x8x384xf32> to vector<8x384xf32>
    %cst_35 = arith.constant dense<0.000000e+00> : vector<8x384xf32>
    %92 = tpu.matmul %50, %9, %cst_35 {dimension_numbers = #tpu.dot_dimension_numbers<[1], [0], [0], [1], [0, 0, 1, 1], [], []>} : vector<8x128xf32>, vector<128x384xf32>, vector<8x384xf32> -> vector<8x384xf32>
    %93 = vector.extract_strided_slice %88 {offsets = [0, 0], sizes = [8, 128], strides = [1, 1]} : vector<8x384xf32> to vector<8x128xf32>
    %94 = vector.extract_strided_slice %92 {offsets = [0, 0], sizes = [8, 128], strides = [1, 1]} : vector<8x384xf32> to vector<8x128xf32>
    %95 = arith.addf %93, %94 : vector<8x128xf32>
    %96 = arith.negf %95 : vector<8x128xf32>
    %97 = math.exp %96 : vector<8x128xf32>
    %cst_36 = arith.constant 1.000000e+00 : f32
    %98 = vector.broadcast %cst_36 : f32 to vector<8x128xf32>
    %99 = arith.addf %98, %97 : vector<8x128xf32>
    %100 = arith.divf %98, %99 : vector<8x128xf32>
    %101 = vector.extract_strided_slice %88 {offsets = [0, 128], sizes = [8, 128], strides = [1, 1]} : vector<8x384xf32> to vector<8x128xf32>
    %102 = vector.extract_strided_slice %92 {offsets = [0, 128], sizes = [8, 128], strides = [1, 1]} : vector<8x384xf32> to vector<8x128xf32>
    %103 = arith.addf %101, %102 : vector<8x128xf32>
    %104 = arith.negf %103 : vector<8x128xf32>
    %105 = math.exp %104 : vector<8x128xf32>
    %cst_37 = arith.constant 1.000000e+00 : f32
    %106 = vector.broadcast %cst_37 : f32 to vector<8x128xf32>
    %107 = arith.addf %106, %105 : vector<8x128xf32>
    %108 = arith.divf %106, %107 : vector<8x128xf32>
    %109 = vector.extract_strided_slice %88 {offsets = [0, 256], sizes = [8, 128], strides = [1, 1]} : vector<8x384xf32> to vector<8x128xf32>
    %110 = vector.extract_strided_slice %92 {offsets = [0, 256], sizes = [8, 128], strides = [1, 1]} : vector<8x384xf32> to vector<8x128xf32>
    %111 = arith.addf %110, %13 : vector<8x128xf32>
    %112 = arith.mulf %100, %111 : vector<8x128xf32>
    %113 = arith.addf %109, %112 : vector<8x128xf32>
    %114 = math.tanh %113 : vector<8x128xf32>
    %115 = arith.subf %50, %114 : vector<8x128xf32>
    %116 = arith.mulf %108, %115 : vector<8x128xf32>
    %117 = arith.addf %114, %116 : vector<8x128xf32>
    %cst_38 = arith.constant dense<0.000000e+00> : vector<8x384xf32>
    %118 = tpu.matmul %76, %10, %cst_38 {dimension_numbers = #tpu.dot_dimension_numbers<[1], [0], [0], [1], [0, 0, 1, 1], [], []>} : vector<8x128xf32>, vector<128x384xf32>, vector<8x384xf32> -> vector<8x384xf32>
    %119 = vector.extract_strided_slice %91 {offsets = [0, 0], sizes = [8, 128], strides = [1, 1]} : vector<8x384xf32> to vector<8x128xf32>
    %120 = vector.extract_strided_slice %118 {offsets = [0, 0], sizes = [8, 128], strides = [1, 1]} : vector<8x384xf32> to vector<8x128xf32>
    %121 = arith.addf %119, %120 : vector<8x128xf32>
    %122 = arith.negf %121 : vector<8x128xf32>
    %123 = math.exp %122 : vector<8x128xf32>
    %cst_39 = arith.constant 1.000000e+00 : f32
    %124 = vector.broadcast %cst_39 : f32 to vector<8x128xf32>
    %125 = arith.addf %124, %123 : vector<8x128xf32>
    %126 = arith.divf %124, %125 : vector<8x128xf32>
    %127 = vector.extract_strided_slice %91 {offsets = [0, 128], sizes = [8, 128], strides = [1, 1]} : vector<8x384xf32> to vector<8x128xf32>
    %128 = vector.extract_strided_slice %118 {offsets = [0, 128], sizes = [8, 128], strides = [1, 1]} : vector<8x384xf32> to vector<8x128xf32>
    %129 = arith.addf %127, %128 : vector<8x128xf32>
    %130 = arith.negf %129 : vector<8x128xf32>
    %131 = math.exp %130 : vector<8x128xf32>
    %cst_40 = arith.constant 1.000000e+00 : f32
    %132 = vector.broadcast %cst_40 : f32 to vector<8x128xf32>
    %133 = arith.addf %132, %131 : vector<8x128xf32>
    %134 = arith.divf %132, %133 : vector<8x128xf32>
    %135 = vector.extract_strided_slice %91 {offsets = [0, 256], sizes = [8, 128], strides = [1, 1]} : vector<8x384xf32> to vector<8x128xf32>
    %136 = vector.extract_strided_slice %118 {offsets = [0, 256], sizes = [8, 128], strides = [1, 1]} : vector<8x384xf32> to vector<8x128xf32>
    %137 = arith.addf %136, %16 : vector<8x128xf32>
    %138 = arith.mulf %126, %137 : vector<8x128xf32>
    %139 = arith.addf %135, %138 : vector<8x128xf32>
    %140 = math.tanh %139 : vector<8x128xf32>
    %141 = arith.subf %76, %140 : vector<8x128xf32>
    %142 = arith.mulf %134, %141 : vector<8x128xf32>
    %143 = arith.addf %140, %142 : vector<8x128xf32>
    %144 = arith.index_cast %c1_i32 : i32 to index
    %c0_41 = arith.constant 0 : index
    %c0_42 = arith.constant 0 : index
    %145 = vector.load %arg13[%144, %c0_41, %c0_42] : memref<8x8x256xf32, #tpu.memory_space<vmem>>, vector<1x8x128xf32>
    %146 = vector.shape_cast %145 : vector<1x8x128xf32> to vector<8x128xf32>
    %147 = vector.shape_cast %117 : vector<8x128xf32> to vector<1x8x128xf32>
    tpu.vector_store %arg13[%144, %c0_41, %c0_42], %147 {strides = array<i32>} : memref<8x8x256xf32, #tpu.memory_space<vmem>>, vector<1x8x128xf32>,
    %148 = arith.index_cast %85 : i32 to index
    %c0_43 = arith.constant 0 : index
    %c128_44 = arith.constant 128 : index
    %149 = vector.load %arg13[%148, %c0_43, %c128_44] : memref<8x8x256xf32, #tpu.memory_space<vmem>>, vector<1x8x128xf32>
    %150 = vector.shape_cast %149 : vector<1x8x128xf32> to vector<8x128xf32>
    %151 = vector.shape_cast %143 : vector<8x128xf32> to vector<1x8x128xf32>
    tpu.vector_store %arg13[%148, %c0_43, %c128_44], %151 {strides = array<i32>} : memref<8x8x256xf32, #tpu.memory_space<vmem>>, vector<1x8x128xf32>,
    %c2_i32 = arith.constant 2 : i32
    %c7_i32_45 = arith.constant 7 : i32
    %152 = arith.subi %c7_i32_45, %c2_i32 : i32
    %153 = arith.index_cast %c2_i32 : i32 to index
    %c0_46 = arith.constant 0 : index
    %c0_47 = arith.constant 0 : index
    %154 = vector.load %arg12[%153, %c0_46, %c0_47] : memref<8x8x768xf32, #tpu.memory_space<vmem>>, vector<1x8x384xf32>
    %155 = vector.shape_cast %154 : vector<1x8x384xf32> to vector<8x384xf32>
    %156 = arith.index_cast %152 : i32 to index
    %c0_48 = arith.constant 0 : index
    %c384_49 = arith.constant 384 : index
    %157 = vector.load %arg12[%156, %c0_48, %c384_49] : memref<8x8x768xf32, #tpu.memory_space<vmem>>, vector<1x8x384xf32>
    %158 = vector.shape_cast %157 : vector<1x8x384xf32> to vector<8x384xf32>
    %cst_50 = arith.constant dense<0.000000e+00> : vector<8x384xf32>
    %159 = tpu.matmul %117, %9, %cst_50 {dimension_numbers = #tpu.dot_dimension_numbers<[1], [0], [0], [1], [0, 0, 1, 1], [], []>} : vector<8x128xf32>, vector<128x384xf32>, vector<8x384xf32> -> vector<8x384xf32>
    %160 = vector.extract_strided_slice %155 {offsets = [0, 0], sizes = [8, 128], strides = [1, 1]} : vector<8x384xf32> to vector<8x128xf32>
    %161 = vector.extract_strided_slice %159 {offsets = [0, 0], sizes = [8, 128], strides = [1, 1]} : vector<8x384xf32> to vector<8x128xf32>
    %162 = arith.addf %160, %161 : vector<8x128xf32>
    %163 = arith.negf %162 : vector<8x128xf32>
    %164 = math.exp %163 : vector<8x128xf32>
    %cst_51 = arith.constant 1.000000e+00 : f32
    %165 = vector.broadcast %cst_51 : f32 to vector<8x128xf32>
    %166 = arith.addf %165, %164 : vector<8x128xf32>
    %167 = arith.divf %165, %166 : vector<8x128xf32>
    %168 = vector.extract_strided_slice %155 {offsets = [0, 128], sizes = [8, 128], strides = [1, 1]} : vector<8x384xf32> to vector<8x128xf32>
    %169 = vector.extract_strided_slice %159 {offsets = [0, 128], sizes = [8, 128], strides = [1, 1]} : vector<8x384xf32> to vector<8x128xf32>
    %170 = arith.addf %168, %169 : vector<8x128xf32>
    %171 = arith.negf %170 : vector<8x128xf32>
    %172 = math.exp %171 : vector<8x128xf32>
    %cst_52 = arith.constant 1.000000e+00 : f32
    %173 = vector.broadcast %cst_52 : f32 to vector<8x128xf32>
    %174 = arith.addf %173, %172 : vector<8x128xf32>
    %175 = arith.divf %173, %174 : vector<8x128xf32>
    %176 = vector.extract_strided_slice %155 {offsets = [0, 256], sizes = [8, 128], strides = [1, 1]} : vector<8x384xf32> to vector<8x128xf32>
    %177 = vector.extract_strided_slice %159 {offsets = [0, 256], sizes = [8, 128], strides = [1, 1]} : vector<8x384xf32> to vector<8x128xf32>
    %178 = arith.addf %177, %13 : vector<8x128xf32>
    %179 = arith.mulf %167, %178 : vector<8x128xf32>
    %180 = arith.addf %176, %179 : vector<8x128xf32>
    %181 = math.tanh %180 : vector<8x128xf32>
    %182 = arith.subf %117, %181 : vector<8x128xf32>
    %183 = arith.mulf %175, %182 : vector<8x128xf32>
    %184 = arith.addf %181, %183 : vector<8x128xf32>
    %cst_53 = arith.constant dense<0.000000e+00> : vector<8x384xf32>
    %185 = tpu.matmul %143, %10, %cst_53 {dimension_numbers = #tpu.dot_dimension_numbers<[1], [0], [0], [1], [0, 0, 1, 1], [], []>} : vector<8x128xf32>, vector<128x384xf32>, vector<8x384xf32> -> vector<8x384xf32>
    %186 = vector.extract_strided_slice %158 {offsets = [0, 0], sizes = [8, 128], strides = [1, 1]} : vector<8x384xf32> to vector<8x128xf32>
    %187 = vector.extract_strided_slice %185 {offsets = [0, 0], sizes = [8, 128], strides = [1, 1]} : vector<8x384xf32> to vector<8x128xf32>
    %188 = arith.addf %186, %187 : vector<8x128xf32>
    %189 = arith.negf %188 : vector<8x128xf32>
    %190 = math.exp %189 : vector<8x128xf32>
    %cst_54 = arith.constant 1.000000e+00 : f32
    %191 = vector.broadcast %cst_54 : f32 to vector<8x128xf32>
    %192 = arith.addf %191, %190 : vector<8x128xf32>
    %193 = arith.divf %191, %192 : vector<8x128xf32>
    %194 = vector.extract_strided_slice %158 {offsets = [0, 128], sizes = [8, 128], strides = [1, 1]} : vector<8x384xf32> to vector<8x128xf32>
    %195 = vector.extract_strided_slice %185 {offsets = [0, 128], sizes = [8, 128], strides = [1, 1]} : vector<8x384xf32> to vector<8x128xf32>
    %196 = arith.addf %194, %195 : vector<8x128xf32>
    %197 = arith.negf %196 : vector<8x128xf32>
    %198 = math.exp %197 : vector<8x128xf32>
    %cst_55 = arith.constant 1.000000e+00 : f32
    %199 = vector.broadcast %cst_55 : f32 to vector<8x128xf32>
    %200 = arith.addf %199, %198 : vector<8x128xf32>
    %201 = arith.divf %199, %200 : vector<8x128xf32>
    %202 = vector.extract_strided_slice %158 {offsets = [0, 256], sizes = [8, 128], strides = [1, 1]} : vector<8x384xf32> to vector<8x128xf32>
    %203 = vector.extract_strided_slice %185 {offsets = [0, 256], sizes = [8, 128], strides = [1, 1]} : vector<8x384xf32> to vector<8x128xf32>
    %204 = arith.addf %203, %16 : vector<8x128xf32>
    %205 = arith.mulf %193, %204 : vector<8x128xf32>
    %206 = arith.addf %202, %205 : vector<8x128xf32>
    %207 = math.tanh %206 : vector<8x128xf32>
    %208 = arith.subf %143, %207 : vector<8x128xf32>
    %209 = arith.mulf %201, %208 : vector<8x128xf32>
    %210 = arith.addf %207, %209 : vector<8x128xf32>
    %211 = arith.index_cast %c2_i32 : i32 to index
    %c0_56 = arith.constant 0 : index
    %c0_57 = arith.constant 0 : index
    %212 = vector.load %arg13[%211, %c0_56, %c0_57] : memref<8x8x256xf32, #tpu.memory_space<vmem>>, vector<1x8x128xf32>
    %213 = vector.shape_cast %212 : vector<1x8x128xf32> to vector<8x128xf32>
    %214 = vector.shape_cast %184 : vector<8x128xf32> to vector<1x8x128xf32>
    tpu.vector_store %arg13[%211, %c0_56, %c0_57], %214 {strides = array<i32>} : memref<8x8x256xf32, #tpu.memory_space<vmem>>, vector<1x8x128xf32>,
    %215 = arith.index_cast %152 : i32 to index
    %c0_58 = arith.constant 0 : index
    %c128_59 = arith.constant 128 : index
    %216 = vector.load %arg13[%215, %c0_58, %c128_59] : memref<8x8x256xf32, #tpu.memory_space<vmem>>, vector<1x8x128xf32>
    %217 = vector.shape_cast %216 : vector<1x8x128xf32> to vector<8x128xf32>
    %218 = vector.shape_cast %210 : vector<8x128xf32> to vector<1x8x128xf32>
    tpu.vector_store %arg13[%215, %c0_58, %c128_59], %218 {strides = array<i32>} : memref<8x8x256xf32, #tpu.memory_space<vmem>>, vector<1x8x128xf32>,
    %c3_i32 = arith.constant 3 : i32
    %c7_i32_60 = arith.constant 7 : i32
    %219 = arith.subi %c7_i32_60, %c3_i32 : i32
    %220 = arith.index_cast %c3_i32 : i32 to index
    %c0_61 = arith.constant 0 : index
    %c0_62 = arith.constant 0 : index
    %221 = vector.load %arg12[%220, %c0_61, %c0_62] : memref<8x8x768xf32, #tpu.memory_space<vmem>>, vector<1x8x384xf32>
    %222 = vector.shape_cast %221 : vector<1x8x384xf32> to vector<8x384xf32>
    %223 = arith.index_cast %219 : i32 to index
    %c0_63 = arith.constant 0 : index
    %c384_64 = arith.constant 384 : index
    %224 = vector.load %arg12[%223, %c0_63, %c384_64] : memref<8x8x768xf32, #tpu.memory_space<vmem>>, vector<1x8x384xf32>
    %225 = vector.shape_cast %224 : vector<1x8x384xf32> to vector<8x384xf32>
    %cst_65 = arith.constant dense<0.000000e+00> : vector<8x384xf32>
    %226 = tpu.matmul %184, %9, %cst_65 {dimension_numbers = #tpu.dot_dimension_numbers<[1], [0], [0], [1], [0, 0, 1, 1], [], []>} : vector<8x128xf32>, vector<128x384xf32>, vector<8x384xf32> -> vector<8x384xf32>
    %227 = vector.extract_strided_slice %222 {offsets = [0, 0], sizes = [8, 128], strides = [1, 1]} : vector<8x384xf32> to vector<8x128xf32>
    %228 = vector.extract_strided_slice %226 {offsets = [0, 0], sizes = [8, 128], strides = [1, 1]} : vector<8x384xf32> to vector<8x128xf32>
    %229 = arith.addf %227, %228 : vector<8x128xf32>
    %230 = arith.negf %229 : vector<8x128xf32>
    %231 = math.exp %230 : vector<8x128xf32>
    %cst_66 = arith.constant 1.000000e+00 : f32
    %232 = vector.broadcast %cst_66 : f32 to vector<8x128xf32>
    %233 = arith.addf %232, %231 : vector<8x128xf32>
    %234 = arith.divf %232, %233 : vector<8x128xf32>
    %235 = vector.extract_strided_slice %222 {offsets = [0, 128], sizes = [8, 128], strides = [1, 1]} : vector<8x384xf32> to vector<8x128xf32>
    %236 = vector.extract_strided_slice %226 {offsets = [0, 128], sizes = [8, 128], strides = [1, 1]} : vector<8x384xf32> to vector<8x128xf32>
    %237 = arith.addf %235, %236 : vector<8x128xf32>
    %238 = arith.negf %237 : vector<8x128xf32>
    %239 = math.exp %238 : vector<8x128xf32>
    %cst_67 = arith.constant 1.000000e+00 : f32
    %240 = vector.broadcast %cst_67 : f32 to vector<8x128xf32>
    %241 = arith.addf %240, %239 : vector<8x128xf32>
    %242 = arith.divf %240, %241 : vector<8x128xf32>
    %243 = vector.extract_strided_slice %222 {offsets = [0, 256], sizes = [8, 128], strides = [1, 1]} : vector<8x384xf32> to vector<8x128xf32>
    %244 = vector.extract_strided_slice %226 {offsets = [0, 256], sizes = [8, 128], strides = [1, 1]} : vector<8x384xf32> to vector<8x128xf32>
    %245 = arith.addf %244, %13 : vector<8x128xf32>
    %246 = arith.mulf %234, %245 : vector<8x128xf32>
    %247 = arith.addf %243, %246 : vector<8x128xf32>
    %248 = math.tanh %247 : vector<8x128xf32>
    %249 = arith.subf %184, %248 : vector<8x128xf32>
    %250 = arith.mulf %242, %249 : vector<8x128xf32>
    %251 = arith.addf %248, %250 : vector<8x128xf32>
    %cst_68 = arith.constant dense<0.000000e+00> : vector<8x384xf32>
    %252 = tpu.matmul %210, %10, %cst_68 {dimension_numbers = #tpu.dot_dimension_numbers<[1], [0], [0], [1], [0, 0, 1, 1], [], []>} : vector<8x128xf32>, vector<128x384xf32>, vector<8x384xf32> -> vector<8x384xf32>
    %253 = vector.extract_strided_slice %225 {offsets = [0, 0], sizes = [8, 128], strides = [1, 1]} : vector<8x384xf32> to vector<8x128xf32>
    %254 = vector.extract_strided_slice %252 {offsets = [0, 0], sizes = [8, 128], strides = [1, 1]} : vector<8x384xf32> to vector<8x128xf32>
    %255 = arith.addf %253, %254 : vector<8x128xf32>
    %256 = arith.negf %255 : vector<8x128xf32>
    %257 = math.exp %256 : vector<8x128xf32>
    %cst_69 = arith.constant 1.000000e+00 : f32
    %258 = vector.broadcast %cst_69 : f32 to vector<8x128xf32>
    %259 = arith.addf %258, %257 : vector<8x128xf32>
    %260 = arith.divf %258, %259 : vector<8x128xf32>
    %261 = vector.extract_strided_slice %225 {offsets = [0, 128], sizes = [8, 128], strides = [1, 1]} : vector<8x384xf32> to vector<8x128xf32>
    %262 = vector.extract_strided_slice %252 {offsets = [0, 128], sizes = [8, 128], strides = [1, 1]} : vector<8x384xf32> to vector<8x128xf32>
    %263 = arith.addf %261, %262 : vector<8x128xf32>
    %264 = arith.negf %263 : vector<8x128xf32>
    %265 = math.exp %264 : vector<8x128xf32>
    %cst_70 = arith.constant 1.000000e+00 : f32
    %266 = vector.broadcast %cst_70 : f32 to vector<8x128xf32>
    %267 = arith.addf %266, %265 : vector<8x128xf32>
    %268 = arith.divf %266, %267 : vector<8x128xf32>
    %269 = vector.extract_strided_slice %225 {offsets = [0, 256], sizes = [8, 128], strides = [1, 1]} : vector<8x384xf32> to vector<8x128xf32>
    %270 = vector.extract_strided_slice %252 {offsets = [0, 256], sizes = [8, 128], strides = [1, 1]} : vector<8x384xf32> to vector<8x128xf32>
    %271 = arith.addf %270, %16 : vector<8x128xf32>
    %272 = arith.mulf %260, %271 : vector<8x128xf32>
    %273 = arith.addf %269, %272 : vector<8x128xf32>
    %274 = math.tanh %273 : vector<8x128xf32>
    %275 = arith.subf %210, %274 : vector<8x128xf32>
    %276 = arith.mulf %268, %275 : vector<8x128xf32>
    %277 = arith.addf %274, %276 : vector<8x128xf32>
    %278 = arith.index_cast %c3_i32 : i32 to index
    %c0_71 = arith.constant 0 : index
    %c0_72 = arith.constant 0 : index
    %279 = vector.load %arg13[%278, %c0_71, %c0_72] : memref<8x8x256xf32, #tpu.memory_space<vmem>>, vector<1x8x128xf32>
    %280 = vector.shape_cast %279 : vector<1x8x128xf32> to vector<8x128xf32>
    %281 = vector.shape_cast %251 : vector<8x128xf32> to vector<1x8x128xf32>
    tpu.vector_store %arg13[%278, %c0_71, %c0_72], %281 {strides = array<i32>} : memref<8x8x256xf32, #tpu.memory_space<vmem>>, vector<1x8x128xf32>,
    %282 = arith.index_cast %219 : i32 to index
    %c0_73 = arith.constant 0 : index
    %c128_74 = arith.constant 128 : index
    %283 = vector.load %arg13[%282, %c0_73, %c128_74] : memref<8x8x256xf32, #tpu.memory_space<vmem>>, vector<1x8x128xf32>
    %284 = vector.shape_cast %283 : vector<1x8x128xf32> to vector<8x128xf32>
    %285 = vector.shape_cast %277 : vector<8x128xf32> to vector<1x8x128xf32>
    tpu.vector_store %arg13[%282, %c0_73, %c128_74], %285 {strides = array<i32>} : memref<8x8x256xf32, #tpu.memory_space<vmem>>, vector<1x8x128xf32>,
    %c4_i32 = arith.constant 4 : i32
    %c7_i32_75 = arith.constant 7 : i32
    %286 = arith.subi %c7_i32_75, %c4_i32 : i32
    %287 = arith.index_cast %c4_i32 : i32 to index
    %c0_76 = arith.constant 0 : index
    %c0_77 = arith.constant 0 : index
    %288 = vector.load %arg12[%287, %c0_76, %c0_77] : memref<8x8x768xf32, #tpu.memory_space<vmem>>, vector<1x8x384xf32>
    %289 = vector.shape_cast %288 : vector<1x8x384xf32> to vector<8x384xf32>
    %290 = arith.index_cast %286 : i32 to index
    %c0_78 = arith.constant 0 : index
    %c384_79 = arith.constant 384 : index
    %291 = vector.load %arg12[%290, %c0_78, %c384_79] : memref<8x8x768xf32, #tpu.memory_space<vmem>>, vector<1x8x384xf32>
    %292 = vector.shape_cast %291 : vector<1x8x384xf32> to vector<8x384xf32>
    %cst_80 = arith.constant dense<0.000000e+00> : vector<8x384xf32>
    %293 = tpu.matmul %251, %9, %cst_80 {dimension_numbers = #tpu.dot_dimension_numbers<[1], [0], [0], [1], [0, 0, 1, 1], [], []>} : vector<8x128xf32>, vector<128x384xf32>, vector<8x384xf32> -> vector<8x384xf32>
    %294 = vector.extract_strided_slice %289 {offsets = [0, 0], sizes = [8, 128], strides = [1, 1]} : vector<8x384xf32> to vector<8x128xf32>
    %295 = vector.extract_strided_slice %293 {offsets = [0, 0], sizes = [8, 128], strides = [1, 1]} : vector<8x384xf32> to vector<8x128xf32>
    %296 = arith.addf %294, %295 : vector<8x128xf32>
    %297 = arith.negf %296 : vector<8x128xf32>
    %298 = math.exp %297 : vector<8x128xf32>
    %cst_81 = arith.constant 1.000000e+00 : f32
    %299 = vector.broadcast %cst_81 : f32 to vector<8x128xf32>
    %300 = arith.addf %299, %298 : vector<8x128xf32>
    %301 = arith.divf %299, %300 : vector<8x128xf32>
    %302 = vector.extract_strided_slice %289 {offsets = [0, 128], sizes = [8, 128], strides = [1, 1]} : vector<8x384xf32> to vector<8x128xf32>
    %303 = vector.extract_strided_slice %293 {offsets = [0, 128], sizes = [8, 128], strides = [1, 1]} : vector<8x384xf32> to vector<8x128xf32>
    %304 = arith.addf %302, %303 : vector<8x128xf32>
    %305 = arith.negf %304 : vector<8x128xf32>
    %306 = math.exp %305 : vector<8x128xf32>
    %cst_82 = arith.constant 1.000000e+00 : f32
    %307 = vector.broadcast %cst_82 : f32 to vector<8x128xf32>
    %308 = arith.addf %307, %306 : vector<8x128xf32>
    %309 = arith.divf %307, %308 : vector<8x128xf32>
    %310 = vector.extract_strided_slice %289 {offsets = [0, 256], sizes = [8, 128], strides = [1, 1]} : vector<8x384xf32> to vector<8x128xf32>
    %311 = vector.extract_strided_slice %293 {offsets = [0, 256], sizes = [8, 128], strides = [1, 1]} : vector<8x384xf32> to vector<8x128xf32>
    %312 = arith.addf %311, %13 : vector<8x128xf32>
    %313 = arith.mulf %301, %312 : vector<8x128xf32>
    %314 = arith.addf %310, %313 : vector<8x128xf32>
    %315 = math.tanh %314 : vector<8x128xf32>
    %316 = arith.subf %251, %315 : vector<8x128xf32>
    %317 = arith.mulf %309, %316 : vector<8x128xf32>
    %318 = arith.addf %315, %317 : vector<8x128xf32>
    %cst_83 = arith.constant dense<0.000000e+00> : vector<8x384xf32>
    %319 = tpu.matmul %277, %10, %cst_83 {dimension_numbers = #tpu.dot_dimension_numbers<[1], [0], [0], [1], [0, 0, 1, 1], [], []>} : vector<8x128xf32>, vector<128x384xf32>, vector<8x384xf32> -> vector<8x384xf32>
    %320 = vector.extract_strided_slice %292 {offsets = [0, 0], sizes = [8, 128], strides = [1, 1]} : vector<8x384xf32> to vector<8x128xf32>
    %321 = vector.extract_strided_slice %319 {offsets = [0, 0], sizes = [8, 128], strides = [1, 1]} : vector<8x384xf32> to vector<8x128xf32>
    %322 = arith.addf %320, %321 : vector<8x128xf32>
    %323 = arith.negf %322 : vector<8x128xf32>
    %324 = math.exp %323 : vector<8x128xf32>
    %cst_84 = arith.constant 1.000000e+00 : f32
    %325 = vector.broadcast %cst_84 : f32 to vector<8x128xf32>
    %326 = arith.addf %325, %324 : vector<8x128xf32>
    %327 = arith.divf %325, %326 : vector<8x128xf32>
    %328 = vector.extract_strided_slice %292 {offsets = [0, 128], sizes = [8, 128], strides = [1, 1]} : vector<8x384xf32> to vector<8x128xf32>
    %329 = vector.extract_strided_slice %319 {offsets = [0, 128], sizes = [8, 128], strides = [1, 1]} : vector<8x384xf32> to vector<8x128xf32>
    %330 = arith.addf %328, %329 : vector<8x128xf32>
    %331 = arith.negf %330 : vector<8x128xf32>
    %332 = math.exp %331 : vector<8x128xf32>
    %cst_85 = arith.constant 1.000000e+00 : f32
    %333 = vector.broadcast %cst_85 : f32 to vector<8x128xf32>
    %334 = arith.addf %333, %332 : vector<8x128xf32>
    %335 = arith.divf %333, %334 : vector<8x128xf32>
    %336 = vector.extract_strided_slice %292 {offsets = [0, 256], sizes = [8, 128], strides = [1, 1]} : vector<8x384xf32> to vector<8x128xf32>
    %337 = vector.extract_strided_slice %319 {offsets = [0, 256], sizes = [8, 128], strides = [1, 1]} : vector<8x384xf32> to vector<8x128xf32>
    %338 = arith.addf %337, %16 : vector<8x128xf32>
    %339 = arith.mulf %327, %338 : vector<8x128xf32>
    %340 = arith.addf %336, %339 : vector<8x128xf32>
    %341 = math.tanh %340 : vector<8x128xf32>
    %342 = arith.subf %277, %341 : vector<8x128xf32>
    %343 = arith.mulf %335, %342 : vector<8x128xf32>
    %344 = arith.addf %341, %343 : vector<8x128xf32>
    %345 = arith.index_cast %c4_i32 : i32 to index
    %c0_86 = arith.constant 0 : index
    %c0_87 = arith.constant 0 : index
    %346 = vector.load %arg13[%345, %c0_86, %c0_87] : memref<8x8x256xf32, #tpu.memory_space<vmem>>, vector<1x8x128xf32>
    %347 = vector.shape_cast %346 : vector<1x8x128xf32> to vector<8x128xf32>
    %348 = vector.shape_cast %318 : vector<8x128xf32> to vector<1x8x128xf32>
    tpu.vector_store %arg13[%345, %c0_86, %c0_87], %348 {strides = array<i32>} : memref<8x8x256xf32, #tpu.memory_space<vmem>>, vector<1x8x128xf32>,
    %349 = arith.index_cast %286 : i32 to index
    %c0_88 = arith.constant 0 : index
    %c128_89 = arith.constant 128 : index
    %350 = vector.load %arg13[%349, %c0_88, %c128_89] : memref<8x8x256xf32, #tpu.memory_space<vmem>>, vector<1x8x128xf32>
    %351 = vector.shape_cast %350 : vector<1x8x128xf32> to vector<8x128xf32>
    %352 = vector.shape_cast %344 : vector<8x128xf32> to vector<1x8x128xf32>
    tpu.vector_store %arg13[%349, %c0_88, %c128_89], %352 {strides = array<i32>} : memref<8x8x256xf32, #tpu.memory_space<vmem>>, vector<1x8x128xf32>,
    %c5_i32 = arith.constant 5 : i32
    %c7_i32_90 = arith.constant 7 : i32
    %353 = arith.subi %c7_i32_90, %c5_i32 : i32
    %354 = arith.index_cast %c5_i32 : i32 to index
    %c0_91 = arith.constant 0 : index
    %c0_92 = arith.constant 0 : index
    %355 = vector.load %arg12[%354, %c0_91, %c0_92] : memref<8x8x768xf32, #tpu.memory_space<vmem>>, vector<1x8x384xf32>
    %356 = vector.shape_cast %355 : vector<1x8x384xf32> to vector<8x384xf32>
    %357 = arith.index_cast %353 : i32 to index
    %c0_93 = arith.constant 0 : index
    %c384_94 = arith.constant 384 : index
    %358 = vector.load %arg12[%357, %c0_93, %c384_94] : memref<8x8x768xf32, #tpu.memory_space<vmem>>, vector<1x8x384xf32>
    %359 = vector.shape_cast %358 : vector<1x8x384xf32> to vector<8x384xf32>
    %cst_95 = arith.constant dense<0.000000e+00> : vector<8x384xf32>
    %360 = tpu.matmul %318, %9, %cst_95 {dimension_numbers = #tpu.dot_dimension_numbers<[1], [0], [0], [1], [0, 0, 1, 1], [], []>} : vector<8x128xf32>, vector<128x384xf32>, vector<8x384xf32> -> vector<8x384xf32>
    %361 = vector.extract_strided_slice %356 {offsets = [0, 0], sizes = [8, 128], strides = [1, 1]} : vector<8x384xf32> to vector<8x128xf32>
    %362 = vector.extract_strided_slice %360 {offsets = [0, 0], sizes = [8, 128], strides = [1, 1]} : vector<8x384xf32> to vector<8x128xf32>
    %363 = arith.addf %361, %362 : vector<8x128xf32>
    %364 = arith.negf %363 : vector<8x128xf32>
    %365 = math.exp %364 : vector<8x128xf32>
    %cst_96 = arith.constant 1.000000e+00 : f32
    %366 = vector.broadcast %cst_96 : f32 to vector<8x128xf32>
    %367 = arith.addf %366, %365 : vector<8x128xf32>
    %368 = arith.divf %366, %367 : vector<8x128xf32>
    %369 = vector.extract_strided_slice %356 {offsets = [0, 128], sizes = [8, 128], strides = [1, 1]} : vector<8x384xf32> to vector<8x128xf32>
    %370 = vector.extract_strided_slice %360 {offsets = [0, 128], sizes = [8, 128], strides = [1, 1]} : vector<8x384xf32> to vector<8x128xf32>
    %371 = arith.addf %369, %370 : vector<8x128xf32>
    %372 = arith.negf %371 : vector<8x128xf32>
    %373 = math.exp %372 : vector<8x128xf32>
    %cst_97 = arith.constant 1.000000e+00 : f32
    %374 = vector.broadcast %cst_97 : f32 to vector<8x128xf32>
    %375 = arith.addf %374, %373 : vector<8x128xf32>
    %376 = arith.divf %374, %375 : vector<8x128xf32>
    %377 = vector.extract_strided_slice %356 {offsets = [0, 256], sizes = [8, 128], strides = [1, 1]} : vector<8x384xf32> to vector<8x128xf32>
    %378 = vector.extract_strided_slice %360 {offsets = [0, 256], sizes = [8, 128], strides = [1, 1]} : vector<8x384xf32> to vector<8x128xf32>
    %379 = arith.addf %378, %13 : vector<8x128xf32>
    %380 = arith.mulf %368, %379 : vector<8x128xf32>
    %381 = arith.addf %377, %380 : vector<8x128xf32>
    %382 = math.tanh %381 : vector<8x128xf32>
    %383 = arith.subf %318, %382 : vector<8x128xf32>
    %384 = arith.mulf %376, %383 : vector<8x128xf32>
    %385 = arith.addf %382, %384 : vector<8x128xf32>
    %cst_98 = arith.constant dense<0.000000e+00> : vector<8x384xf32>
    %386 = tpu.matmul %344, %10, %cst_98 {dimension_numbers = #tpu.dot_dimension_numbers<[1], [0], [0], [1], [0, 0, 1, 1], [], []>} : vector<8x128xf32>, vector<128x384xf32>, vector<8x384xf32> -> vector<8x384xf32>
    %387 = vector.extract_strided_slice %359 {offsets = [0, 0], sizes = [8, 128], strides = [1, 1]} : vector<8x384xf32> to vector<8x128xf32>
    %388 = vector.extract_strided_slice %386 {offsets = [0, 0], sizes = [8, 128], strides = [1, 1]} : vector<8x384xf32> to vector<8x128xf32>
    %389 = arith.addf %387, %388 : vector<8x128xf32>
    %390 = arith.negf %389 : vector<8x128xf32>
    %391 = math.exp %390 : vector<8x128xf32>
    %cst_99 = arith.constant 1.000000e+00 : f32
    %392 = vector.broadcast %cst_99 : f32 to vector<8x128xf32>
    %393 = arith.addf %392, %391 : vector<8x128xf32>
    %394 = arith.divf %392, %393 : vector<8x128xf32>
    %395 = vector.extract_strided_slice %359 {offsets = [0, 128], sizes = [8, 128], strides = [1, 1]} : vector<8x384xf32> to vector<8x128xf32>
    %396 = vector.extract_strided_slice %386 {offsets = [0, 128], sizes = [8, 128], strides = [1, 1]} : vector<8x384xf32> to vector<8x128xf32>
    %397 = arith.addf %395, %396 : vector<8x128xf32>
    %398 = arith.negf %397 : vector<8x128xf32>
    %399 = math.exp %398 : vector<8x128xf32>
    %cst_100 = arith.constant 1.000000e+00 : f32
    %400 = vector.broadcast %cst_100 : f32 to vector<8x128xf32>
    %401 = arith.addf %400, %399 : vector<8x128xf32>
    %402 = arith.divf %400, %401 : vector<8x128xf32>
    %403 = vector.extract_strided_slice %359 {offsets = [0, 256], sizes = [8, 128], strides = [1, 1]} : vector<8x384xf32> to vector<8x128xf32>
    %404 = vector.extract_strided_slice %386 {offsets = [0, 256], sizes = [8, 128], strides = [1, 1]} : vector<8x384xf32> to vector<8x128xf32>
    %405 = arith.addf %404, %16 : vector<8x128xf32>
    %406 = arith.mulf %394, %405 : vector<8x128xf32>
    %407 = arith.addf %403, %406 : vector<8x128xf32>
    %408 = math.tanh %407 : vector<8x128xf32>
    %409 = arith.subf %344, %408 : vector<8x128xf32>
    %410 = arith.mulf %402, %409 : vector<8x128xf32>
    %411 = arith.addf %408, %410 : vector<8x128xf32>
    %412 = arith.index_cast %c5_i32 : i32 to index
    %c0_101 = arith.constant 0 : index
    %c0_102 = arith.constant 0 : index
    %413 = vector.load %arg13[%412, %c0_101, %c0_102] : memref<8x8x256xf32, #tpu.memory_space<vmem>>, vector<1x8x128xf32>
    %414 = vector.shape_cast %413 : vector<1x8x128xf32> to vector<8x128xf32>
    %415 = vector.shape_cast %385 : vector<8x128xf32> to vector<1x8x128xf32>
    tpu.vector_store %arg13[%412, %c0_101, %c0_102], %415 {strides = array<i32>} : memref<8x8x256xf32, #tpu.memory_space<vmem>>, vector<1x8x128xf32>,
    %416 = arith.index_cast %353 : i32 to index
    %c0_103 = arith.constant 0 : index
    %c128_104 = arith.constant 128 : index
    %417 = vector.load %arg13[%416, %c0_103, %c128_104] : memref<8x8x256xf32, #tpu.memory_space<vmem>>, vector<1x8x128xf32>
    %418 = vector.shape_cast %417 : vector<1x8x128xf32> to vector<8x128xf32>
    %419 = vector.shape_cast %411 : vector<8x128xf32> to vector<1x8x128xf32>
    tpu.vector_store %arg13[%416, %c0_103, %c128_104], %419 {strides = array<i32>} : memref<8x8x256xf32, #tpu.memory_space<vmem>>, vector<1x8x128xf32>,
    %c6_i32 = arith.constant 6 : i32
    %c7_i32_105 = arith.constant 7 : i32
    %420 = arith.subi %c7_i32_105, %c6_i32 : i32
    %421 = arith.index_cast %c6_i32 : i32 to index
    %c0_106 = arith.constant 0 : index
    %c0_107 = arith.constant 0 : index
    %422 = vector.load %arg12[%421, %c0_106, %c0_107] : memref<8x8x768xf32, #tpu.memory_space<vmem>>, vector<1x8x384xf32>
    %423 = vector.shape_cast %422 : vector<1x8x384xf32> to vector<8x384xf32>
    %424 = arith.index_cast %420 : i32 to index
    %c0_108 = arith.constant 0 : index
    %c384_109 = arith.constant 384 : index
    %425 = vector.load %arg12[%424, %c0_108, %c384_109] : memref<8x8x768xf32, #tpu.memory_space<vmem>>, vector<1x8x384xf32>
    %426 = vector.shape_cast %425 : vector<1x8x384xf32> to vector<8x384xf32>
    %cst_110 = arith.constant dense<0.000000e+00> : vector<8x384xf32>
    %427 = tpu.matmul %385, %9, %cst_110 {dimension_numbers = #tpu.dot_dimension_numbers<[1], [0], [0], [1], [0, 0, 1, 1], [], []>} : vector<8x128xf32>, vector<128x384xf32>, vector<8x384xf32> -> vector<8x384xf32>
    %428 = vector.extract_strided_slice %423 {offsets = [0, 0], sizes = [8, 128], strides = [1, 1]} : vector<8x384xf32> to vector<8x128xf32>
    %429 = vector.extract_strided_slice %427 {offsets = [0, 0], sizes = [8, 128], strides = [1, 1]} : vector<8x384xf32> to vector<8x128xf32>
    %430 = arith.addf %428, %429 : vector<8x128xf32>
    %431 = arith.negf %430 : vector<8x128xf32>
    %432 = math.exp %431 : vector<8x128xf32>
    %cst_111 = arith.constant 1.000000e+00 : f32
    %433 = vector.broadcast %cst_111 : f32 to vector<8x128xf32>
    %434 = arith.addf %433, %432 : vector<8x128xf32>
    %435 = arith.divf %433, %434 : vector<8x128xf32>
    %436 = vector.extract_strided_slice %423 {offsets = [0, 128], sizes = [8, 128], strides = [1, 1]} : vector<8x384xf32> to vector<8x128xf32>
    %437 = vector.extract_strided_slice %427 {offsets = [0, 128], sizes = [8, 128], strides = [1, 1]} : vector<8x384xf32> to vector<8x128xf32>
    %438 = arith.addf %436, %437 : vector<8x128xf32>
    %439 = arith.negf %438 : vector<8x128xf32>
    %440 = math.exp %439 : vector<8x128xf32>
    %cst_112 = arith.constant 1.000000e+00 : f32
    %441 = vector.broadcast %cst_112 : f32 to vector<8x128xf32>
    %442 = arith.addf %441, %440 : vector<8x128xf32>
    %443 = arith.divf %441, %442 : vector<8x128xf32>
    %444 = vector.extract_strided_slice %423 {offsets = [0, 256], sizes = [8, 128], strides = [1, 1]} : vector<8x384xf32> to vector<8x128xf32>
    %445 = vector.extract_strided_slice %427 {offsets = [0, 256], sizes = [8, 128], strides = [1, 1]} : vector<8x384xf32> to vector<8x128xf32>
    %446 = arith.addf %445, %13 : vector<8x128xf32>
    %447 = arith.mulf %435, %446 : vector<8x128xf32>
    %448 = arith.addf %444, %447 : vector<8x128xf32>
    %449 = math.tanh %448 : vector<8x128xf32>
    %450 = arith.subf %385, %449 : vector<8x128xf32>
    %451 = arith.mulf %443, %450 : vector<8x128xf32>
    %452 = arith.addf %449, %451 : vector<8x128xf32>
    %cst_113 = arith.constant dense<0.000000e+00> : vector<8x384xf32>
    %453 = tpu.matmul %411, %10, %cst_113 {dimension_numbers = #tpu.dot_dimension_numbers<[1], [0], [0], [1], [0, 0, 1, 1], [], []>} : vector<8x128xf32>, vector<128x384xf32>, vector<8x384xf32> -> vector<8x384xf32>
    %454 = vector.extract_strided_slice %426 {offsets = [0, 0], sizes = [8, 128], strides = [1, 1]} : vector<8x384xf32> to vector<8x128xf32>
    %455 = vector.extract_strided_slice %453 {offsets = [0, 0], sizes = [8, 128], strides = [1, 1]} : vector<8x384xf32> to vector<8x128xf32>
    %456 = arith.addf %454, %455 : vector<8x128xf32>
    %457 = arith.negf %456 : vector<8x128xf32>
    %458 = math.exp %457 : vector<8x128xf32>
    %cst_114 = arith.constant 1.000000e+00 : f32
    %459 = vector.broadcast %cst_114 : f32 to vector<8x128xf32>
    %460 = arith.addf %459, %458 : vector<8x128xf32>
    %461 = arith.divf %459, %460 : vector<8x128xf32>
    %462 = vector.extract_strided_slice %426 {offsets = [0, 128], sizes = [8, 128], strides = [1, 1]} : vector<8x384xf32> to vector<8x128xf32>
    %463 = vector.extract_strided_slice %453 {offsets = [0, 128], sizes = [8, 128], strides = [1, 1]} : vector<8x384xf32> to vector<8x128xf32>
    %464 = arith.addf %462, %463 : vector<8x128xf32>
    %465 = arith.negf %464 : vector<8x128xf32>
    %466 = math.exp %465 : vector<8x128xf32>
    %cst_115 = arith.constant 1.000000e+00 : f32
    %467 = vector.broadcast %cst_115 : f32 to vector<8x128xf32>
    %468 = arith.addf %467, %466 : vector<8x128xf32>
    %469 = arith.divf %467, %468 : vector<8x128xf32>
    %470 = vector.extract_strided_slice %426 {offsets = [0, 256], sizes = [8, 128], strides = [1, 1]} : vector<8x384xf32> to vector<8x128xf32>
    %471 = vector.extract_strided_slice %453 {offsets = [0, 256], sizes = [8, 128], strides = [1, 1]} : vector<8x384xf32> to vector<8x128xf32>
    %472 = arith.addf %471, %16 : vector<8x128xf32>
    %473 = arith.mulf %461, %472 : vector<8x128xf32>
    %474 = arith.addf %470, %473 : vector<8x128xf32>
    %475 = math.tanh %474 : vector<8x128xf32>
    %476 = arith.subf %411, %475 : vector<8x128xf32>
    %477 = arith.mulf %469, %476 : vector<8x128xf32>
    %478 = arith.addf %475, %477 : vector<8x128xf32>
    %479 = arith.index_cast %c6_i32 : i32 to index
    %c0_116 = arith.constant 0 : index
    %c0_117 = arith.constant 0 : index
    %480 = vector.load %arg13[%479, %c0_116, %c0_117] : memref<8x8x256xf32, #tpu.memory_space<vmem>>, vector<1x8x128xf32>
    %481 = vector.shape_cast %480 : vector<1x8x128xf32> to vector<8x128xf32>
    %482 = vector.shape_cast %452 : vector<8x128xf32> to vector<1x8x128xf32>
    tpu.vector_store %arg13[%479, %c0_116, %c0_117], %482 {strides = array<i32>} : memref<8x8x256xf32, #tpu.memory_space<vmem>>, vector<1x8x128xf32>,
    %483 = arith.index_cast %420 : i32 to index
    %c0_118 = arith.constant 0 : index
    %c128_119 = arith.constant 128 : index
    %484 = vector.load %arg13[%483, %c0_118, %c128_119] : memref<8x8x256xf32, #tpu.memory_space<vmem>>, vector<1x8x128xf32>
    %485 = vector.shape_cast %484 : vector<1x8x128xf32> to vector<8x128xf32>
    %486 = vector.shape_cast %478 : vector<8x128xf32> to vector<1x8x128xf32>
    tpu.vector_store %arg13[%483, %c0_118, %c128_119], %486 {strides = array<i32>} : memref<8x8x256xf32, #tpu.memory_space<vmem>>, vector<1x8x128xf32>,
    %c7_i32_120 = arith.constant 7 : i32
    %c7_i32_121 = arith.constant 7 : i32
    %487 = arith.subi %c7_i32_121, %c7_i32_120 : i32
    %488 = arith.index_cast %c7_i32_120 : i32 to index
    %c0_122 = arith.constant 0 : index
    %c0_123 = arith.constant 0 : index
    %489 = vector.load %arg12[%488, %c0_122, %c0_123] : memref<8x8x768xf32, #tpu.memory_space<vmem>>, vector<1x8x384xf32>
    %490 = vector.shape_cast %489 : vector<1x8x384xf32> to vector<8x384xf32>
    %491 = arith.index_cast %487 : i32 to index
    %c0_124 = arith.constant 0 : index
    %c384_125 = arith.constant 384 : index
    %492 = vector.load %arg12[%491, %c0_124, %c384_125] : memref<8x8x768xf32, #tpu.memory_space<vmem>>, vector<1x8x384xf32>
    %493 = vector.shape_cast %492 : vector<1x8x384xf32> to vector<8x384xf32>
    %cst_126 = arith.constant dense<0.000000e+00> : vector<8x384xf32>
    %494 = tpu.matmul %452, %9, %cst_126 {dimension_numbers = #tpu.dot_dimension_numbers<[1], [0], [0], [1], [0, 0, 1, 1], [], []>} : vector<8x128xf32>, vector<128x384xf32>, vector<8x384xf32> -> vector<8x384xf32>
    %495 = vector.extract_strided_slice %490 {offsets = [0, 0], sizes = [8, 128], strides = [1, 1]} : vector<8x384xf32> to vector<8x128xf32>
    %496 = vector.extract_strided_slice %494 {offsets = [0, 0], sizes = [8, 128], strides = [1, 1]} : vector<8x384xf32> to vector<8x128xf32>
    %497 = arith.addf %495, %496 : vector<8x128xf32>
    %498 = arith.negf %497 : vector<8x128xf32>
    %499 = math.exp %498 : vector<8x128xf32>
    %cst_127 = arith.constant 1.000000e+00 : f32
    %500 = vector.broadcast %cst_127 : f32 to vector<8x128xf32>
    %501 = arith.addf %500, %499 : vector<8x128xf32>
    %502 = arith.divf %500, %501 : vector<8x128xf32>
    %503 = vector.extract_strided_slice %490 {offsets = [0, 128], sizes = [8, 128], strides = [1, 1]} : vector<8x384xf32> to vector<8x128xf32>
    %504 = vector.extract_strided_slice %494 {offsets = [0, 128], sizes = [8, 128], strides = [1, 1]} : vector<8x384xf32> to vector<8x128xf32>
    %505 = arith.addf %503, %504 : vector<8x128xf32>
    %506 = arith.negf %505 : vector<8x128xf32>
    %507 = math.exp %506 : vector<8x128xf32>
    %cst_128 = arith.constant 1.000000e+00 : f32
    %508 = vector.broadcast %cst_128 : f32 to vector<8x128xf32>
    %509 = arith.addf %508, %507 : vector<8x128xf32>
    %510 = arith.divf %508, %509 : vector<8x128xf32>
    %511 = vector.extract_strided_slice %490 {offsets = [0, 256], sizes = [8, 128], strides = [1, 1]} : vector<8x384xf32> to vector<8x128xf32>
    %512 = vector.extract_strided_slice %494 {offsets = [0, 256], sizes = [8, 128], strides = [1, 1]} : vector<8x384xf32> to vector<8x128xf32>
    %513 = arith.addf %512, %13 : vector<8x128xf32>
    %514 = arith.mulf %502, %513 : vector<8x128xf32>
    %515 = arith.addf %511, %514 : vector<8x128xf32>
    %516 = math.tanh %515 : vector<8x128xf32>
    %517 = arith.subf %452, %516 : vector<8x128xf32>
    %518 = arith.mulf %510, %517 : vector<8x128xf32>
    %519 = arith.addf %516, %518 : vector<8x128xf32>
    %cst_129 = arith.constant dense<0.000000e+00> : vector<8x384xf32>
    %520 = tpu.matmul %478, %10, %cst_129 {dimension_numbers = #tpu.dot_dimension_numbers<[1], [0], [0], [1], [0, 0, 1, 1], [], []>} : vector<8x128xf32>, vector<128x384xf32>, vector<8x384xf32> -> vector<8x384xf32>
    %521 = vector.extract_strided_slice %493 {offsets = [0, 0], sizes = [8, 128], strides = [1, 1]} : vector<8x384xf32> to vector<8x128xf32>
    %522 = vector.extract_strided_slice %520 {offsets = [0, 0], sizes = [8, 128], strides = [1, 1]} : vector<8x384xf32> to vector<8x128xf32>
    %523 = arith.addf %521, %522 : vector<8x128xf32>
    %524 = arith.negf %523 : vector<8x128xf32>
    %525 = math.exp %524 : vector<8x128xf32>
    %cst_130 = arith.constant 1.000000e+00 : f32
    %526 = vector.broadcast %cst_130 : f32 to vector<8x128xf32>
    %527 = arith.addf %526, %525 : vector<8x128xf32>
    %528 = arith.divf %526, %527 : vector<8x128xf32>
    %529 = vector.extract_strided_slice %493 {offsets = [0, 128], sizes = [8, 128], strides = [1, 1]} : vector<8x384xf32> to vector<8x128xf32>
    %530 = vector.extract_strided_slice %520 {offsets = [0, 128], sizes = [8, 128], strides = [1, 1]} : vector<8x384xf32> to vector<8x128xf32>
    %531 = arith.addf %529, %530 : vector<8x128xf32>
    %532 = arith.negf %531 : vector<8x128xf32>
    %533 = math.exp %532 : vector<8x128xf32>
    %cst_131 = arith.constant 1.000000e+00 : f32
    %534 = vector.broadcast %cst_131 : f32 to vector<8x128xf32>
    %535 = arith.addf %534, %533 : vector<8x128xf32>
    %536 = arith.divf %534, %535 : vector<8x128xf32>
    %537 = vector.extract_strided_slice %493 {offsets = [0, 256], sizes = [8, 128], strides = [1, 1]} : vector<8x384xf32> to vector<8x128xf32>
    %538 = vector.extract_strided_slice %520 {offsets = [0, 256], sizes = [8, 128], strides = [1, 1]} : vector<8x384xf32> to vector<8x128xf32>
    %539 = arith.addf %538, %16 : vector<8x128xf32>
    %540 = arith.mulf %528, %539 : vector<8x128xf32>
    %541 = arith.addf %537, %540 : vector<8x128xf32>
    %542 = math.tanh %541 : vector<8x128xf32>
    %543 = arith.subf %478, %542 : vector<8x128xf32>
    %544 = arith.mulf %536, %543 : vector<8x128xf32>
    %545 = arith.addf %542, %544 : vector<8x128xf32>
    %546 = arith.index_cast %c7_i32_120 : i32 to index
    %c0_132 = arith.constant 0 : index
    %c0_133 = arith.constant 0 : index
    %547 = vector.load %arg13[%546, %c0_132, %c0_133] : memref<8x8x256xf32, #tpu.memory_space<vmem>>, vector<1x8x128xf32>
    %548 = vector.shape_cast %547 : vector<1x8x128xf32> to vector<8x128xf32>
    %549 = vector.shape_cast %519 : vector<8x128xf32> to vector<1x8x128xf32>
    tpu.vector_store %arg13[%546, %c0_132, %c0_133], %549 {strides = array<i32>} : memref<8x8x256xf32, #tpu.memory_space<vmem>>, vector<1x8x128xf32>,
    %550 = arith.index_cast %487 : i32 to index
    %c0_134 = arith.constant 0 : index
    %c128_135 = arith.constant 128 : index
    %551 = vector.load %arg13[%550, %c0_134, %c128_135] : memref<8x8x256xf32, #tpu.memory_space<vmem>>, vector<1x8x128xf32>
    %552 = vector.shape_cast %551 : vector<1x8x128xf32> to vector<8x128xf32>
    %553 = vector.shape_cast %545 : vector<8x128xf32> to vector<1x8x128xf32>
    tpu.vector_store %arg13[%550, %c0_134, %c128_135], %553 {strides = array<i32>} : memref<8x8x256xf32, #tpu.memory_space<vmem>>, vector<1x8x128xf32>,
    %c8_i32 = arith.constant 8 : i32
    %c0_136 = arith.constant 0 : index
    %c0_137 = arith.constant 0 : index
    %c0_138 = arith.constant 0 : index
    %554 = vector.load %arg11[%c0_136, %c0_137, %c0_138] : memref<2x8x128xf32, #tpu.memory_space<vmem>>, vector<1x8x128xf32>
    %555 = vector.shape_cast %554 : vector<1x8x128xf32> to vector<8x128xf32>
    %556 = vector.shape_cast %519 : vector<8x128xf32> to vector<1x8x128xf32>
    tpu.vector_store %arg11[%c0_136, %c0_137, %c0_138], %556 {strides = array<i32>} : memref<2x8x128xf32, #tpu.memory_space<vmem>>, vector<1x8x128xf32>,
    %c1 = arith.constant 1 : index
    %c0_139 = arith.constant 0 : index
    %c0_140 = arith.constant 0 : index
    %557 = vector.load %arg11[%c1, %c0_139, %c0_140] : memref<2x8x128xf32, #tpu.memory_space<vmem>>, vector<1x8x128xf32>
    %558 = vector.shape_cast %557 : vector<1x8x128xf32> to vector<8x128xf32>
    %559 = vector.shape_cast %545 : vector<8x128xf32> to vector<1x8x128xf32>
    tpu.vector_store %arg11[%c1, %c0_139, %c0_140], %559 {strides = array<i32>} : memref<2x8x128xf32, #tpu.memory_space<vmem>>, vector<1x8x128xf32>,
    %c0_141 = arith.constant 0 : index
    %c0_142 = arith.constant 0 : index
    %c0_143 = arith.constant 0 : index
    %560 = vector.load %arg13[%c0_141, %c0_142, %c0_143] : memref<8x8x256xf32, #tpu.memory_space<vmem>>, vector<8x8x256xf32>
    %561 = vector.shape_cast %560 : vector<8x8x256xf32> to vector<64x256xf32>
    %c0_144 = arith.constant 0 : index
    %c0_145 = arith.constant 0 : index
    %562 = vector.load %arg8[%c0_144, %c0_145] : memref<256x128xf32, #tpu.memory_space<vmem>>, vector<256x128xf32>
    %cst_146 = arith.constant dense<0.000000e+00> : vector<64x128xf32>
    %563 = tpu.matmul %561, %562, %cst_146 {dimension_numbers = #tpu.dot_dimension_numbers<[1], [0], [0], [1], [0, 0, 1, 1], [], []>} : vector<64x256xf32>, vector<256x128xf32>, vector<64x128xf32> -> vector<64x128xf32>
    %c0_147 = arith.constant 0 : index
    %c0_148 = arith.constant 0 : index
    %564 = vector.load %arg9[%c0_147, %c0_148] : memref<1x128xf32, #tpu.memory_space<vmem>>, vector<1x128xf32>
    %565 = vector.broadcast %564 : vector<1x128xf32> to vector<64x128xf32>
    %566 = arith.addf %563, %565 : vector<64x128xf32>
    %567 = vector.shape_cast %566 : vector<64x128xf32> to vector<8x8x128xf32>
    %c0_149 = arith.constant 0 : index
    %c0_150 = arith.constant 0 : index
    %c0_151 = arith.constant 0 : index
    %568 = vector.load %arg10[%c0_149, %c0_150, %c0_151] : memref<8x8x128xf32, #tpu.memory_space<vmem>>, vector<8x8x128xf32>
    tpu.vector_store %arg10[%c0_149, %c0_150, %c0_151], %567 {strides = array<i32>} : memref<8x8x128xf32, #tpu.memory_space<vmem>>, vector<8x8x128xf32>,
    return
  }
  func.func @transform_0(%arg0: i32) -> (i32, i32, i32) {
    %c0_i32 = arith.constant 0 : i32
    %c0_i32_0 = arith.constant 0 : i32
    %c0_i32_1 = arith.constant 0 : i32
    return %c0_i32, %arg0, %c0_i32_0 : i32, i32, i32
  }
  func.func @transform_1(%arg0: i32) -> (i32, i32) {
    %c0_i32 = arith.constant 0 : i32
    %c0_i32_0 = arith.constant 0 : i32
    %c0_i32_1 = arith.constant 0 : i32
    return %c0_i32, %c0_i32_0 : i32, i32
  }
  func.func @transform_2(%arg0: i32) -> (i32, i32) {
    %c0_i32 = arith.constant 0 : i32
    %c0_i32_0 = arith.constant 0 : i32
    %c0_i32_1 = arith.constant 0 : i32
    return %c0_i32, %c0_i32_0 : i32, i32
  }
  func.func @transform_3(%arg0: i32) -> (i32, i32) {
    %c0_i32 = arith.constant 0 : i32
    %c0_i32_0 = arith.constant 0 : i32
    %c0_i32_1 = arith.constant 0 : i32
    return %c0_i32, %c0_i32_0 : i32, i32
  }
  func.func @transform_4(%arg0: i32) -> (i32, i32) {
    %c0_i32 = arith.constant 0 : i32
    %c0_i32_0 = arith.constant 0 : i32
    %c0_i32_1 = arith.constant 0 : i32
    return %c0_i32, %c0_i32_0 : i32, i32
  }
  func.func @transform_5(%arg0: i32) -> (i32, i32) {
    %c0_i32 = arith.constant 0 : i32
    %c0_i32_0 = arith.constant 0 : i32
    %c0_i32_1 = arith.constant 0 : i32
    return %c0_i32, %c0_i32_0 : i32, i32
  }
  func.func @transform_6(%arg0: i32) -> (i32, i32) {
    %c0_i32 = arith.constant 0 : i32
    %c0_i32_0 = arith.constant 0 : i32
    %c0_i32_1 = arith.constant 0 : i32
    return %c0_i32, %c0_i32_0 : i32, i32
  }
  func.func @transform_7(%arg0: i32) -> (i32, i32) {
    %c0_i32 = arith.constant 0 : i32
    %c0_i32_0 = arith.constant 0 : i32
    %c0_i32_1 = arith.constant 0 : i32
    return %c0_i32, %c0_i32_0 : i32, i32
  }
  func.func @transform_8(%arg0: i32) -> (i32, i32) {
    %c0_i32 = arith.constant 0 : i32
    %c0_i32_0 = arith.constant 0 : i32
    %c0_i32_1 = arith.constant 0 : i32
    return %c0_i32, %c0_i32_0 : i32, i32
  }
  func.func @transform_9(%arg0: i32) -> (i32, i32, i32) {
    %c0_i32 = arith.constant 0 : i32
    %c0_i32_0 = arith.constant 0 : i32
    %c0_i32_1 = arith.constant 0 : i32
    return %c0_i32, %arg0, %c0_i32_0 : i32, i32, i32
  }
  func.func @transform_10(%arg0: i32) -> (i32, i32, i32) {
    %c0_i32 = arith.constant 0 : i32
    %c0_i32_0 = arith.constant 0 : i32
    %c0_i32_1 = arith.constant 0 : i32
    return %c0_i32, %arg0, %c0_i32_0 : i32, i32, i32
  }
}

</mosaic_0001>

<bundles_post_ra>
// kernel: tpu_custom_call.1
= control target key start
LH: loop header
LB: loop body
LE: loop exit
PB: predicated region body
PF: predicated region fallthrough
CT: control target
= control target key end

     0   :  { %16 = vsyncpa [#allocation5], 0  ;;  %s7256_s0 = inlined_call_operand.hbm [shape: f32[8,8,128], index: 0, kind: input, shape index: {}]   ;;  %s7257_s1 = inlined_call_operand.hbm [shape: f32[128,768], index: 1, kind: input, shape index: {}]   ;;  %s7258_s2 = inlined_call_operand.hbm [shape: f32[1,768], index: 2, kind: input, shape index: {}]   ;;  %s7259_s3 = inlined_call_operand.hbm [shape: f32[128,384], index: 3, kind: input, shape index: {}]   ;;  %s7260_s4 = inlined_call_operand.hbm [shape: f32[128,384], index: 4, kind: input, shape index: {}]   ;;  %s7261_s5 = inlined_call_operand.vmem [shape: f32[1,128], index: 5, kind: input, shape index: {}]   ;;  %s7262_s6 = inlined_call_operand.vmem [shape: f32[1,128], index: 6, kind: input, shape index: {}]   ;;  %s7263_s7 = inlined_call_operand.hbm [shape: f32[256,128], index: 7, kind: input, shape index: {}]   ;;  %s7264_s8 = inlined_call_operand.vmem [shape: f32[1,128], index: 8, kind: input, shape index: {}]   ;;  %s7265_s9 = inlined_call_operand.hbm [shape: f32[8,8,128], index: 9, kind: output, shape index: {0}]   ;;  %s7266_s10 = inlined_call_operand.hbm [shape: f32[2,8,128], index: 10, kind: output, shape index: {1}]  }
   0x1   :  { %17 = vsyncpa [#allocation8], 0 }
   0x2   :  { %18 = vsyncpa [#allocation11], 0 }
   0x3   :  { %19 = vsyncpa [#allocation14], 0 }
   0x4   :  { %20 = vsyncpa [#allocation6], 0 }
   0x5   :  { %21 = vsyncpa [#allocation17], 0  ;;  %s5093_s13 = smov [#allocation7]  }
   0x6   :  { %s39_s14 = sshll.u32 %s5093_s13, 4  ;;  %s40_s14 = int_to_ptr.vmem [resolvable:$true] %s39_s14 }
   0x7   :  { %s4929_s15 = scalar_lea.vmem %s40_s14, 12288  ;;  %p4934_p1 = scmp.lt.s32.totalorder %s40_s14, %s40_s14 }
   0x8   :  { %p4930_p0 = scmp.ne.s32.totalorder %s40_s14, %s4929_s15  ;;  %p4935_p2 = scmp.lt.s32.totalorder %s4929_s15, %s4929_s15 }
   0xa   :  { %p4936_p3 = por %p4935_p2, %p4934_p1 }
   0xc   :  { %p4937_p4 = pnand %p4936_p3, %p4930_p0 }
   0xe   :  { %4940 = shalt.err (!%p4937_p4)
}
   0xf   :  { %s5094_s16 = smov 768   ;;  %s5095_s17 = smov 48  }
  0x10   :  { %45 = dma.hbm_to_vmem [thread:$0]  %s7257_s1, 12288, %s40_s14, [#allocation8], %s5094_s16, %s5094_s16, %s5095_s17  }
  0x11   :  { %s5096_s20 = smov [#allocation10]  }
  0x12   :  { %s61_s21 = sshll.u32 %s5096_s20, 4  ;;  %s62_s21 = int_to_ptr.vmem [resolvable:$true] %s61_s21 }
  0x13   :  { %s4949_s22 = scalar_lea.vmem %s62_s21, 6144  ;;  %p4954_p6 = scmp.lt.s32.totalorder %s62_s21, %s62_s21 }
  0x14   :  { %p4950_p5 = scmp.ne.s32.totalorder %s62_s21, %s4949_s22  ;;  %p4955_p7 = scmp.lt.s32.totalorder %s4949_s22, %s4949_s22 }
  0x16   :  { %p4956_p8 = por %p4955_p7, %p4954_p6 }
  0x18   :  { %p4957_p9 = pnand %p4956_p8, %p4950_p5 }
  0x1a   :  { %4960 = shalt.err (!%p4957_p9)
}
  0x1b   :  { %s5097_s23 = smov 384   ;;  %s5098_s24 = smov 24  }
  0x1c   :  { %67 = dma.hbm_to_vmem [thread:$0]  %s7259_s3, 6144, %s62_s21, [#allocation11], %s5097_s23, %s5097_s23, %s5098_s24  }
  0x1d   :  { %s5099_s1 = smov [#allocation4]  }
  0x1e   :  { %s27_s27 = sshll.u32 %s5099_s1, 4  ;;  %s28_s27 = int_to_ptr.vmem [resolvable:$true] %s27_s27 }
  0x1f   :  { %s4969_s28 = scalar_lea.vmem %s28_s27, 1024  ;;  %p4974_p11 = scmp.lt.s32.totalorder %s28_s27, %s28_s27 }
  0x20   :  { %p4970_p10 = scmp.ne.s32.totalorder %s28_s27, %s4969_s28  ;;  %p4975_p12 = scmp.lt.s32.totalorder %s4969_s28, %s4969_s28 }
  0x22   :  { %p4976_p13 = por %p4975_p12, %p4974_p11 }
  0x24   :  { %p4977_p0 = pnand %p4976_p13, %p4970_p10 }
  0x26   :  { %4980 = shalt.err (!%p4977_p0)
}
  0x27   :  { %s5100_s29 = smov 128   ;;  %s5101_s30 = smov 8  }
  0x28   :  { %33 = dma.hbm_to_vmem [thread:$0]  %s7256_s0, 1024, %s28_s27, [#allocation5], %s5100_s29, %s5100_s29, %s5101_s30  }
  0x29   :  { %s5102_s3 = smov [#allocation9]   ;;  %s5103_s14 = smov [#allocation12]  }
  0x2a   :  { %s52_s13 = sshll.u32 %s5102_s3, 4  ;;  %s73_s15 = sshll.u32 %s5103_s14, 4  ;;  %s53_s13 = int_to_ptr.vmem [resolvable:$true] %s52_s13  ;;  %s74_s15 = int_to_ptr.vmem [resolvable:$true] %s73_s15 }
  0x2b   :  { %s4989_s16 = scalar_lea.vmem %s53_s13, 96  ;;  %p4994_p2 = scmp.lt.s32.totalorder %s53_s13, %s53_s13 }
  0x2c   :  { %p4990_p1 = scmp.ne.s32.totalorder %s53_s13, %s4989_s16  ;;  %p4995_p3 = scmp.lt.s32.totalorder %s4989_s16, %s4989_s16 }
  0x2e   :  { %p4996_p4 = por %p4995_p3, %p4994_p2 }
  0x30   :  { %p4997_p5 = pnand %p4996_p4, %p4990_p1 }
  0x32   :  { %5000 = shalt.err (!%p4997_p5)
}
  0x33   :  { %55 = dma.hbm_to_vmem [thread:$0]  %s7258_s2, 96, %s53_s13, [#allocation8]  }
  0x34   :  { %s5009_s19 = scalar_lea.vmem %s74_s15, 6144  ;;  %p5014_p7 = scmp.lt.s32.totalorder %s74_s15, %s74_s15 }
  0x35   :  { %p5010_p6 = scmp.ne.s32.totalorder %s74_s15, %s5009_s19  ;;  %p5015_p8 = scmp.lt.s32.totalorder %s5009_s19, %s5009_s19 }
  0x37   :  { %p5016_p9 = por %p5015_p8, %p5014_p7 }
  0x39   :  { %p5017_p10 = pnand %p5016_p9, %p5010_p6 }
  0x3b   :  { %5020 = shalt.err (!%p5017_p10)
}
  0x3c   :  { %79 = dma.hbm_to_vmem [thread:$0]  %s7260_s4, 6144, %s74_s15, [#allocation11], %s5097_s23, %s5097_s23, %s5098_s24  }
  0x3d   :  { %s5104_s21 = smov [#allocation13]  }
  0x3e   :  { %s89_s22 = sshll.u32 %s5104_s21, 4  ;;  %s90_s22 = int_to_ptr.vmem [resolvable:$true] %s89_s22 }
  0x3f   :  { %s5029_s25 = scalar_lea.vmem %s90_s22, 4096  ;;  %p5034_p12 = scmp.lt.s32.totalorder %s90_s22, %s90_s22 }
  0x40   :  { %p5030_p11 = scmp.ne.s32.totalorder %s90_s22, %s5029_s25  ;;  %p5035_p13 = scmp.lt.s32.totalorder %s5029_s25, %s5029_s25 }
  0x42   :  { %p5036_p0 = por %p5035_p13, %p5034_p12 }
  0x44   :  { %p5037_p1 = pnand %p5036_p0, %p5030_p11 }
  0x46   :  { %5040 = shalt.err (!%p5037_p1)
}
  0x47   :  { %95 = dma.hbm_to_vmem [thread:$0]  %s7263_s7, 4096, %s90_s22, [#allocation14], %s5100_s29, %s5100_s29, %s5101_s30  }
  0x48   :  { %5081 = dma.done.wait [#allocation5], 1024  }
  0x49   :  { %5082 = vsyncadd [#allocation5], 4294966272 }
  0x4a   :  { %5083 = dma.done.wait [#allocation8], 12384  }
  0x4b   :  { %5084 = vsyncadd [#allocation8], 4294954912 }
  0x4c   :  { %5085 = dma.done.wait [#allocation11], 12288  }
  0x4d   :  { %5086 = vsyncadd [#allocation11], 4294955008 }
  0x4e   :  { %5087 = dma.done.wait [#allocation14], 4096  }
  0x4f   :  { %5088 = vsyncadd [#allocation14], 4294963200  ;;  %v7288_v0 = vmov 0.0   ;;  %v215_v1 = vld [vmem:[#allocation7 + $0x2d8] sm:$0xff]  ;;  %v217_v2 = vld [vmem:[#allocation7 + $0x2e8] sm:$0xff]  ;;  %vm5106_vm0 = vmmov 0  }
  0x50   :  { %316 = vmatprep.mubr.f32.mxu0 %v7288_v0  ;;  %429 = vmatprep.mubr.f32.mxu1 %v7288_v0  ;;  %v214_v3 = vld [vmem:[#allocation7 + $0x2d0] sm:$0xff]  ;;  %v216_v4 = vld [vmem:[#allocation7 + $0x2e0] sm:$0xff]  ;;  %v209_v5 = vld [vmem:[#allocation7 + $0x2a8] sm:$0xff] }
  0x51   :  { %252 = vmatprep.subr.mxu0 %v215_v1  ;;  %365 = vmatprep.subr.mxu1 %v217_v2  ;;  %v211_v6 = vld [vmem:[#allocation7 + $0x2b8] sm:$0xff]  ;;  %v208_v7 = vld [vmem:[#allocation7 + $0x2a0] sm:$0xff]  ;;  %v210_v8 = vld [vmem:[#allocation7 + $0x2b0] sm:$0xff] }
  0x52   :  { %253 = vmatpush1.msra.mxu0 %v214_v3  ;;  %366 = vmatpush1.msra.mxu1 %v216_v4  ;;  %v203_v9 = vld [vmem:[#allocation7 + $0x278] sm:$0xff]  ;;  %v205_v10 = vld [vmem:[#allocation7 + $0x288] sm:$0xff]  ;;  %v202_v11 = vld [vmem:[#allocation7 + $0x270] sm:$0xff] }
  0x53   :  { %254 = vmatprep.subr.mxu0 %v209_v5  ;;  %367 = vmatprep.subr.mxu1 %v211_v6  ;;  %v204_v12 = vld [vmem:[#allocation7 + $0x280] sm:$0xff]  ;;  %v197_v13 = vld [vmem:[#allocation7 + $0x248] sm:$0xff]  ;;  %v199_v14 = vld [vmem:[#allocation7 + $0x258] sm:$0xff] }
  0x54   :  { %255 = vmatpush1.msra.mxu0 %v208_v7  ;;  %368 = vmatpush1.msra.mxu1 %v210_v8  ;;  %v196_v15 = vld [vmem:[#allocation7 + $0x240] sm:$0xff]  ;;  %v198_v16 = vld [vmem:[#allocation7 + $0x250] sm:$0xff]  ;;  %v191_v17 = vld [vmem:[#allocation7 + $0x218] sm:$0xff] }
  0x55   :  { %256 = vmatprep.subr.mxu0 %v203_v9  ;;  %369 = vmatprep.subr.mxu1 %v205_v10  ;;  %v193_v18 = vld [vmem:[#allocation7 + $0x228] sm:$0xff]  ;;  %v190_v19 = vld [vmem:[#allocation7 + $0x210] sm:$0xff]  ;;  %v192_v20 = vld [vmem:[#allocation7 + $0x220] sm:$0xff] }
  0x56   :  { %257 = vmatpush1.msra.mxu0 %v202_v11  ;;  %370 = vmatpush1.msra.mxu1 %v204_v12  ;;  %v185_v21 = vld [vmem:[#allocation7 + $0x1e8] sm:$0xff]  ;;  %v187_v22 = vld [vmem:[#allocation7 + $0x1f8] sm:$0xff]  ;;  %v184_v23 = vld [vmem:[#allocation7 + $0x1e0] sm:$0xff] }
  0x57   :  { %258 = vmatprep.subr.mxu0 %v197_v13  ;;  %371 = vmatprep.subr.mxu1 %v199_v14  ;;  %v186_v24 = vld [vmem:[#allocation7 + $0x1f0] sm:$0xff]  ;;  %v179_v25 = vld [vmem:[#allocation7 + $0x1b8] sm:$0xff]  ;;  %v181_v26 = vld [vmem:[#allocation7 + $0x1c8] sm:$0xff] }
  0x58   :  { %259 = vmatpush1.msra.mxu0 %v196_v15  ;;  %372 = vmatpush1.msra.mxu1 %v198_v16  ;;  %v178_v27 = vld [vmem:[#allocation7 + $0x1b0] sm:$0xff]  ;;  %v180_v28 = vld [vmem:[#allocation7 + $0x1c0] sm:$0xff]  ;;  %v173_v29 = vld [vmem:[#allocation7 + $0x188] sm:$0xff] }
  0x59   :  { %260 = vmatprep.subr.mxu0 %v191_v17  ;;  %373 = vmatprep.subr.mxu1 %v193_v18  ;;  %v175_v30 = vld [vmem:[#allocation7 + $0x198] sm:$0xff]  ;;  %v172_v31 = vld [vmem:[#allocation7 + $0x180] sm:$0xff]  ;;  %v174_v32 = vld [vmem:[#allocation7 + $0x190] sm:$0xff] }
  0x5a   :  { %261 = vmatpush1.msra.mxu0 %v190_v19  ;;  %374 = vmatpush1.msra.mxu1 %v192_v20  ;;  %v167_v33 = vld [vmem:[#allocation7 + $0x158] sm:$0xff]  ;;  %v169_v34 = vld [vmem:[#allocation7 + $0x168] sm:$0xff]  ;;  %v166_v35 = vld [vmem:[#allocation7 + $0x150] sm:$0xff] }
  0x5b   :  { %262 = vmatprep.subr.mxu0 %v185_v21  ;;  %375 = vmatprep.subr.mxu1 %v187_v22  ;;  %v168_v36 = vld [vmem:[#allocation7 + $0x160] sm:$0xff]  ;;  %v161_v37 = vld [vmem:[#allocation7 + $0x128] sm:$0xff]  ;;  %v163_v38 = vld [vmem:[#allocation7 + $0x138] sm:$0xff] }
  0x5c   :  { %263 = vmatpush1.msra.mxu0 %v184_v23  ;;  %376 = vmatpush1.msra.mxu1 %v186_v24  ;;  %v160_v39 = vld [vmem:[#allocation7 + $0x120] sm:$0xff]  ;;  %v162_v40 = vld [vmem:[#allocation7 + $0x130] sm:$0xff]  ;;  %v155_v41 = vld [vmem:[#allocation7 + $0xf8] sm:$0xff] }
  0x5d   :  { %264 = vmatprep.subr.mxu0 %v179_v25  ;;  %377 = vmatprep.subr.mxu1 %v181_v26  ;;  %v157_v42 = vld [vmem:[#allocation7 + $0x108] sm:$0xff]  ;;  %v154_v43 = vld [vmem:[#allocation7 + $0xf0] sm:$0xff]  ;;  %v156_v44 = vld [vmem:[#allocation7 + $0x100] sm:$0xff] }
  0x5e   :  { %265 = vmatpush1.msra.mxu0 %v178_v27  ;;  %378 = vmatpush1.msra.mxu1 %v180_v28  ;;  %v149_v45 = vld [vmem:[#allocation7 + $0xc8] sm:$0xff]  ;;  %v151_v46 = vld [vmem:[#allocation7 + $0xd8] sm:$0xff]  ;;  %v148_v47 = vld [vmem:[#allocation7 + $0xc0] sm:$0xff] }
  0x5f   :  { %266 = vmatprep.subr.mxu0 %v173_v29  ;;  %379 = vmatprep.subr.mxu1 %v175_v30  ;;  %v150_v48 = vld [vmem:[#allocation7 + $0xd0] sm:$0xff]  ;;  %v143_v49 = vld [vmem:[#allocation7 + $0x98] sm:$0xff]  ;;  %v145_v50 = vld [vmem:[#allocation7 + $0xa8] sm:$0xff] }
  0x60   :  { %267 = vmatpush1.msra.mxu0 %v172_v31  ;;  %380 = vmatpush1.msra.mxu1 %v174_v32  ;;  %v142_v51 = vld [vmem:[#allocation7 + $0x90] sm:$0xff]  ;;  %v144_v52 = vld [vmem:[#allocation7 + $0xa0] sm:$0xff]  ;;  %v137_v53 = vld [vmem:[#allocation7 + $0x68] sm:$0xff] }
  0x61   :  { %268 = vmatprep.subr.mxu0 %v167_v33  ;;  %381 = vmatprep.subr.mxu1 %v169_v34  ;;  %v139_v54 = vld [vmem:[#allocation7 + $0x78] sm:$0xff]  ;;  %v136_v55 = vld [vmem:[#allocation7 + $0x60] sm:$0xff]  ;;  %v138_v56 = vld [vmem:[#allocation7 + $0x70] sm:$0xff] }
  0x62   :  { %269 = vmatpush1.msra.mxu0 %v166_v35  ;;  %382 = vmatpush1.msra.mxu1 %v168_v36  ;;  %v131_v57 = vld [vmem:[#allocation7 + $0x38] sm:$0xff]  ;;  %v133_v58 = vld [vmem:[#allocation7 + $0x48] sm:$0xff]  ;;  %v130_v59 = vld [vmem:[#allocation7 + $0x30] sm:$0xff] }
  0x63   :  { %270 = vmatprep.subr.mxu0 %v161_v37  ;;  %383 = vmatprep.subr.mxu1 %v163_v38  ;;  %v132_v60 = vld [vmem:[#allocation7 + $0x40] sm:$0xff]  ;;  %v125_v61 = vld [vmem:[#allocation7 + $0x8] sm:$0xff]  ;;  %v127_v62 = vld [vmem:[#allocation7 + $0x18] sm:$0xff] }
  0x64   :  { %271 = vmatpush1.msra.mxu0 %v160_v39  ;;  %384 = vmatpush1.msra.mxu1 %v162_v40  ;;  %v124_v63 = vld [vmem:[#allocation7] sm:$0xff]  ;;  %v126_v1 = vld [vmem:[#allocation7 + $0x10] sm:$0xff]  ;;  %v219_v3 = vld [vmem:[#allocation7 + $0x2f8] sm:$0xff] }
  0x65   :  { %272 = vmatprep.subr.mxu0 %v155_v41  ;;  %385 = vmatprep.subr.mxu1 %v157_v42  ;;  %v5196_v2 = vld [vmem:[#allocation4] sm:$0xff]  ;;  %v5198_v4 = vld [vmem:[#allocation10 + $0x170] sm:$0xff]  ;;  %v5200_v6 = vld [vmem:[#allocation10 + $0x168] sm:$0xff] }
  0x66   :  { %273 = vmatpush1.msra.mxu0 %v154_v43  ;;  %386 = vmatpush1.msra.mxu1 %v156_v44  ;;  %v218_v5 = vld [vmem:[#allocation7 + $0x2f0] sm:$0xff]  ;;  %v213_v7 = vld [vmem:[#allocation7 + $0x2c8] sm:$0xff]  ;;  %v5204_v8 = vld [vmem:[#allocation10 + $0x158] sm:$0xff] }
  0x67   :  { %274 = vmatprep.subr.mxu0 %v149_v45  ;;  %387 = vmatprep.subr.mxu1 %v151_v46  ;;  %v212_v9 = vld [vmem:[#allocation7 + $0x2c0] sm:$0xff]  ;;  %v5208_v10 = vld [vmem:[#allocation10 + $0x150] sm:$0xff]  ;;  %v5211_v11 = vld [vmem:[#allocation4 + $0x8] sm:$0xff] }
  0x68   :  { %275 = vmatpush1.msra.mxu0 %v148_v47  ;;  %388 = vmatpush1.msra.mxu1 %v150_v48  ;;  %v207_v12 = vld [vmem:[#allocation7 + $0x298] sm:$0xff]  ;;  %v5215_v13 = vld [vmem:[#allocation10 + $0x140] sm:$0xff]  ;;  %v206_v14 = vld [vmem:[#allocation7 + $0x290] sm:$0xff] }
  0x69   :  { %276 = vmatprep.subr.mxu0 %v143_v49  ;;  %389 = vmatprep.subr.mxu1 %v145_v50  ;;  %v5218_v15 = vld [vmem:[#allocation10 + $0x138] sm:$0xff]  ;;  %v201_v16 = vld [vmem:[#allocation7 + $0x268] sm:$0xff]  ;;  %v5229_v20 = vld [vmem:[#allocation4 + $0x10] sm:$0xff] }
  0x6a   :  { %277 = vmatpush1.msra.mxu0 %v142_v51  ;;  %390 = vmatpush1.msra.mxu1 %v144_v52  ;;  %v5222_v17 = vld [vmem:[#allocation10 + $0x128] sm:$0xff]  ;;  %v200_v18 = vld [vmem:[#allocation7 + $0x260] sm:$0xff]  ;;  %v195_v21 = vld [vmem:[#allocation7 + $0x238] sm:$0xff] }
  0x6b   :  { %278 = vmatprep.subr.mxu0 %v137_v53  ;;  %391 = vmatprep.subr.mxu1 %v139_v54  ;;  %v5226_v19 = vld [vmem:[#allocation10 + $0x120] sm:$0xff]  ;;  %v5233_v22 = vld [vmem:[#allocation10 + $0x110] sm:$0xff]  ;;  %v5236_v24 = vld [vmem:[#allocation10 + $0x108] sm:$0xff] }
  0x6c   :  { %279 = vmatpush1.msra.mxu0 %v136_v55  ;;  %392 = vmatpush1.msra.mxu1 %v138_v56  ;;  %v194_v23 = vld [vmem:[#allocation7 + $0x230] sm:$0xff]  ;;  %v189_v25 = vld [vmem:[#allocation7 + $0x208] sm:$0xff]  ;;  %v5240_v26 = vld [vmem:[#allocation10 + $0xf8] sm:$0xff] }
  0x6d   :  { %280 = vmatprep.subr.mxu0 %v131_v57  ;;  %393 = vmatprep.subr.mxu1 %v133_v58  ;;  %v188_v27 = vld [vmem:[#allocation7 + $0x200] sm:$0xff]  ;;  %v5244_v28 = vld [vmem:[#allocation10 + $0xf0] sm:$0xff]  ;;  %v177_v34 = vld [vmem:[#allocation7 + $0x1a8] sm:$0xff] }
  0x6e   :  { %281 = vmatpush1.msra.mxu0 %v130_v59  ;;  %394 = vmatpush1.msra.mxu1 %v132_v60  ;;  %v5247_v29 = vld [vmem:[#allocation4 + $0x18] sm:$0xff]  ;;  %v5251_v31 = vld [vmem:[#allocation10 + $0xe0] sm:$0xff]  ;;  %v182_v32 = vld [vmem:[#allocation7 + $0x1d0] sm:$0xff] }
  0x6f   :  { %282 = vmatprep.subr.mxu0 %v125_v61  ;;  %395 = vmatprep.subr.mxu1 %v127_v62  ;;  %v183_v30 = vld [vmem:[#allocation7 + $0x1d8] sm:$0xff]  ;;  %v5258_v35 = vld [vmem:[#allocation10 + $0xc8] sm:$0xff]  ;;  %v176_v36 = vld [vmem:[#allocation7 + $0x1a0] sm:$0xff] }
  0x70   :  { %283 = vmatpush1.msra.mxu0 %v124_v63  ;;  %396 = vmatpush1.msra.mxu1 %v126_v1  ;;  %v5254_v33 = vld [vmem:[#allocation10 + $0xd8] sm:$0xff]  ;;  %v5262_v37 = vld [vmem:[#allocation10 + $0xc0] sm:$0xff]  ;;  %v5269_v40 = vld [vmem:[#allocation10 + $0xb0] sm:$0xff] }
  0x71   :  { %317 = vmatmul.mubr.f32.vlgmr.msra.gmra.mxu0 %v5196_v2  ;;  %430 = vmatmul.mubr.f32.vlgmr.msra.gmra.mxu1 %v5196_v2  ;;  %v5265_v38 = vld [vmem:[#allocation4 + $0x20] sm:$0xff]  ;;  %v171_v39 = vld [vmem:[#allocation7 + $0x178] sm:$0xff]  ;;  %v170_v41 = vld [vmem:[#allocation7 + $0x170] sm:$0xff] }
  0x72   :  { %478 = vmatprep.subr.mxu0 %v219_v3  ;;  %756 = vmatprep.subr.mxu1 %v5198_v4  ;;  %v5272_v42 = vld [vmem:[#allocation10 + $0xa8] sm:$0xff]  ;;  %v5276_v44 = vld [vmem:[#allocation10 + $0x98] sm:$0xff]  ;;  %v5280_v46 = vld [vmem:[#allocation10 + $0x90] sm:$0xff] }
  0x73   :  { %479 = vmatpush1.msra.mxu0 %v218_v5  ;;  %757 = vmatpush1.msra.mxu1 %v5200_v6  ;;  %v165_v43 = vld [vmem:[#allocation7 + $0x148] sm:$0xff]  ;;  %v164_v45 = vld [vmem:[#allocation7 + $0x140] sm:$0xff]  ;;  %v159_v48 = vld [vmem:[#allocation7 + $0x118] sm:$0xff] }
  0x74   :  { %480 = vmatprep.subr.mxu0 %v213_v7  ;;  %758 = vmatprep.subr.mxu1 %v5204_v8  ;;  %v5283_v47 = vld [vmem:[#allocation4 + $0x28] sm:$0xff]  ;;  %v158_v50 = vld [vmem:[#allocation7 + $0x110] sm:$0xff]  ;;  %v5290_v51 = vld [vmem:[#allocation10 + $0x78] sm:$0xff] }
  0x75   :  { %322 = vmatprep.mubr.f32.mxu0 %v7288_v0  ;;  %435 = vmatprep.mubr.f32.mxu1 %v7288_v0  ;;  %v5287_v49 = vld [vmem:[#allocation10 + $0x80] sm:$0xff]  ;;  %v5294_v53 = vld [vmem:[#allocation10 + $0x68] sm:$0xff]  ;;  %v147_v57 = vld [vmem:[#allocation7 + $0xb8] sm:$0xff] }
  0x76   :  { %481 = vmatpush1.msra.mxu0 %v212_v9  ;;  %759 = vmatpush1.msra.mxu1 %v5208_v10  ;;  %v153_v52 = vld [vmem:[#allocation7 + $0xe8] sm:$0xff]  ;;  %v152_v54 = vld [vmem:[#allocation7 + $0xe0] sm:$0xff]  ;;  %v5301_v56 = vld [vmem:[#allocation4 + $0x30] sm:$0xff] }
  0x77   :  { %323 = vmatmul.mubr.f32.gmra.mxu0 %v5211_v11  ;;  %436 = vmatmul.mubr.f32.gmra.mxu1 %v5211_v11  ;;  %v5298_v55 = vld [vmem:[#allocation10 + $0x60] sm:$0xff]  ;;  %v5305_v58 = vld [vmem:[#allocation10 + $0x50] sm:$0xff]  ;;  %v5308_v60 = vld [vmem:[#allocation10 + $0x48] sm:$0xff] }
  0x78   :  { %482 = vmatprep.subr.mxu0 %v207_v12  ;;  %760 = vmatprep.subr.mxu1 %v5215_v13  ;;  %v146_v59 = vld [vmem:[#allocation7 + $0xb0] sm:$0xff]  ;;  %v141_v61 = vld [vmem:[#allocation7 + $0x88] sm:$0xff]  ;;  %v5312_v62 = vld [vmem:[#allocation10 + $0x38] sm:$0xff] }
  0x79   :  { %483 = vmatpush1.msra.mxu0 %v206_v14  ;;  %761 = vmatpush1.msra.mxu1 %v5218_v15  ;;  %v140_v63 = vld [vmem:[#allocation7 + $0x80] sm:$0xff]  ;;  %v5316_v1 = vld [vmem:[#allocation10 + $0x30] sm:$0xff]  ;;  %v129_v14 = vld [vmem:[#allocation7 + $0x28] sm:$0xff] }
  0x7a   :  { %484 = vmatprep.subr.mxu0 %v201_v16  ;;  %762 = vmatprep.subr.mxu1 %v5222_v17  ;;  %v5319_v3 = vld [vmem:[#allocation4 + $0x38] sm:$0xff]  ;;  %v5323_v7 = vld [vmem:[#allocation10 + $0x20] sm:$0xff]  ;;  %v134_v9 = vld [vmem:[#allocation7 + $0x50] sm:$0xff] }
  0x7b   :  { %328 = vmatprep.mubr.f32.mxu0 %v7288_v0  ;;  %441 = vmatprep.mubr.f32.mxu1 %v7288_v0  ;;  %v135_v5 = vld [vmem:[#allocation7 + $0x58] sm:$0xff]  ;;  %v5330_v16 = vld [vmem:[#allocation10 + $0x8] sm:$0xff] }
  0x7c   :  { %485 = vmatpush1.msra.mxu0 %v200_v18  ;;  %763 = vmatpush1.msra.mxu1 %v5226_v19  ;;  %v5326_v12 = vld [vmem:[#allocation10 + $0x18] sm:$0xff] }
  0x7d   :  { %329 = vmatmul.mubr.f32.gmra.mxu0 %v5229_v20  ;;  %442 = vmatmul.mubr.f32.gmra.mxu1 %v5229_v20  ;;  %v128_v18 = vld [vmem:[#allocation7 + $0x20] sm:$0xff] }
  0x7e   :  { %486 = vmatprep.subr.mxu0 %v195_v21  ;;  %764 = vmatprep.subr.mxu1 %v5233_v22  ;;  %v5334_v21 = vld [vmem:[#allocation10] sm:$0xff] }
  0x7f   :  { %487 = vmatpush1.msra.mxu0 %v194_v23  ;;  %765 = vmatpush1.msra.mxu1 %v5236_v24  ;;  %v5338_v23 = vld [vmem:[#allocation12 + $0x170] sm:$0xff] }
  0x80   :  { %488 = vmatprep.subr.mxu0 %v189_v25  ;;  %766 = vmatprep.subr.mxu1 %v5240_v26  ;;  %v5342_v25 = vld [vmem:[#allocation10 + $0x178] sm:$0xff] }
  0x81   :  { %334 = vmatprep.mubr.f32.mxu0 %v7288_v0  ;;  %447 = vmatprep.mubr.f32.mxu1 %v7288_v0 }
  0x82   :  { %489 = vmatpush1.msra.mxu0 %v188_v27  ;;  %767 = vmatpush1.msra.mxu1 %v5244_v28  ;;  %v5344_v27 = vld [vmem:[#allocation12 + $0x168] sm:$0xff] }
  0x83   :  { %335 = vmatmul.mubr.f32.gmra.mxu0 %v5247_v29  ;;  %448 = vmatmul.mubr.f32.gmra.mxu1 %v5247_v29 }
  0x84   :  { %490 = vmatprep.subr.mxu0 %v183_v30  ;;  %768 = vmatprep.subr.mxu1 %v5251_v31  ;;  %v5348_v30 = vld [vmem:[#allocation12 + $0x158] sm:$0xff] }
  0x85   :  { %491 = vmatpush1.msra.mxu0 %v182_v32  ;;  %769 = vmatpush1.msra.mxu1 %v5254_v33  ;;  %v5352_v32 = vld [vmem:[#allocation10 + $0x160] sm:$0xff] }
  0x86   :  { %492 = vmatprep.subr.mxu0 %v177_v34  ;;  %770 = vmatprep.subr.mxu1 %v5258_v35  ;;  %v5356_v34 = vld [vmem:[#allocation12 + $0x150] sm:$0xff] }
  0x87   :  { %340 = vmatprep.mubr.f32.mxu0 %v7288_v0  ;;  %453 = vmatprep.mubr.f32.mxu1 %v7288_v0 }
  0x88   :  { %493 = vmatpush1.msra.mxu0 %v176_v36  ;;  %771 = vmatpush1.msra.mxu1 %v5262_v37  ;;  %v5364_v36 = vld [vmem:[#allocation10 + $0x148] sm:$0xff] }
  0x89   :  { %341 = vmatmul.mubr.f32.gmra.mxu0 %v5265_v38  ;;  %454 = vmatmul.mubr.f32.gmra.mxu1 %v5265_v38 }
  0x8a   :  { %494 = vmatprep.subr.mxu0 %v171_v39  ;;  %772 = vmatprep.subr.mxu1 %v5269_v40  ;;  %v5366_v39 = vld [vmem:[#allocation12 + $0x138] sm:$0xff] }
  0x8b   :  { %495 = vmatpush1.msra.mxu0 %v170_v41  ;;  %773 = vmatpush1.msra.mxu1 %v5272_v42  ;;  %v5370_v41 = vld [vmem:[#allocation12 + $0x128] sm:$0xff] }
  0x8c   :  { %496 = vmatprep.subr.mxu0 %v165_v43  ;;  %774 = vmatprep.subr.mxu1 %v5276_v44  ;;  %v5374_v43 = vld [vmem:[#allocation10 + $0x130] sm:$0xff] }
  0x8d   :  { %346 = vmatprep.mubr.f32.mxu0 %v7288_v0  ;;  %459 = vmatprep.mubr.f32.mxu1 %v7288_v0 }
  0x8e   :  { %497 = vmatpush1.msra.mxu0 %v164_v45  ;;  %775 = vmatpush1.msra.mxu1 %v5280_v46  ;;  %v5378_v45 = vld [vmem:[#allocation12 + $0x120] sm:$0xff] }
  0x8f   :  { %347 = vmatmul.mubr.f32.gmra.mxu0 %v5283_v47  ;;  %460 = vmatmul.mubr.f32.gmra.mxu1 %v5283_v47 }
  0x90   :  { %498 = vmatprep.subr.mxu0 %v159_v48  ;;  %776 = vmatprep.subr.mxu1 %v5287_v49  ;;  %v5382_v48 = vld [vmem:[#allocation12 + $0x110] sm:$0xff] }
  0x91   :  { %499 = vmatpush1.msra.mxu0 %v158_v50  ;;  %777 = vmatpush1.msra.mxu1 %v5290_v51  ;;  %v5388_v50 = vld [vmem:[#allocation12 + $0x108] sm:$0xff] }
  0x92   :  { %500 = vmatprep.subr.mxu0 %v153_v52  ;;  %778 = vmatprep.subr.mxu1 %v5294_v53  ;;  %7442 = vst [vmem:[#allocation24_spill] sm:$0xff] %v5388_v50  ;;  %v5392_v52 = vld [vmem:[#allocation12 + $0xf8] sm:$0xff] }
  0x93   :  { %352 = vmatprep.mubr.f32.mxu0 %v7288_v0  ;;  %465 = vmatprep.mubr.f32.mxu1 %v7288_v0  ;;  %7443 = vst [vmem:[#allocation25_spill] sm:$0xff] %v5392_v52 }
  0x94   :  { %501 = vmatpush1.msra.mxu0 %v152_v54  ;;  %779 = vmatpush1.msra.mxu1 %v5298_v55  ;;  %v5396_v54 = vld [vmem:[#allocation10 + $0x100] sm:$0xff] }
  0x95   :  { %353 = vmatmul.mubr.f32.gmra.mxu0 %v5301_v56  ;;  %466 = vmatmul.mubr.f32.gmra.mxu1 %v5301_v56 }
  0x96   :  { %502 = vmatprep.subr.mxu0 %v147_v57  ;;  %780 = vmatprep.subr.mxu1 %v5305_v58  ;;  %v5400_v57 = vld [vmem:[#allocation12 + $0xf0] sm:$0xff] }
  0x97   :  { %503 = vmatpush1.msra.mxu0 %v146_v59  ;;  %781 = vmatpush1.msra.mxu1 %v5308_v60  ;;  %7444 = vst [vmem:[#allocation26_spill] sm:$0xff] %v5400_v57  ;;  %v5404_v59 = vld [vmem:[#allocation12 + $0xe0] sm:$0xff] }
  0x98   :  { %504 = vmatprep.subr.mxu0 %v141_v61  ;;  %782 = vmatprep.subr.mxu1 %v5312_v62  ;;  %7445 = vst [vmem:[#allocation27_spill] sm:$0xff] %v5404_v59  ;;  %v5410_v61 = vld [vmem:[#allocation12 + $0xd8] sm:$0xff] }
  0x99   :  { %358 = vmatprep.mubr.f32.mxu0 %v7288_v0  ;;  %471 = vmatprep.mubr.f32.mxu1 %v7288_v0  ;;  %7446 = vst [vmem:[#allocation28_spill] sm:$0xff] %v5410_v61 }
  0x9a   :  { %505 = vmatpush1.msra.mxu0 %v140_v63  ;;  %783 = vmatpush1.msra.mxu1 %v5316_v1  ;;  %v5414_v63 = vld [vmem:[#allocation12 + $0xc8] sm:$0xff] }
  0x9b   :  { %359 = vmatmul.mubr.f32.gmra.mxu0 %v5319_v3  ;;  %472 = vmatmul.mubr.f32.gmra.mxu1 %v5319_v3  ;;  %7447 = vst [vmem:[#allocation29_spill] sm:$0xff] %v5414_v63 }
  0x9c   :  { %506 = vmatprep.subr.mxu0 %v135_v5  ;;  %784 = vmatprep.subr.mxu1 %v5323_v7  ;;  %v5418_v5 = vld [vmem:[#allocation10 + $0xd0] sm:$0xff] }
  0x9d   :  { %507 = vmatpush1.msra.mxu0 %v134_v9  ;;  %785 = vmatpush1.msra.mxu1 %v5326_v12  ;;  %v5422_v9 = vld [vmem:[#allocation12 + $0xc0] sm:$0xff] }
  0x9e   :  { %508 = vmatprep.subr.mxu0 %v129_v14  ;;  %786 = vmatprep.subr.mxu1 %v5330_v16  ;;  %7448 = vst [vmem:[#allocation30_spill] sm:$0xff] %v5422_v9  ;;  %v5426_v14 = vld [vmem:[#allocation12 + $0xb0] sm:$0xff] }
  0x9f   :  { %509 = vmatpush1.msra.mxu0 %v128_v18  ;;  %542 = vmatprep.mubr.f32.mxu0 %v7288_v0  ;;  %7449 = vst [vmem:[#allocation31_spill] sm:$0xff] %v5426_v14  ;;  %v5432_v18 = vld [vmem:[#allocation12 + $0xa8] sm:$0xff] }
  0xa0   :  { %787 = vmatpush1.msra.mxu1 %v5334_v21  ;;  %820 = vmatprep.mubr.f32.mxu1 %v7288_v0  ;;  %7450 = vst [vmem:[#allocation32_spill] sm:$0xff] %v5432_v18 }
  0xa1   :  { %543 = vmatmul.mubr.f32.vlgmr.msra.gmra.mxu0 %v5196_v2  ;;  %821 = vmatmul.mubr.f32.vlgmr.msra.gmra.mxu1 %v7288_v0  ;;  %v5360_v2 = vld [vmem:[#allocation12 + $0x140] sm:$0xff] }
  0xa2   :  { %3989 = vmatprep.subr.mxu0 %v7288_v0  ;;  %918 = vmatprep.subr.mxu1 %v5338_v23 }
  0xa3   :  { %3990 = vmatpush3.msra.mxu0 %v5342_v25  ;;  %919 = vmatpush1.msra.mxu1 %v5344_v27 }
  0xa4   :  { %3991 = vmatprep.subr.mxu0 %v7288_v0  ;;  %920 = vmatprep.subr.mxu1 %v5348_v30 }
  0xa5   :  { %548 = vmatprep.mubr.f32.mxu0 %v7288_v0  ;;  %3992 = vmatpush3.msra.mxu0 %v5352_v32 }
  0xa6   :  { %921 = vmatpush1.msra.mxu1 %v5356_v34  ;;  %549 = vmatmul.mubr.f32.gmra.mxu0 %v5211_v11  ;;  %v5386_v11 = vld [vmem:[#allocation10 + $0x118] sm:$0xff] }
  0xa7   :  { %3993 = vmatprep.subr.mxu0 %v7288_v0  ;;  %922 = vmatprep.subr.mxu1 %v5360_v2 }
  0xa8   :  { %3994 = vmatpush3.msra.mxu0 %v5364_v36  ;;  %923 = vmatpush1.msra.mxu1 %v5366_v39 }
  0xa9   :  { %3995 = vmatprep.subr.mxu0 %v7288_v0  ;;  %924 = vmatprep.subr.mxu1 %v5370_v41 }
  0xaa   :  { %554 = vmatprep.mubr.f32.mxu0 %v7288_v0  ;;  %3996 = vmatpush3.msra.mxu0 %v5374_v43 }
  0xab   :  { %925 = vmatpush1.msra.mxu1 %v5378_v45  ;;  %555 = vmatmul.mubr.f32.gmra.mxu0 %v5229_v20  ;;  %v5408_v20 = vld [vmem:[#allocation10 + $0xe8] sm:$0xff] }
  0xac   :  { %3997 = vmatprep.subr.mxu0 %v7288_v0  ;;  %926 = vmatprep.subr.mxu1 %v5382_v48 }
  0xad   :  { %3998 = vmatpush3.msra.mxu0 %v5386_v11  ;;  %927 = vmatpush1.msra.mxu1 %v5388_v50  ;;  %v5510_v50 = vld [vmem:[#allocation12] sm:$0xff] }
  0xae   :  { %3999 = vmatprep.subr.mxu0 %v7288_v0  ;;  %928 = vmatprep.subr.mxu1 %v5392_v52  ;;  %v5488_v52 = vld [vmem:[#allocation12 + $0x30] sm:$0xff]  ;;  %7465 = vst [vmem:[#allocation47_spill] sm:$0xff] %v5510_v50 }
  0xaf   :  { %560 = vmatprep.mubr.f32.mxu0 %v7288_v0  ;;  %4000 = vmatpush3.msra.mxu0 %v5396_v54 }
  0xb0   :  { %929 = vmatpush1.msra.mxu1 %v5400_v57  ;;  %561 = vmatmul.mubr.f32.gmra.mxu0 %v5247_v29  ;;  %v5430_v29 = vld [vmem:[#allocation10 + $0xb8] sm:$0xff]  ;;  %v5466_v57 = vld [vmem:[#allocation12 + $0x60] sm:$0xff] }
  0xb1   :  { %4001 = vmatprep.subr.mxu0 %v7288_v0  ;;  %930 = vmatprep.subr.mxu1 %v5404_v59  ;;  %v5444_v59 = vld [vmem:[#allocation12 + $0x90] sm:$0xff]  ;;  %7456 = vst [vmem:[#allocation38_spill] sm:$0xff] %v5466_v57 }
  0xb2   :  { %4002 = vmatpush3.msra.mxu0 %v5408_v20  ;;  %931 = vmatpush1.msra.mxu1 %v5410_v61  ;;  %v5436_v61 = vld [vmem:[#allocation12 + $0x98] sm:$0xff]  ;;  %7452 = vst [vmem:[#allocation34_spill] sm:$0xff] %v5444_v59 }
  0xb3   :  { %4003 = vmatprep.subr.mxu0 %v7288_v0  ;;  %932 = vmatprep.subr.mxu1 %v5414_v63  ;;  %7451 = vst [vmem:[#allocation33_spill] sm:$0xff] %v5436_v61  ;;  %v5440_v63 = vld [vmem:[#allocation10 + $0xa0] sm:$0xff] }
  0xb4   :  { %566 = vmatprep.mubr.f32.mxu0 %v7288_v0  ;;  %4004 = vmatpush3.msra.mxu0 %v5418_v5 }
  0xb5   :  { %933 = vmatpush1.msra.mxu1 %v5422_v9  ;;  %567 = vmatmul.mubr.f32.gmra.mxu0 %v5265_v38  ;;  %v5448_v9 = vld [vmem:[#allocation12 + $0x80] sm:$0xff]  ;;  %v5452_v38 = vld [vmem:[#allocation10 + $0x88] sm:$0xff] }
  0xb6   :  { %4005 = vmatprep.subr.mxu0 %v7288_v0  ;;  %934 = vmatprep.subr.mxu1 %v5426_v14  ;;  %7453 = vst [vmem:[#allocation35_spill] sm:$0xff] %v5448_v9  ;;  %v5454_v14 = vld [vmem:[#allocation12 + $0x78] sm:$0xff] }
  0xb7   :  { %4006 = vmatpush3.msra.mxu0 %v5430_v29  ;;  %935 = vmatpush1.msra.mxu1 %v5432_v18  ;;  %7454 = vst [vmem:[#allocation36_spill] sm:$0xff] %v5454_v14  ;;  %v5458_v18 = vld [vmem:[#allocation12 + $0x68] sm:$0xff] }
  0xb8   :  { %4007 = vmatprep.subr.mxu0 %v7288_v0  ;;  %936 = vmatprep.subr.mxu1 %v5436_v61  ;;  %7455 = vst [vmem:[#allocation37_spill] sm:$0xff] %v5458_v18  ;;  %v5462_v61 = vld [vmem:[#allocation10 + $0x70] sm:$0xff] }
  0xb9   :  { %572 = vmatprep.mubr.f32.mxu0 %v7288_v0  ;;  %4008 = vmatpush3.msra.mxu0 %v5440_v63 }
  0xba   :  { %937 = vmatpush1.msra.mxu1 %v5444_v59  ;;  %573 = vmatmul.mubr.f32.gmra.mxu0 %v5283_v47  ;;  %v5470_v59 = vld [vmem:[#allocation12 + $0x50] sm:$0xff]  ;;  %v5474_v47 = vld [vmem:[#allocation10 + $0x58] sm:$0xff] }
  0xbb   :  { %4009 = vmatprep.subr.mxu0 %v7288_v0  ;;  %938 = vmatprep.subr.mxu1 %v5448_v9  ;;  %7457 = vst [vmem:[#allocation39_spill] sm:$0xff] %v5470_v59  ;;  %v5476_v9 = vld [vmem:[#allocation12 + $0x48] sm:$0xff] }
  0xbc   :  { %4010 = vmatpush3.msra.mxu0 %v5452_v38  ;;  %939 = vmatpush1.msra.mxu1 %v5454_v14  ;;  %7458 = vst [vmem:[#allocation40_spill] sm:$0xff] %v5476_v9  ;;  %v5480_v14 = vld [vmem:[#allocation12 + $0x38] sm:$0xff] }
  0xbd   :  { %4011 = vmatprep.subr.mxu0 %v7288_v0  ;;  %940 = vmatprep.subr.mxu1 %v5458_v18  ;;  %7459 = vst [vmem:[#allocation41_spill] sm:$0xff] %v5480_v14  ;;  %v5484_v18 = vld [vmem:[#allocation10 + $0x40] sm:$0xff] }
  0xbe   :  { %578 = vmatprep.mubr.f32.mxu0 %v7288_v0  ;;  %4012 = vmatpush3.msra.mxu0 %v5462_v61  ;;  %7460 = vst [vmem:[#allocation42_spill] sm:$0xff] %v5484_v18 }
  0xbf   :  { %941 = vmatpush1.msra.mxu1 %v5466_v57  ;;  %579 = vmatmul.mubr.f32.gmra.mxu0 %v5301_v56  ;;  %v5492_v57 = vld [vmem:[#allocation12 + $0x20] sm:$0xff]  ;;  %v5496_v56 = vld [vmem:[#allocation10 + $0x28] sm:$0xff] }
  0xc0   :  { %4013 = vmatprep.subr.mxu0 %v7288_v0  ;;  %942 = vmatprep.subr.mxu1 %v5470_v59  ;;  %7461 = vst [vmem:[#allocation43_spill] sm:$0xff] %v5496_v56  ;;  %v5498_v59 = vld [vmem:[#allocation12 + $0x18] sm:$0xff] }
  0xc1   :  { %4014 = vmatpush3.msra.mxu0 %v5474_v47  ;;  %943 = vmatpush1.msra.mxu1 %v5476_v9  ;;  %7462 = vst [vmem:[#allocation44_spill] sm:$0xff] %v5498_v59  ;;  %v5502_v9 = vld [vmem:[#allocation12 + $0x8] sm:$0xff] }
  0xc2   :  { %4015 = vmatprep.subr.mxu0 %v7288_v0  ;;  %944 = vmatprep.subr.mxu1 %v5480_v14  ;;  %7463 = vst [vmem:[#allocation45_spill] sm:$0xff] %v5502_v9  ;;  %v5506_v14 = vld [vmem:[#allocation10 + $0x10] sm:$0xff] }
  0xc3   :  { %584 = vmatprep.mubr.f32.mxu0 %v7288_v0  ;;  %4016 = vmatpush3.msra.mxu0 %v5484_v18  ;;  %7464 = vst [vmem:[#allocation46_spill] sm:$0xff] %v5506_v14 }
  0xc4   :  { %945 = vmatpush1.msra.mxu1 %v5488_v52  ;;  %585 = vmatmul.mubr.f32.gmra.mxu0 %v5319_v3  ;;  %v5519_v3 = vld [vmem:[#allocation12 + $0x178] sm:$0xff] }
  0xc5   :  { %4017 = vmatprep.subr.mxu0 %v7288_v0  ;;  %946 = vmatprep.subr.mxu1 %v5492_v57 }
  0xc6   :  { %4018 = vmatpush3.msra.mxu0 %v5496_v56  ;;  %947 = vmatpush1.msra.mxu1 %v5498_v59  ;;  %v5524_v59 = vld [vmem:[#allocation12 + $0x160] sm:$0xff] }
  0xc7   :  { %4019 = vmatprep.subr.mxu0 %v7288_v0  ;;  %948 = vmatprep.subr.mxu1 %v5502_v9  ;;  %v5537_v9 = vld [vmem:[#allocation12 + $0x130] sm:$0xff] }
  0xc8   :  { %4020 = vmatpush3.msra.mxu0 %v5506_v14  ;;  %4021 = vmatprep.mubr.msk.f32.mxu0 %vm5106_vm0, %v7288_v0 }
  0xc9   :  { %949 = vmatpush1.msra.mxu1 %v5510_v50  ;;  %982 = vmatprep.mubr.f32.mxu1 %v7288_v0  ;;  %v5531_v50 = vld [vmem:[#allocation12 + $0x148] sm:$0xff] }
  0xca   :  { %4022 = vmatmul.mubr.f32.vlgmr.msra.gmra.mxu0 %v7288_v0  ;;  %983 = vmatmul.mubr.f32.vlgmr.msra.gmra.mxu1 %v7288_v0 }
  0xcb   :  { %4024 = vmatprep.subr.mxu0 %v7288_v0  ;;  %4056 = vmatprep.mubr.msk.f32.mxu0 %vm5106_vm0, %v7288_v0 }
  0xcc   :  { %4025 = vmatpush3.msra.mxu0 %v5519_v3  ;;  %1091 = vmatprep.subr.mxu1 %v5198_v4  ;;  %v5543_v4 = vld [vmem:[#allocation12 + $0x118] sm:$0xff] }
  0xcd   :  { %4026 = vmatprep.subr.mxu0 %v7288_v0  ;;  %1092 = vmatpush1.msra.mxu1 %v5200_v6  ;;  %v5549_v6 = vld [vmem:[#allocation12 + $0x100] sm:$0xff] }
  0xce   :  { %4027 = vmatpush3.msra.mxu0 %v5524_v59  ;;  %1093 = vmatprep.subr.mxu1 %v5204_v8  ;;  %v5555_v8 = vld [vmem:[#allocation12 + $0xe8] sm:$0xff] }
  0xcf   :  { %4028 = vmatprep.subr.mxu0 %v7288_v0  ;;  %1094 = vmatpush1.msra.mxu1 %v5208_v10  ;;  %v5561_v10 = vld [vmem:[#allocation12 + $0xd0] sm:$0xff] }
  0xd0   :  { %4029 = vmatpush3.msra.mxu0 %v5531_v50  ;;  %1095 = vmatprep.subr.mxu1 %v5215_v13  ;;  %v5567_v13 = vld [vmem:[#allocation12 + $0xb8] sm:$0xff] }
  0xd1   :  { %4030 = vmatprep.subr.mxu0 %v7288_v0  ;;  %1096 = vmatpush1.msra.mxu1 %v5218_v15  ;;  %v5573_v15 = vld [vmem:[#allocation12 + $0xa0] sm:$0xff] }
  0xd2   :  { %4031 = vmatpush3.msra.mxu0 %v5537_v9  ;;  %1097 = vmatprep.subr.mxu1 %v5222_v17  ;;  %v5579_v17 = vld [vmem:[#allocation12 + $0x88] sm:$0xff] }
  0xd3   :  { %4032 = vmatprep.subr.mxu0 %v7288_v0  ;;  %1098 = vmatpush1.msra.mxu1 %v5226_v19  ;;  %v5585_v19 = vld [vmem:[#allocation12 + $0x70] sm:$0xff] }
  0xd4   :  { %4033 = vmatpush3.msra.mxu0 %v5543_v4  ;;  %1099 = vmatprep.subr.mxu1 %v5233_v22  ;;  %v5591_v22 = vld [vmem:[#allocation12 + $0x58] sm:$0xff] }
  0xd5   :  { %4034 = vmatprep.subr.mxu0 %v7288_v0  ;;  %1100 = vmatpush1.msra.mxu1 %v5236_v24  ;;  %v5597_v24 = vld [vmem:[#allocation12 + $0x40] sm:$0xff] }
  0xd6   :  { %4035 = vmatpush3.msra.mxu0 %v5549_v6  ;;  %1101 = vmatprep.subr.mxu1 %v5240_v26  ;;  %v5603_v26 = vld [vmem:[#allocation12 + $0x28] sm:$0xff] }
  0xd7   :  { %4036 = vmatprep.subr.mxu0 %v7288_v0  ;;  %1102 = vmatpush1.msra.mxu1 %v5244_v28  ;;  %v5609_v28 = vld [vmem:[#allocation12 + $0x10] sm:$0xff] }
  0xd8   :  { %4037 = vmatpush3.msra.mxu0 %v5555_v8  ;;  %1103 = vmatprep.subr.mxu1 %v5251_v31  ;;  %v222_v31 = vlaneseq }
  0xd9   :  { %4038 = vmatprep.subr.mxu0 %v7288_v0  ;;  %1104 = vmatpush1.msra.mxu1 %v5254_v33 }
  0xda   :  { %4039 = vmatpush3.msra.mxu0 %v5561_v10  ;;  %1105 = vmatprep.subr.mxu1 %v5258_v35  ;;  %v5657_v33 = vshrl.u32 %v222_v31, 7 }
  0xdb   :  { %4040 = vmatprep.subr.mxu0 %v7288_v0  ;;  %1106 = vmatpush1.msra.mxu1 %v5262_v37  ;;  %v5660_v37 = vld [vmem:[#allocation9] sm:$0x3f] }
  0xdc   :  { %4041 = vmatpush3.msra.mxu0 %v5567_v13  ;;  %1107 = vmatprep.subr.mxu1 %v5269_v40  ;;  %v236_v35 = vsub.s32 3, %v5657_v33 }
  0xdd   :  { %4042 = vmatprep.subr.mxu0 %v7288_v0  ;;  %1108 = vmatpush1.msra.mxu1 %v5272_v42 }
  0xde   :  { %4043 = vmatpush3.msra.mxu0 %v5573_v15  ;;  %1109 = vmatprep.subr.mxu1 %v5276_v44  ;;  %v5663_v40 = vrot.slane %v5660_v37, %v236_v35 }
  0xdf   :  { %4044 = vmatprep.subr.mxu0 %v7288_v0  ;;  %1110 = vmatpush1.msra.mxu1 %v5280_v46  ;;  %v224_v46 = vsub.s32 0, %v5657_v33 }
  0xe0   :  { %4045 = vmatpush3.msra.mxu0 %v5579_v17  ;;  %1111 = vmatprep.subr.mxu1 %v5287_v49  ;;  %v232_v49 = vsub.s32 2, %v5657_v33 }
  0xe1   :  { %4046 = vmatprep.subr.mxu0 %v7288_v0  ;;  %1112 = vmatpush1.msra.mxu1 %v5290_v51 }
  0xe2   :  { %4047 = vmatpush3.msra.mxu0 %v5585_v19  ;;  %1113 = vmatprep.subr.mxu1 %v5294_v53 }
  0xe3   :  { %4048 = vmatprep.subr.mxu0 %v7288_v0  ;;  %1114 = vmatpush1.msra.mxu1 %v5298_v55  ;;  %v228_v55 = vsub.s32 1, %v5657_v33 }
  0xe4   :  { %4049 = vmatpush3.msra.mxu0 %v5591_v22  ;;  %1115 = vmatprep.subr.mxu1 %v5305_v58 }
  0xe5   :  { %4050 = vmatprep.subr.mxu0 %v7288_v0  ;;  %1116 = vmatpush1.msra.mxu1 %v5308_v60  ;;  %v225_v60 = vrot.slane %v5660_v37, %v224_v46 }
  0xe6   :  { %4051 = vmatpush3.msra.mxu0 %v5597_v24  ;;  %1117 = vmatprep.subr.mxu1 %v5312_v62  ;;  %v5679_v62 = vrot.slane %v5660_v37, %v232_v49 }
  0xe7   :  { %4052 = vmatprep.subr.mxu0 %v7288_v0  ;;  %1118 = vmatpush1.msra.mxu1 %v5316_v1 }
  0xe8   :  { %4053 = vmatpush3.msra.mxu0 %v5603_v26  ;;  %1119 = vmatprep.subr.mxu1 %v5323_v7 }
  0xe9   :  { %4054 = vmatprep.subr.mxu0 %v7288_v0  ;;  %1120 = vmatpush1.msra.mxu1 %v5326_v12  ;;  %v5682_v12 = vrot.slane %v5660_v37, %v228_v55 }
  0xea   :  { %4055 = vmatpush3.msra.mxu0 %v5609_v28  ;;  %1121 = vmatprep.subr.mxu1 %v5330_v16 }
  0xeb   :  { %4057 = vmatmul.mubr.f32.vlgmr.msra.gmra.mxu0 %v7288_v0  ;;  %4059 = vmatprep.subr.mxu0 %v7288_v0 }
  0xec   :  { %4060 = vmatpush3.msra.mxu0 %v5342_v25  ;;  %1122 = vmatpush1.msra.mxu1 %v5334_v21 }
  0xed   :  { %4061 = vmatprep.subr.mxu0 %v7288_v0  ;;  %1155 = vmatprep.mubr.f32.mxu1 %v7288_v0 }
  0xee   :  { %4062 = vmatpush3.msra.mxu0 %v5352_v32  ;;  %4091 = vmatprep.mubr.msk.f32.mxu0 %vm5106_vm0, %v7288_v0 }
  0xef   :  { %4063 = vmatprep.subr.mxu0 %v7288_v0  ;;  %1253 = vmatprep.subr.mxu1 %v5338_v23 }
  0xf0   :  { %4064 = vmatpush3.msra.mxu0 %v5364_v36 }
  0xf1   :  { %4065 = vmatprep.subr.mxu0 %v7288_v0 }
  0xf2   :  { %4066 = vmatpush3.msra.mxu0 %v5374_v43 }
  0xf3   :  { %4067 = vmatprep.subr.mxu0 %v7288_v0 }
  0xf4   :  { %4068 = vmatpush3.msra.mxu0 %v5386_v11 }
  0xf5   :  { %4069 = vmatprep.subr.mxu0 %v7288_v0 }
  0xf6   :  { %4070 = vmatpush3.msra.mxu0 %v5396_v54 }
  0xf7   :  { %4071 = vmatprep.subr.mxu0 %v7288_v0 }
  0xf8   :  { %4072 = vmatpush3.msra.mxu0 %v5408_v20 }
  0xf9   :  { %4073 = vmatprep.subr.mxu0 %v7288_v0 }
  0xfa   :  { %4074 = vmatpush3.msra.mxu0 %v5418_v5 }
  0xfb   :  { %4075 = vmatprep.subr.mxu0 %v7288_v0 }
  0xfc   :  { %4076 = vmatpush3.msra.mxu0 %v5430_v29 }
  0xfd   :  { %4077 = vmatprep.subr.mxu0 %v7288_v0 }
  0xfe   :  { %4078 = vmatpush3.msra.mxu0 %v5440_v63 }
  0xff   :  { %4079 = vmatprep.subr.mxu0 %v7288_v0 }
 0x100   :  { %4080 = vmatpush3.msra.mxu0 %v5452_v38 }
 0x101   :  { %4081 = vmatprep.subr.mxu0 %v7288_v0 }
 0x102   :  { %4082 = vmatpush3.msra.mxu0 %v5462_v61 }
 0x103   :  { %4083 = vmatprep.subr.mxu0 %v7288_v0 }
 0x104   :  { %4084 = vmatpush3.msra.mxu0 %v5474_v47 }
 0x105   :  { %4085 = vmatprep.subr.mxu0 %v7288_v0 }
 0x106   :  { %4086 = vmatpush3.msra.mxu0 %v5484_v18 }
 0x107   :  { %4087 = vmatprep.subr.mxu0 %v7288_v0 }
 0x108   :  { %4088 = vmatpush3.msra.mxu0 %v5496_v56 }
 0x109   :  { %4089 = vmatprep.subr.mxu0 %v7288_v0 }
 0x10a   :  { %4090 = vmatpush3.msra.mxu0 %v5506_v14 }
 0x10b   :  { %4094 = vmatprep.subr.mxu0 %v7288_v0 }
 0x131   :  { %v5665_v42 = vpop.f32.mrf.mxu0  ;;  %v5667_v44 = vpop.f32.mrf.mxu1 }
 0x133   :  { %v5671_v51 = vpop.f32.mrf.mxu0  ;;  %v433_v53 = vpop.f32.mrf.mxu1 }
 0x134   :  { %v5675_v58 = vadd.f32 %v433_v53, %v5663_v40 }
 0x136   :  { %7466 = vst [vmem:[#allocation48_spill] sm:$0xff] %v5675_v58 }
 0x137   :  { %v324_v1 = vpop.f32.mrf.mxu0  ;;  %v437_v7 = vpop.f32.mrf.mxu1 }
 0x138   :  { %v5684_v16 = vadd.f32 %v324_v1, %v225_v60  ;;  %v5687_v21 = vadd.f32 %v437_v7, %v5679_v62 }
 0x139   :  { %v326_v23 = vpop.f32.mrf.mxu0  ;;  %v439_v31 = vpop.f32.mrf.mxu1 }
 0x13a   :  { %7467 = vst [vmem:[#allocation49_spill] sm:$0xff] %v5684_v16  ;;  %7468 = vst [vmem:[#allocation50_spill] sm:$0xff] %v5687_v21  ;;  %v5690_v35 = vadd.f32 %v326_v23, %v5682_v12  ;;  %v5693_v46 = vadd.f32 %v439_v31, %v5663_v40 }
 0x13c   :  { %7469 = vst [vmem:[#allocation51_spill] sm:$0xff] %v5690_v35  ;;  %7470 = vst [vmem:[#allocation52_spill] sm:$0xff] %v5693_v46 }
 0x13d   :  { %v330_v49 = vpop.f32.mrf.mxu0  ;;  %v443_v53 = vpop.f32.mrf.mxu1 }
 0x13e   :  { %v5695_v0 = vadd.f32 %v330_v49, %v225_v60  ;;  %v5698_v55 = vadd.f32 %v443_v53, %v5679_v62 }
 0x13f   :  { %v332_v1 = vpop.f32.mrf.mxu0  ;;  %v445_v58 = vpop.f32.mrf.mxu1 }
 0x140   :  { %7471 = vst [vmem:[#allocation53_spill] sm:$0xff] %v5695_v0  ;;  %7472 = vst [vmem:[#allocation54_spill] sm:$0xff] %v5698_v55  ;;  %v5701_v7 = vadd.f32 %v332_v1, %v5682_v12  ;;  %v5704_v21 = vadd.f32 %v445_v58, %v5663_v40 }
 0x142   :  { %7473 = vst [vmem:[#allocation55_spill] sm:$0xff] %v5701_v7  ;;  %7474 = vst [vmem:[#allocation56_spill] sm:$0xff] %v5704_v21 }
 0x143   :  { %v336_v23 = vpop.f32.mrf.mxu0  ;;  %v449_v35 = vpop.f32.mrf.mxu1 }
 0x144   :  { %v5706_v16 = vadd.f32 %v336_v23, %v225_v60  ;;  %v5709_v31 = vadd.f32 %v449_v35, %v5679_v62 }
 0x145   :  { %v338_v49 = vpop.f32.mrf.mxu0  ;;  %v451_v46 = vpop.f32.mrf.mxu1 }
 0x146   :  { %7475 = vst [vmem:[#allocation57_spill] sm:$0xff] %v5706_v16  ;;  %7476 = vst [vmem:[#allocation58_spill] sm:$0xff] %v5709_v31  ;;  %v5712_v53 = vadd.f32 %v338_v49, %v5682_v12  ;;  %v5715_v55 = vadd.f32 %v451_v46, %v5663_v40 }
 0x148   :  { %7477 = vst [vmem:[#allocation59_spill] sm:$0xff] %v5712_v53  ;;  %7478 = vst [vmem:[#allocation60_spill] sm:$0xff] %v5715_v55 }
 0x149   :  { %v342_v1 = vpop.f32.mrf.mxu0  ;;  %v455_v7 = vpop.f32.mrf.mxu1 }
 0x14a   :  { %v5717_v0 = vadd.f32 %v342_v1, %v225_v60  ;;  %v5720_v58 = vadd.f32 %v455_v7, %v5679_v62 }
 0x14b   :  { %v344_v23 = vpop.f32.mrf.mxu0  ;;  %v457_v21 = vpop.f32.mrf.mxu1 }
 0x14c   :  { %7479 = vst [vmem:[#allocation61_spill] sm:$0xff] %v5717_v0  ;;  %7480 = vst [vmem:[#allocation62_spill] sm:$0xff] %v5720_v58  ;;  %v5723_v35 = vadd.f32 %v344_v23, %v5682_v12  ;;  %v5726_v31 = vadd.f32 %v457_v21, %v5663_v40 }
 0x14e   :  { %7481 = vst [vmem:[#allocation63_spill] sm:$0xff] %v5723_v35  ;;  %7482 = vst [vmem:[#allocation64_spill] sm:$0xff] %v5726_v31 }
 0x14f   :  { %v348_v49 = vpop.f32.mrf.mxu0  ;;  %v461_v53 = vpop.f32.mrf.mxu1 }
 0x150   :  { %v5728_v16 = vadd.f32 %v348_v49, %v225_v60  ;;  %v5731_v46 = vadd.f32 %v461_v53, %v5679_v62 }
 0x151   :  { %v350_v1 = vpop.f32.mrf.mxu0  ;;  %v463_v55 = vpop.f32.mrf.mxu1 }
 0x152   :  { %7483 = vst [vmem:[#allocation65_spill] sm:$0xff] %v5728_v16  ;;  %7484 = vst [vmem:[#allocation66_spill] sm:$0xff] %v5731_v46  ;;  %v5734_v7 = vadd.f32 %v350_v1, %v5682_v12  ;;  %v5737_v58 = vadd.f32 %v463_v55, %v5663_v40  ;;  %v240_v1 = vsub.s32 4, %v5657_v33 }
 0x154   :  { %7485 = vst [vmem:[#allocation67_spill] sm:$0xff] %v5734_v7  ;;  %7486 = vst [vmem:[#allocation68_spill] sm:$0xff] %v5737_v58 }
 0x155   :  { %v354_v23 = vpop.f32.mrf.mxu0  ;;  %v467_v35 = vpop.f32.mrf.mxu1 }
 0x156   :  { %v5739_v0 = vadd.f32 %v354_v23, %v225_v60  ;;  %v5742_v21 = vadd.f32 %v467_v35, %v5679_v62  ;;  %v244_v35 = vsub.s32 5, %v5657_v33 }
 0x157   :  { %v356_v49 = vpop.f32.mrf.mxu0  ;;  %v469_v16 = vpop.f32.mrf.mxu1 }
 0x158   :  { %7487 = vst [vmem:[#allocation69_spill] sm:$0xff] %v5739_v0  ;;  %7488 = vst [vmem:[#allocation70_spill] sm:$0xff] %v5742_v21  ;;  %v5745_v53 = vadd.f32 %v356_v49, %v5682_v12  ;;  %v5748_v46 = vadd.f32 %v469_v16, %v5663_v40  ;;  %v5761_v49 = vrot.slane %v5660_v37, %v240_v1 }
 0x159   :  { %v319_v16 = vadd.f32 %v5665_v42, %v225_v60 }
 0x15a   :  { %7489 = vst [vmem:[#allocation71_spill] sm:$0xff] %v5745_v53  ;;  %7490 = vst [vmem:[#allocation72_spill] sm:$0xff] %v5748_v46  ;;  %v5765_v53 = vrot.slane %v5660_v37, %v244_v35 }
 0x15b   :  { %v360_v7 = vpop.f32.mrf.mxu0  ;;  %v473_v55 = vpop.f32.mrf.mxu1 }
 0x15c   :  { %v5751_v31 = vadd.f32 %v360_v7, %v225_v60  ;;  %v5754_v23 = vadd.f32 %v473_v55, %v5679_v62 }
 0x15d   :  { %v362_v21 = vpop.f32.mrf.mxu0  ;;  %v475_v0 = vpop.f32.mrf.mxu1 }
 0x15e   :  { %7491 = vst [vmem:[#allocation73_spill] sm:$0xff] %v5751_v31  ;;  %7492 = vst [vmem:[#allocation74_spill] sm:$0xff] %v5754_v23  ;;  %v5758_v58 = vadd.f32 %v362_v21, %v5682_v12 }
 0x160   :  { %7493 = vst [vmem:[#allocation75_spill] sm:$0xff] %v5758_v58 }
 0x161   :  { %v544_v7 = vpop.f32.mrf.mxu0  ;;  %v822_v31 = vpop.f32.mrf.mxu1 }
 0x162   :  { %v5768_v55 = vadd.f32 %v544_v7, %v5761_v49  ;;  %v897_v23 = vadd.f32 %v822_v31, %v319_v16 }
 0x163   :  { %v546_v33 = vpop.f32.mrf.mxu0 }
 0x164   :  { %7494 = vst [vmem:[#allocation76_spill] sm:$0xff] %v5768_v55  ;;  %v5771_v46 = vadd.f32 %v546_v33, %v5765_v53  ;;  %v3628_v21 = vmul.f32 -1.442695, %v897_v23  ;;  %v824_v33 = vpop.f32.mrf.mxu1 }
 0x166   :  { %7495 = vst [vmem:[#allocation77_spill] sm:$0xff] %v5771_v46  ;;  %v550_v58 = vpop.f32.mrf.mxu0  ;;  %4565 = vpow2.f32 %v3628_v21 }
 0x167   :  { %v5774_v1 = vadd.f32 %v550_v58, %v5761_v49 }
 0x168   :  { %v552_v14 = vpop.f32.mrf.mxu0 }
 0x169   :  { %7496 = vst [vmem:[#allocation78_spill] sm:$0xff] %v5774_v1  ;;  %v5777_v37 = vadd.f32 %v552_v14, %v5765_v53  ;;  %v321_v14 = vadd.f32 %v5671_v51, %v5682_v12 }
 0x16b   :  { %7497 = vst [vmem:[#allocation79_spill] sm:$0xff] %v5777_v37  ;;  %v556_v42 = vpop.f32.mrf.mxu0  ;;  %v904_v55 = vadd.f32 %v824_v33, %v321_v14 }
 0x16c   :  { %v5780_v60 = vadd.f32 %v556_v42, %v5761_v49 }
 0x16d   :  { %v558_v35 = vpop.f32.mrf.mxu0 }
 0x16e   :  { %7498 = vst [vmem:[#allocation80_spill] sm:$0xff] %v5780_v60  ;;  %v5783_v31 = vadd.f32 %v558_v35, %v5765_v53 }
 0x170   :  { %7499 = vst [vmem:[#allocation81_spill] sm:$0xff] %v5783_v31  ;;  %v562_v16 = vpop.f32.mrf.mxu0  ;;  %v3629_v31 = vmul.f32 -1.442695, %v904_v55  ;;  %v5814_v55 = vld [vmem:[%s7261_s5] ss:$0 sm:$0xff] }
 0x171   :  { %v5786_v23 = vadd.f32 %v562_v16, %v5761_v49  ;;  %7508 = vst [vmem:[#allocation90_spill] sm:$0xff] %v5814_v55 }
 0x172   :  { %v564_v7 = vpop.f32.mrf.mxu0 }
 0x173   :  { %7500 = vst [vmem:[#allocation82_spill] sm:$0xff] %v5786_v23  ;;  %v5789_v58 = vadd.f32 %v564_v7, %v5765_v53  ;;  %v4566_v46 = vpop.eup %4565 }
 0x174   :  { %v901_v16 = vadd.f32 1.0, %v4566_v46 }
 0x175   :  { %7501 = vst [vmem:[#allocation83_spill] sm:$0xff] %v5789_v58  ;;  %v568_v21 = vpop.f32.mrf.mxu0 }
 0x176   :  { %v5794_v42 = vadd.f32 %v568_v21, %v5761_v49  ;;  %4567 = vrcp.f32 %v901_v16 }
 0x177   :  { %v570_v35 = vpop.f32.mrf.mxu0  ;;  %4569 = vpow2.f32 %v3629_v31 }
 0x178   :  { %7502 = vst [vmem:[#allocation84_spill] sm:$0xff] %v5794_v42  ;;  %v5797_v37 = vadd.f32 %v570_v35, %v5765_v53 }
 0x17a   :  { %7503 = vst [vmem:[#allocation85_spill] sm:$0xff] %v5797_v37  ;;  %v574_v1 = vpop.f32.mrf.mxu0 }
 0x17b   :  { %v5800_v7 = vadd.f32 %v574_v1, %v5761_v49  ;;  %v476_v1 = vadd.f32 %v475_v0, %v5663_v40 }
 0x17c   :  { %v576_v60 = vpop.f32.mrf.mxu0 }
 0x17d   :  { %7504 = vst [vmem:[#allocation86_spill] sm:$0xff] %v5800_v7  ;;  %v5803_v51 = vadd.f32 %v576_v60, %v5765_v53 }
 0x17f   :  { %7505 = vst [vmem:[#allocation87_spill] sm:$0xff] %v5803_v51  ;;  %v580_v12 = vpop.f32.mrf.mxu0 }
 0x180   :  { %v5806_v21 = vadd.f32 %v580_v12, %v5761_v49 }
 0x181   :  { %v582_v33 = vpop.f32.mrf.mxu0 }
 0x182   :  { %7506 = vst [vmem:[#allocation88_spill] sm:$0xff] %v5806_v21  ;;  %v5809_v14 = vadd.f32 %v582_v33, %v5765_v53  ;;  %v432_v33 = vadd.f32 %v5667_v44, %v5679_v62 }
 0x183   :  { %v4568_v60 = vpop.eup %4567 }
 0x184   :  { %7507 = vst [vmem:[#allocation89_spill] sm:$0xff] %v5809_v14  ;;  %v586_v46 = vpop.f32.mrf.mxu0  ;;  %v4570_v23 = vpop.eup %4569 }
 0x185   :  { %v908_v7 = vadd.f32 1.0, %v4570_v23  ;;  %v587_v0 = vadd.f32 %v586_v46, %v5761_v49  ;;  %v7510_v49 = vmov 0.0   ;;  %v7519_v46 = vld [vmem:[#allocation32_spill] sm:$0xff] }
 0x186   :  { %v588_v35 = vpop.f32.mrf.mxu0 }
 0x18a   :  { %v893_v16 = vpop.f32.mrf.mxu0  ;;  %v984_v31 = vpop.f32.mrf.mxu1 }
 0x18b   :  { %v911_v58 = vadd.f32 %v5814_v55, %v893_v16  ;;  %v1059_v12 = vadd.f32 %v984_v31, %v476_v1 }
 0x18c   :  { %v4023_v37 = vpop.f32.mrf.mxu0  ;;  %v986_v21 = vpop.f32.mrf.mxu1 }
 0x18d   :  { %v912_v42 = vmul.f32 %v4568_v60, %v911_v58  ;;  %v3630_v51 = vmul.f32 -1.442695, %v1059_v12  ;;  %v1066_v40 = vadd.f32 %v986_v21, %v587_v0  ;;  %v7511_v58 = vld [vmem:[#allocation24_spill] sm:$0xff]  ;;  %v7517_v21 = vld [vmem:[#allocation30_spill] sm:$0xff]  ;;  %v7522_v12 = vld [vmem:[#allocation35_spill] sm:$0xff] }
 0x18e   :  { %v7521_v60 = vld [vmem:[#allocation34_spill] sm:$0xff]  ;;  %v7524_v0 = vld [vmem:[#allocation37_spill] sm:$0xff] }
 0x18f   :  { %v913_v14 = vadd.f32 %v912_v42, %v432_v33  ;;  %4571 = vpow2.f32 %v3630_v51  ;;  %v3631_v18 = vmul.f32 -1.442695, %v1066_v40  ;;  %v7516_v51 = vld [vmem:[#allocation29_spill] sm:$0xff]  ;;  %v7523_v33 = vld [vmem:[#allocation36_spill] sm:$0xff]  ;;  %v7525_v40 = vld [vmem:[#allocation38_spill] sm:$0xff] }
 0x191   :  { %4573 = vtanh.f32 %v913_v14  ;;  %v7518_v14 = vld [vmem:[#allocation31_spill] sm:$0xff] }
 0x192   :  { %4575 = vrcp.f32 %v908_v7  ;;  %v7513_v7 = vld [vmem:[#allocation26_spill] sm:$0xff] }
 0x19c   :  { %v4572_v56 = vpop.eup %4571 }
 0x19d   :  { %v1063_v16 = vadd.f32 1.0, %v4572_v56 }
 0x19e   :  { %v4574_v1 = vpop.eup %4573 }
 0x19f   :  { %4577 = vrcp.f32 %v1063_v16  ;;  %v915_v37 = vsub.f32 0.0, %v4574_v1  ;;  %v4576_v31 = vpop.eup %4575  ;;  %v7526_v16 = vld [vmem:[#allocation39_spill] sm:$0xff] }
 0x1a0   :  { %4579 = vpow2.f32 %v3631_v18  ;;  %v5836_v18 = vld [vmem:[%s7262_s6] ss:$0 sm:$0xff] }
 0x1a1   :  { %v916_v44 = vmul.f32 %v4576_v31, %v915_v37  ;;  %v7528_v31 = vld [vmem:[#allocation41_spill] sm:$0xff] }
 0x1a3   :  { %v5821_v62 = vadd.f32 %v4574_v1, %v916_v44  ;;  %v7527_v1 = vld [vmem:[#allocation40_spill] sm:$0xff] }
 0x1a5   :  { %7509 = vst [vmem:[#allocation91_spill] sm:$0xff] %v5821_v62  ;;  %1156 = vmatmul.mubr.f32.vlgmr.msra.gmra.mxu1 %v5821_v62  ;;  %4092 = vmatmul.mubr.f32.vlgmr.msra.gmra.mxu0 %v5821_v62 }
 0x1a6   :  { %1254 = vmatpush1.msra.mxu1 %v5344_v27  ;;  %4095 = vmatpush3.msra.mxu0 %v5519_v3 }
 0x1a7   :  { %1255 = vmatprep.subr.mxu1 %v5348_v30  ;;  %4096 = vmatprep.subr.mxu0 %v7510_v49 }
 0x1a8   :  { %1256 = vmatpush1.msra.mxu1 %v5356_v34  ;;  %4097 = vmatpush3.msra.mxu0 %v5524_v59 }
 0x1a9   :  { %1257 = vmatprep.subr.mxu1 %v5360_v2  ;;  %4098 = vmatprep.subr.mxu0 %v7510_v49 }
 0x1aa   :  { %1258 = vmatpush1.msra.mxu1 %v5366_v39  ;;  %4099 = vmatpush3.msra.mxu0 %v5531_v50  ;;  %v589_v39 = vadd.f32 %v588_v35, %v5765_v53  ;;  %v7515_v53 = vld [vmem:[#allocation28_spill] sm:$0xff]  ;;  %v7520_v35 = vld [vmem:[#allocation33_spill] sm:$0xff] }
 0x1ab   :  { %v1055_v27 = vpop.f32.mrf.mxu0  ;;  %1259 = vmatprep.subr.mxu1 %v5370_v41  ;;  %4100 = vmatprep.subr.mxu0 %v7510_v49  ;;  %v7512_v41 = vld [vmem:[#allocation25_spill] sm:$0xff] }
 0x1ac   :  { %v4578_v30 = vpop.eup %4577  ;;  %v1073_v34 = vadd.f32 %v5836_v18, %v1055_v27  ;;  %1260 = vmatpush1.msra.mxu1 %v5378_v45  ;;  %4101 = vmatpush3.msra.mxu0 %v5537_v9 }
 0x1ad   :  { %v4580_v2 = vpop.eup %4579  ;;  %v4058_v56 = vpop.f32.mrf.mxu0  ;;  %1261 = vmatprep.subr.mxu1 %v5382_v48  ;;  %4102 = vmatprep.subr.mxu0 %v7510_v49  ;;  %v7514_v48 = vld [vmem:[#allocation27_spill] sm:$0xff] }
 0x1ae   :  { %v1074_v23 = vmul.f32 %v4578_v30, %v1073_v34  ;;  %1262 = vmatpush1.msra.mxu1 %v7511_v58  ;;  %4103 = vmatpush3.msra.mxu0 %v5543_v4  ;;  %v1070_v45 = vadd.f32 1.0, %v4580_v2  ;;  %v7529_v30 = vld [vmem:[#allocation44_spill] sm:$0xff]  ;;  %v7530_v2 = vld [vmem:[#allocation45_spill] sm:$0xff]  ;;  %v7531_v56 = vld [vmem:[#allocation47_spill] sm:$0xff] }
 0x1af   :  { %1263 = vmatprep.subr.mxu1 %v7512_v41  ;;  %4104 = vmatprep.subr.mxu0 %v7510_v49  ;;  %v5913_v58 = vld [vmem:[#allocation10 + $0x150] sm:$0xff]  ;;  %v5917_v41 = vld [vmem:[#allocation10 + $0x140] sm:$0xff] }
 0x1b0   :  { %v1075_v42 = vadd.f32 %v1074_v23, %v589_v39  ;;  %1264 = vmatpush1.msra.mxu1 %v7513_v7  ;;  %4105 = vmatpush3.msra.mxu0 %v5549_v6  ;;  %v5905_v39 = vld [vmem:[#allocation10 + $0x168] sm:$0xff]  ;;  %v5909_v23 = vld [vmem:[#allocation10 + $0x158] sm:$0xff] }
 0x1b1   :  { %1265 = vmatprep.subr.mxu1 %v7514_v48  ;;  %4106 = vmatprep.subr.mxu0 %v7510_v49  ;;  %v5937_v7 = vld [vmem:[#allocation10 + $0x108] sm:$0xff]  ;;  %v5945_v48 = vld [vmem:[#allocation10 + $0xf0] sm:$0xff] }
 0x1b2   :  { %4581 = vtanh.f32 %v1075_v42  ;;  %1266 = vmatpush1.msra.mxu1 %v7515_v53  ;;  %4107 = vmatpush3.msra.mxu0 %v5555_v8  ;;  %v5929_v42 = vld [vmem:[#allocation10 + $0x120] sm:$0xff]  ;;  %7536 = vst [vmem:[#allocation28_spill] sm:$0xff] %v5937_v7  ;;  %7538 = vst [vmem:[#allocation30_spill] sm:$0xff] %v5945_v48  ;;  %v5953_v53 = vld [vmem:[#allocation10 + $0xd8] sm:$0xff] }
 0x1b3   :  { %1267 = vmatprep.subr.mxu1 %v7516_v51  ;;  %4108 = vmatprep.subr.mxu0 %v7510_v49  ;;  %4583 = vrcp.f32 %v1070_v45  ;;  %v5921_v45 = vld [vmem:[#allocation10 + $0x138] sm:$0xff]  ;;  %7534 = vst [vmem:[#allocation26_spill] sm:$0xff] %v5929_v42  ;;  %7540 = vst [vmem:[#allocation32_spill] sm:$0xff] %v5953_v53  ;;  %v5961_v51 = vld [vmem:[#allocation10 + $0xc0] sm:$0xff] }
 0x1b4   :  { %1268 = vmatpush1.msra.mxu1 %v7517_v21  ;;  %4109 = vmatpush3.msra.mxu0 %v5561_v10  ;;  %7542 = vst [vmem:[#allocation34_spill] sm:$0xff] %v5961_v51  ;;  %v5969_v21 = vld [vmem:[#allocation10 + $0xa8] sm:$0xff] }
 0x1b5   :  { %1269 = vmatprep.subr.mxu1 %v7518_v14  ;;  %4110 = vmatprep.subr.mxu0 %v7510_v49  ;;  %7544 = vst [vmem:[#allocation36_spill] sm:$0xff] %v5969_v21  ;;  %v5977_v14 = vld [vmem:[#allocation10 + $0x90] sm:$0xff] }
 0x1b6   :  { %1270 = vmatpush1.msra.mxu1 %v7519_v46  ;;  %4111 = vmatpush3.msra.mxu0 %v5567_v13  ;;  %7546 = vst [vmem:[#allocation38_spill] sm:$0xff] %v5977_v14  ;;  %v5985_v46 = vld [vmem:[#allocation10 + $0x78] sm:$0xff] }
 0x1b7   :  { %1271 = vmatprep.subr.mxu1 %v7520_v35  ;;  %4112 = vmatprep.subr.mxu0 %v7510_v49  ;;  %7548 = vst [vmem:[#allocation40_spill] sm:$0xff] %v5985_v46  ;;  %v5993_v35 = vld [vmem:[#allocation10 + $0x60] sm:$0xff] }
 0x1b8   :  { %1272 = vmatpush1.msra.mxu1 %v7521_v60  ;;  %4113 = vmatpush3.msra.mxu0 %v5573_v15  ;;  %7550 = vst [vmem:[#allocation44_spill] sm:$0xff] %v5993_v35  ;;  %v6001_v60 = vld [vmem:[#allocation10 + $0x48] sm:$0xff] }
 0x1b9   :  { %1273 = vmatprep.subr.mxu1 %v7522_v12  ;;  %4114 = vmatprep.subr.mxu0 %v7510_v49  ;;  %7552 = vst [vmem:[#allocation47_spill] sm:$0xff] %v6001_v60  ;;  %v6009_v12 = vld [vmem:[#allocation10 + $0x30] sm:$0xff] }
 0x1ba   :  { %1274 = vmatpush1.msra.mxu1 %v7523_v33  ;;  %4115 = vmatpush3.msra.mxu0 %v5579_v17  ;;  %7554 = vst [vmem:[#allocation93_spill] sm:$0xff] %v6009_v12  ;;  %v6013_v33 = vld [vmem:[#allocation10 + $0x20] sm:$0xff] }
 0x1bb   :  { %1275 = vmatprep.subr.mxu1 %v7524_v0  ;;  %4116 = vmatprep.subr.mxu0 %v7510_v49  ;;  %v6017_v0 = vld [vmem:[#allocation10 + $0x18] sm:$0xff] }
 0x1bc   :  { %1276 = vmatpush1.msra.mxu1 %v7525_v40  ;;  %4117 = vmatpush3.msra.mxu0 %v5585_v19  ;;  %7557 = vst [vmem:[#allocation94_spill] sm:$0xff] %v6017_v0  ;;  %v6021_v40 = vld [vmem:[#allocation10 + $0x8] sm:$0xff] }
 0x1bd   :  { %1277 = vmatprep.subr.mxu1 %v7526_v16  ;;  %4118 = vmatprep.subr.mxu0 %v7510_v49  ;;  %v6025_v16 = vld [vmem:[#allocation10] sm:$0xff] }
 0x1be   :  { %1278 = vmatpush1.msra.mxu1 %v7527_v1  ;;  %4119 = vmatpush3.msra.mxu0 %v5591_v22  ;;  %7560 = vst [vmem:[#allocation95_spill] sm:$0xff] %v6025_v16  ;;  %v7561_v1 = vld [vmem:[#allocation46_spill] sm:$0xff] }
 0x1bf   :  { %v4582_v37 = vpop.eup %4581  ;;  %1279 = vmatprep.subr.mxu1 %v7528_v31  ;;  %4120 = vmatprep.subr.mxu0 %v7510_v49 }
 0x1c0   :  { %1280 = vmatpush1.msra.mxu1 %v5488_v52  ;;  %4121 = vmatpush3.msra.mxu0 %v5597_v24  ;;  %v1077_v44 = vsub.f32 0.0, %v4582_v37  ;;  %v4584_v27 = vpop.eup %4583 }
 0x1c1   :  { %1281 = vmatprep.subr.mxu1 %v5492_v57  ;;  %4122 = vmatprep.subr.mxu0 %v7510_v49  ;;  %v5901_v57 = vld [vmem:[#allocation10 + $0x170] sm:$0xff] }
 0x1c2   :  { %1282 = vmatpush1.msra.mxu1 %v7529_v30  ;;  %4123 = vmatpush3.msra.mxu0 %v5603_v26  ;;  %v1078_v34 = vmul.f32 %v4584_v27, %v1077_v44  ;;  %v7563_v27 = vld [vmem:[#allocation49_spill] sm:$0xff] }
 0x1c3   :  { %1283 = vmatprep.subr.mxu1 %v7530_v2  ;;  %4124 = vmatprep.subr.mxu0 %v7510_v49 }
 0x1c4   :  { %1284 = vmatpush1.msra.mxu1 %v7531_v56  ;;  %1317 = vmatprep.mubr.f32.mxu1 %v7510_v49  ;;  %v5894_v52 = vadd.f32 %v4582_v37, %v1078_v34  ;;  %v6032_v37 = vld [vmem:[#allocation12 + $0x170] sm:$0xff] }
 0x1c5   :  { %4125 = vmatpush3.msra.mxu0 %v5609_v28  ;;  %4126 = vmatprep.mubr.msk.f32.mxu0 %vm5106_vm0, %v7510_v49  ;;  %7562 = vst [vmem:[#allocation46_spill] sm:$0xff] %v6032_v37 }
 0x1c6   :  { %7532 = vst [vmem:[#allocation24_spill] sm:$0xff] %v5894_v52  ;;  %1318 = vmatmul.mubr.f32.vlgmr.msra.gmra.mxu1 %v5894_v52  ;;  %4127 = vmatmul.mubr.f32.vlgmr.msra.gmra.mxu0 %v5894_v52 }
 0x1c7   :  { %1427 = vmatprep.subr.mxu1 %v5901_v57  ;;  %4129 = vmatprep.subr.mxu0 %v7510_v49 }
 0x1c8   :  { %1428 = vmatpush1.msra.mxu1 %v5905_v39  ;;  %4130 = vmatpush3.msra.mxu0 %v5342_v25  ;;  %v5925_v25 = vld [vmem:[#allocation10 + $0x128] sm:$0xff] }
 0x1c9   :  { %1429 = vmatprep.subr.mxu1 %v5909_v23  ;;  %4131 = vmatprep.subr.mxu0 %v7510_v49  ;;  %7533 = vst [vmem:[#allocation25_spill] sm:$0xff] %v5925_v25 }
 0x1ca   :  { %1430 = vmatpush1.msra.mxu1 %v5913_v58  ;;  %4132 = vmatpush3.msra.mxu0 %v5352_v32  ;;  %v5933_v32 = vld [vmem:[#allocation10 + $0x110] sm:$0xff] }
 0x1cb   :  { %1431 = vmatprep.subr.mxu1 %v5917_v41  ;;  %4133 = vmatprep.subr.mxu0 %v7510_v49  ;;  %7535 = vst [vmem:[#allocation27_spill] sm:$0xff] %v5933_v32 }
 0x1cc   :  { %1432 = vmatpush1.msra.mxu1 %v5921_v45  ;;  %4134 = vmatpush3.msra.mxu0 %v5364_v36  ;;  %v5941_v36 = vld [vmem:[#allocation10 + $0xf8] sm:$0xff] }
 0x1cd   :  { %1433 = vmatprep.subr.mxu1 %v5925_v25  ;;  %4135 = vmatprep.subr.mxu0 %v7510_v49  ;;  %7537 = vst [vmem:[#allocation29_spill] sm:$0xff] %v5941_v36 }
 0x1ce   :  { %1434 = vmatpush1.msra.mxu1 %v5929_v42  ;;  %4136 = vmatpush3.msra.mxu0 %v5374_v43  ;;  %v5949_v43 = vld [vmem:[#allocation10 + $0xe0] sm:$0xff] }
 0x1cf   :  { %1435 = vmatprep.subr.mxu1 %v5933_v32  ;;  %4137 = vmatprep.subr.mxu0 %v7510_v49  ;;  %7539 = vst [vmem:[#allocation31_spill] sm:$0xff] %v5949_v43 }
 0x1d0   :  { %1436 = vmatpush1.msra.mxu1 %v5937_v7  ;;  %4138 = vmatpush3.msra.mxu0 %v5386_v11  ;;  %v5957_v11 = vld [vmem:[#allocation10 + $0xc8] sm:$0xff] }
 0x1d1   :  { %1437 = vmatprep.subr.mxu1 %v5941_v36  ;;  %4139 = vmatprep.subr.mxu0 %v7510_v49  ;;  %7541 = vst [vmem:[#allocation33_spill] sm:$0xff] %v5957_v11 }
 0x1d2   :  { %1438 = vmatpush1.msra.mxu1 %v5945_v48  ;;  %4140 = vmatpush3.msra.mxu0 %v5396_v54  ;;  %v5965_v54 = vld [vmem:[#allocation10 + $0xb0] sm:$0xff] }
 0x1d3   :  { %1439 = vmatprep.subr.mxu1 %v5949_v43  ;;  %4141 = vmatprep.subr.mxu0 %v7510_v49  ;;  %7543 = vst [vmem:[#allocation35_spill] sm:$0xff] %v5965_v54 }
 0x1d4   :  { %1440 = vmatpush1.msra.mxu1 %v5953_v53  ;;  %4142 = vmatpush3.msra.mxu0 %v5408_v20  ;;  %v5973_v20 = vld [vmem:[#allocation10 + $0x98] sm:$0xff] }
 0x1d5   :  { %1441 = vmatprep.subr.mxu1 %v5957_v11  ;;  %4143 = vmatprep.subr.mxu0 %v7510_v49  ;;  %7545 = vst [vmem:[#allocation37_spill] sm:$0xff] %v5973_v20 }
 0x1d6   :  { %1442 = vmatpush1.msra.mxu1 %v5961_v51  ;;  %4144 = vmatpush3.msra.mxu0 %v5418_v5  ;;  %v5981_v5 = vld [vmem:[#allocation10 + $0x80] sm:$0xff] }
 0x1d7   :  { %1443 = vmatprep.subr.mxu1 %v5965_v54  ;;  %4145 = vmatprep.subr.mxu0 %v7510_v49  ;;  %7547 = vst [vmem:[#allocation39_spill] sm:$0xff] %v5981_v5 }
 0x1d8   :  { %1444 = vmatpush1.msra.mxu1 %v5969_v21  ;;  %4146 = vmatpush3.msra.mxu0 %v5430_v29  ;;  %v5989_v29 = vld [vmem:[#allocation10 + $0x68] sm:$0xff] }
 0x1d9   :  { %1445 = vmatprep.subr.mxu1 %v5973_v20  ;;  %4147 = vmatprep.subr.mxu0 %v7510_v49  ;;  %7549 = vst [vmem:[#allocation41_spill] sm:$0xff] %v5989_v29 }
 0x1da   :  { %1446 = vmatpush1.msra.mxu1 %v5977_v14  ;;  %4148 = vmatpush3.msra.mxu0 %v5440_v63  ;;  %v5997_v63 = vld [vmem:[#allocation10 + $0x50] sm:$0xff] }
 0x1db   :  { %1447 = vmatprep.subr.mxu1 %v5981_v5  ;;  %4149 = vmatprep.subr.mxu0 %v7510_v49  ;;  %7551 = vst [vmem:[#allocation45_spill] sm:$0xff] %v5997_v63 }
 0x1dc   :  { %1448 = vmatpush1.msra.mxu1 %v5985_v46  ;;  %4150 = vmatpush3.msra.mxu0 %v5452_v38  ;;  %v6005_v38 = vld [vmem:[#allocation10 + $0x38] sm:$0xff] }
 0x1dd   :  { %1449 = vmatprep.subr.mxu1 %v5989_v29  ;;  %4151 = vmatprep.subr.mxu0 %v7510_v49  ;;  %7553 = vst [vmem:[#allocation92_spill] sm:$0xff] %v6005_v38 }
 0x1de   :  { %1450 = vmatpush1.msra.mxu1 %v5993_v35  ;;  %4152 = vmatpush3.msra.mxu0 %v5462_v61  ;;  %v7555_v61 = vld [vmem:[#allocation42_spill] sm:$0xff] }
 0x1df   :  { %1451 = vmatprep.subr.mxu1 %v5997_v63  ;;  %4153 = vmatprep.subr.mxu0 %v7510_v49  ;;  %7556 = vst [vmem:[#allocation42_spill] sm:$0xff] %v6013_v33 }
 0x1e0   :  { %1452 = vmatpush1.msra.mxu1 %v6001_v60  ;;  %4154 = vmatpush3.msra.mxu0 %v5474_v47  ;;  %v7558_v47 = vld [vmem:[#allocation43_spill] sm:$0xff]  ;;  %v7565_v60 = vld [vmem:[#allocation72_spill] sm:$0xff] }
 0x1e1   :  { %1453 = vmatprep.subr.mxu1 %v6005_v38  ;;  %4155 = vmatprep.subr.mxu0 %v7510_v49  ;;  %7559 = vst [vmem:[#allocation43_spill] sm:$0xff] %v6021_v40 }
 0x1e2   :  { %1454 = vmatpush1.msra.mxu1 %v6009_v12  ;;  %4156 = vmatpush3.msra.mxu0 %v7555_v61  ;;  %v7564_v61 = vld [vmem:[#allocation51_spill] sm:$0xff] }
 0x1e3   :  { %1455 = vmatprep.subr.mxu1 %v6013_v33  ;;  %4157 = vmatprep.subr.mxu0 %v7510_v49 }
 0x1e4   :  { %1456 = vmatpush1.msra.mxu1 %v6017_v0  ;;  %4158 = vmatpush3.msra.mxu0 %v7558_v47 }
 0x1e5   :  { %1457 = vmatprep.subr.mxu1 %v6021_v40  ;;  %4159 = vmatprep.subr.mxu0 %v7510_v49 }
 0x1e6   :  { %1458 = vmatpush1.msra.mxu1 %v6025_v16  ;;  %1491 = vmatprep.mubr.f32.mxu1 %v7510_v49 }
 0x1e7   :  { %4160 = vmatpush3.msra.mxu0 %v7561_v1  ;;  %4161 = vmatprep.mubr.msk.f32.mxu0 %vm5106_vm0, %v7510_v49 }
 0x1e8   :  { %1589 = vmatprep.subr.mxu1 %v6032_v37  ;;  %4164 = vmatprep.subr.mxu0 %v7510_v49 }
 0x265   :  { %v1157_v31 = vpop.f32.mrf.mxu1  ;;  %v1228_v44 = vpop.f32.mrf.mxu0 }
 0x266   :  { %v1232_v30 = vadd.f32 %v1157_v31, %v7563_v27  ;;  %v1246_v37 = vadd.f32 %v5814_v55, %v1228_v44 }
 0x267   :  { %v4093_v34 = vpop.f32.mrf.mxu0  ;;  %v1159_v56 = vpop.f32.mrf.mxu1 }
 0x268   :  { %v3632_v2 = vmul.f32 -1.442695, %v1232_v30  ;;  %v1239_v47 = vadd.f32 %v1159_v56, %v7564_v61  ;;  %v7566_v34 = vld [vmem:[#allocation50_spill] sm:$0xff]  ;;  %v7567_v56 = vld [vmem:[#allocation88_spill] sm:$0xff] }
 0x26a   :  { %4585 = vpow2.f32 %v3632_v2  ;;  %v3633_v1 = vmul.f32 -1.442695, %v1239_v47 }
 0x26c   :  { %4587 = vpow2.f32 %v3633_v1 }
 0x277   :  { %v4586_v16 = vpop.eup %4585 }
 0x278   :  { %v1236_v40 = vadd.f32 1.0, %v4586_v16 }
 0x279   :  { %v4588_v0 = vpop.eup %4587 }
 0x27a   :  { %4589 = vrcp.f32 %v1236_v40  ;;  %v1243_v35 = vadd.f32 1.0, %v4588_v0  ;;  %v6055_v0 = vld [vmem:[#allocation12 + $0x150] sm:$0xff] }
 0x286   :  { %v1319_v33 = vpop.f32.mrf.mxu1  ;;  %v1390_v12 = vpop.f32.mrf.mxu0 }
 0x287   :  { %v4590_v38 = vpop.eup %4589  ;;  %v1394_v63 = vadd.f32 %v1319_v33, %v7565_v60  ;;  %v6051_v33 = vld [vmem:[#allocation12 + $0x158] sm:$0xff] }
 0x288   :  { %v1247_v31 = vmul.f32 %v4590_v38, %v1246_v37  ;;  %v4128_v27 = vpop.f32.mrf.mxu0  ;;  %v1321_v16 = vpop.f32.mrf.mxu1  ;;  %v6063_v37 = vld [vmem:[#allocation12 + $0x138] sm:$0xff] }
 0x289   :  { %v3634_v30 = vmul.f32 -1.442695, %v1394_v63  ;;  %v1401_v40 = vadd.f32 %v1321_v16, %v7567_v56  ;;  %v6072_v27 = vld [vmem:[#allocation12 + $0x120] sm:$0xff] }
 0x28a   :  { %v1248_v2 = vadd.f32 %v1247_v31, %v7566_v34  ;;  %v6076_v34 = vld [vmem:[#allocation12 + $0x110] sm:$0xff] }
 0x28b   :  { %4591 = vpow2.f32 %v3634_v30  ;;  %v3635_v61 = vmul.f32 -1.442695, %v1401_v40  ;;  %v6089_v40 = vld [vmem:[#allocation12 + $0xf0] sm:$0xff] }
 0x28c   :  { %4593 = vtanh.f32 %v1248_v2  ;;  %v6080_v2 = vld [vmem:[#allocation12 + $0x108] sm:$0xff] }
 0x28d   :  { %4595 = vrcp.f32 %v1243_v35  ;;  %v6047_v35 = vld [vmem:[#allocation12 + $0x168] sm:$0xff] }
 0x28e   :  { %4597 = vpow2.f32 %v3635_v61  ;;  %v6093_v61 = vld [vmem:[#allocation12 + $0xe0] sm:$0xff] }
 0x298   :  { %v4592_v47 = vpop.eup %4591 }
 0x299   :  { %v4594_v44 = vpop.eup %4593  ;;  %v1398_v1 = vadd.f32 1.0, %v4592_v47  ;;  %v6101_v47 = vld [vmem:[#allocation12 + $0xc8] sm:$0xff] }
 0x29a   :  { %v1250_v55 = vsub.f32 %v5821_v62, %v4594_v44  ;;  %v4596_v60 = vpop.eup %4595  ;;  %v6166_v62 = vld [vmem:[#allocation12 + $0x8] sm:$0xff] }
 0x29b   :  { %4599 = vrcp.f32 %v1398_v1  ;;  %v4598_v31 = vpop.eup %4597  ;;  %v6117_v1 = vld [vmem:[#allocation12 + $0x98] sm:$0xff]  ;;  %7572 = vst [vmem:[#allocation50_spill] sm:$0xff] %v6166_v62 }
 0x29c   :  { %v1251_v38 = vmul.f32 %v4596_v60, %v1250_v55  ;;  %v6059_v55 = vld [vmem:[#allocation12 + $0x140] sm:$0xff]  ;;  %v1405_v56 = vadd.f32 1.0, %v4598_v31  ;;  %v6121_v60 = vld [vmem:[#allocation12 + $0x90] sm:$0xff] }
 0x29d   :  { %v6137_v31 = vld [vmem:[#allocation12 + $0x60] sm:$0xff] }
 0x29e   :  { %v6043_v63 = vadd.f32 %v4594_v44, %v1251_v38  ;;  %v6109_v44 = vld [vmem:[#allocation12 + $0xb0] sm:$0xff]  ;;  %v6129_v38 = vld [vmem:[#allocation12 + $0x78] sm:$0xff] }
 0x2a0   :  { %7568 = vst [vmem:[#allocation49_spill] sm:$0xff] %v6043_v63  ;;  %1492 = vmatmul.mubr.f32.vlgmr.msra.gmra.mxu1 %v6043_v63  ;;  %4162 = vmatmul.mubr.f32.vlgmr.msra.gmra.mxu0 %v6043_v63 }
 0x2a1   :  { %1590 = vmatpush1.msra.mxu1 %v6047_v35  ;;  %4165 = vmatpush3.msra.mxu0 %v5519_v3  ;;  %v6067_v3 = vld [vmem:[#allocation12 + $0x128] sm:$0xff] }
 0x2a2   :  { %1591 = vmatprep.subr.mxu1 %v6051_v33  ;;  %4166 = vmatprep.subr.mxu0 %v7510_v49 }
 0x2a3   :  { %1592 = vmatpush1.msra.mxu1 %v6055_v0  ;;  %4167 = vmatpush3.msra.mxu0 %v5524_v59  ;;  %v1408_v59 = vadd.f32 %v5836_v18, %v1390_v12  ;;  %v6084_v12 = vld [vmem:[#allocation12 + $0xf8] sm:$0xff] }
 0x2a4   :  { %1593 = vmatprep.subr.mxu1 %v6059_v55  ;;  %4168 = vmatprep.subr.mxu0 %v7510_v49 }
 0x2a5   :  { %1594 = vmatpush1.msra.mxu1 %v6063_v37  ;;  %4169 = vmatpush3.msra.mxu0 %v5531_v50 }
 0x2a6   :  { %1595 = vmatprep.subr.mxu1 %v6067_v3  ;;  %4170 = vmatprep.subr.mxu0 %v7510_v49 }
 0x2a7   :  { %1596 = vmatpush1.msra.mxu1 %v6072_v27  ;;  %4171 = vmatpush3.msra.mxu0 %v5537_v9  ;;  %v7569_v9 = vld [vmem:[#allocation89_spill] sm:$0xff] }
 0x2a8   :  { %v4600_v30 = vpop.eup %4599  ;;  %1597 = vmatprep.subr.mxu1 %v6076_v34  ;;  %4172 = vmatprep.subr.mxu0 %v7510_v49 }
 0x2a9   :  { %v1409_v50 = vmul.f32 %v4600_v30, %v1408_v59  ;;  %1598 = vmatpush1.msra.mxu1 %v6080_v2  ;;  %4173 = vmatpush3.msra.mxu0 %v5543_v4  ;;  %v6097_v4 = vld [vmem:[#allocation12 + $0xd8] sm:$0xff]  ;;  %v6145_v59 = vld [vmem:[#allocation12 + $0x48] sm:$0xff] }
 0x2aa   :  { %1599 = vmatprep.subr.mxu1 %v6084_v12  ;;  %4174 = vmatprep.subr.mxu0 %v7510_v49  ;;  %v6149_v30 = vld [vmem:[#allocation12 + $0x38] sm:$0xff] }
 0x2ab   :  { %v1410_v16 = vadd.f32 %v1409_v50, %v7569_v9  ;;  %1600 = vmatpush1.msra.mxu1 %v6089_v40  ;;  %4175 = vmatpush3.msra.mxu0 %v5549_v6  ;;  %v6105_v6 = vld [vmem:[#allocation12 + $0xc0] sm:$0xff] }
 0x2ac   :  { %1601 = vmatprep.subr.mxu1 %v6093_v61  ;;  %4176 = vmatprep.subr.mxu0 %v7510_v49 }
 0x2ad   :  { %4601 = vtanh.f32 %v1410_v16  ;;  %1602 = vmatpush1.msra.mxu1 %v6097_v4  ;;  %4177 = vmatpush3.msra.mxu0 %v5555_v8  ;;  %v6113_v8 = vld [vmem:[#allocation12 + $0xa8] sm:$0xff]  ;;  %v6158_v16 = vld [vmem:[#allocation12 + $0x20] sm:$0xff] }
 0x2ae   :  { %1603 = vmatprep.subr.mxu1 %v6101_v47  ;;  %4178 = vmatprep.subr.mxu0 %v7510_v49  ;;  %4603 = vrcp.f32 %v1405_v56  ;;  %7570 = vst [vmem:[#allocation51_spill] sm:$0xff] %v6158_v16 }
 0x2af   :  { %1604 = vmatpush1.msra.mxu1 %v6105_v6  ;;  %4179 = vmatpush3.msra.mxu0 %v5561_v10  ;;  %v6125_v10 = vld [vmem:[#allocation12 + $0x80] sm:$0xff] }
 0x2b0   :  { %1605 = vmatprep.subr.mxu1 %v6109_v44  ;;  %4180 = vmatprep.subr.mxu0 %v7510_v49 }
 0x2b1   :  { %1606 = vmatpush1.msra.mxu1 %v6113_v8  ;;  %4181 = vmatpush3.msra.mxu0 %v5567_v13  ;;  %v6133_v13 = vld [vmem:[#allocation12 + $0x68] sm:$0xff] }
 0x2b2   :  { %1607 = vmatprep.subr.mxu1 %v6117_v1  ;;  %4182 = vmatprep.subr.mxu0 %v7510_v49 }
 0x2b3   :  { %1608 = vmatpush1.msra.mxu1 %v6121_v60  ;;  %4183 = vmatpush3.msra.mxu0 %v5573_v15  ;;  %v6141_v15 = vld [vmem:[#allocation12 + $0x50] sm:$0xff] }
 0x2b4   :  { %1609 = vmatprep.subr.mxu1 %v6125_v10  ;;  %4184 = vmatprep.subr.mxu0 %v7510_v49 }
 0x2b5   :  { %1610 = vmatpush1.msra.mxu1 %v6129_v38  ;;  %4185 = vmatpush3.msra.mxu0 %v5579_v17 }
 0x2b6   :  { %1611 = vmatprep.subr.mxu1 %v6133_v13  ;;  %4186 = vmatprep.subr.mxu0 %v7510_v49 }
 0x2b7   :  { %1612 = vmatpush1.msra.mxu1 %v6137_v31  ;;  %4187 = vmatpush3.msra.mxu0 %v5585_v19  ;;  %v6153_v19 = vld [vmem:[#allocation12 + $0x30] sm:$0xff] }
 0x2b8   :  { %1613 = vmatprep.subr.mxu1 %v6141_v15  ;;  %4188 = vmatprep.subr.mxu0 %v7510_v49 }
 0x2b9   :  { %1614 = vmatpush1.msra.mxu1 %v6145_v59  ;;  %4189 = vmatpush3.msra.mxu0 %v5591_v22  ;;  %v6162_v22 = vld [vmem:[#allocation12 + $0x18] sm:$0xff] }
 0x2ba   :  { %v4602_v17 = vpop.eup %4601  ;;  %1615 = vmatprep.subr.mxu1 %v6149_v30  ;;  %4190 = vmatprep.subr.mxu0 %v7510_v49  ;;  %7571 = vst [vmem:[#allocation72_spill] sm:$0xff] %v6162_v22 }
 0x2bb   :  { %1616 = vmatpush1.msra.mxu1 %v6153_v19  ;;  %4191 = vmatpush3.msra.mxu0 %v5597_v24  ;;  %v1412_v50 = vsub.f32 %v5894_v52, %v4602_v17  ;;  %v4604_v9 = vpop.eup %4603  ;;  %v6170_v24 = vld [vmem:[#allocation12] sm:$0xff] }
 0x2bc   :  { %1617 = vmatprep.subr.mxu1 %v6158_v16  ;;  %4192 = vmatprep.subr.mxu0 %v7510_v49  ;;  %7573 = vst [vmem:[#allocation88_spill] sm:$0xff] %v6170_v24 }
 0x2bd   :  { %1618 = vmatpush1.msra.mxu1 %v6162_v22  ;;  %4193 = vmatpush3.msra.mxu0 %v5603_v26  ;;  %v1413_v56 = vmul.f32 %v4604_v9, %v1412_v50  ;;  %v6184_v26 = vld [vmem:[#allocation10 + $0x178] sm:$0xff]  ;;  %v6202_v50 = vld [vmem:[#allocation10 + $0x130] sm:$0xff] }
 0x2be   :  { %1619 = vmatprep.subr.mxu1 %v6166_v62  ;;  %4194 = vmatprep.subr.mxu0 %v7510_v49  ;;  %7575 = vst [vmem:[#allocation96_spill] sm:$0xff] %v6184_v26  ;;  %7578 = vst [vmem:[#allocation99_spill] sm:$0xff] %v6202_v50  ;;  %v6208_v9 = vld [vmem:[#allocation10 + $0x118] sm:$0xff] }
 0x2bf   :  { %1620 = vmatpush1.msra.mxu1 %v6170_v24  ;;  %1653 = vmatprep.mubr.f32.mxu1 %v7510_v49  ;;  %v6174_v52 = vadd.f32 %v4602_v17, %v1413_v56  ;;  %v6196_v17 = vld [vmem:[#allocation10 + $0x148] sm:$0xff]  ;;  %7579 = vst [vmem:[#allocation100_spill] sm:$0xff] %v6208_v9  ;;  %v6214_v56 = vld [vmem:[#allocation10 + $0x100] sm:$0xff] }
 0x2c0   :  { %4195 = vmatpush3.msra.mxu0 %v5609_v28  ;;  %4196 = vmatprep.mubr.msk.f32.mxu0 %vm5106_vm0, %v7510_v49  ;;  %v6190_v28 = vld [vmem:[#allocation10 + $0x160] sm:$0xff]  ;;  %7577 = vst [vmem:[#allocation98_spill] sm:$0xff] %v6196_v17  ;;  %7580 = vst [vmem:[#allocation101_spill] sm:$0xff] %v6214_v56 }
 0x2c1   :  { %7574 = vst [vmem:[#allocation89_spill] sm:$0xff] %v6174_v52  ;;  %1654 = vmatmul.mubr.f32.vlgmr.msra.gmra.mxu1 %v6174_v52  ;;  %4197 = vmatmul.mubr.f32.vlgmr.msra.gmra.mxu0 %v6174_v52  ;;  %7576 = vst [vmem:[#allocation97_spill] sm:$0xff] %v6190_v28 }
 0x2c2   :  { %1763 = vmatprep.subr.mxu1 %v5901_v57  ;;  %4199 = vmatprep.subr.mxu0 %v7510_v49 }
 0x2c3   :  { %1764 = vmatpush1.msra.mxu1 %v5905_v39  ;;  %4200 = vmatpush3.msra.mxu0 %v6184_v26 }
 0x2c4   :  { %1765 = vmatprep.subr.mxu1 %v5909_v23  ;;  %4201 = vmatprep.subr.mxu0 %v7510_v49 }
 0x2c5   :  { %1766 = vmatpush1.msra.mxu1 %v5913_v58  ;;  %4202 = vmatpush3.msra.mxu0 %v6190_v28 }
 0x2c6   :  { %1767 = vmatprep.subr.mxu1 %v5917_v41  ;;  %4203 = vmatprep.subr.mxu0 %v7510_v49 }
 0x2c7   :  { %1768 = vmatpush1.msra.mxu1 %v5921_v45  ;;  %4204 = vmatpush3.msra.mxu0 %v6196_v17 }
 0x2c8   :  { %1769 = vmatprep.subr.mxu1 %v5925_v25  ;;  %4205 = vmatprep.subr.mxu0 %v7510_v49 }
 0x2c9   :  { %1770 = vmatpush1.msra.mxu1 %v5929_v42  ;;  %4206 = vmatpush3.msra.mxu0 %v6202_v50  ;;  %v7604_v42 = vld [vmem:[#allocation68_spill] sm:$0xff] }
 0x2ca   :  { %1771 = vmatprep.subr.mxu1 %v5933_v32  ;;  %4207 = vmatprep.subr.mxu0 %v7510_v49 }
 0x2cb   :  { %1772 = vmatpush1.msra.mxu1 %v5937_v7  ;;  %4208 = vmatpush3.msra.mxu0 %v6208_v9  ;;  %v6220_v7 = vld [vmem:[#allocation10 + $0xe8] sm:$0xff] }
 0x2cc   :  { %1773 = vmatprep.subr.mxu1 %v5941_v36  ;;  %4209 = vmatprep.subr.mxu0 %v7510_v49  ;;  %7581 = vst [vmem:[#allocation102_spill] sm:$0xff] %v6220_v7  ;;  %v7603_v36 = vld [vmem:[#allocation90_spill] sm:$0xff] }
 0x2cd   :  { %1774 = vmatpush1.msra.mxu1 %v5945_v48  ;;  %4210 = vmatpush3.msra.mxu0 %v6214_v56  ;;  %v6226_v48 = vld [vmem:[#allocation10 + $0xd0] sm:$0xff] }
 0x2ce   :  { %1775 = vmatprep.subr.mxu1 %v5949_v43  ;;  %4211 = vmatprep.subr.mxu0 %v7510_v49  ;;  %7582 = vst [vmem:[#allocation103_spill] sm:$0xff] %v6226_v48 }
 0x2cf   :  { %1776 = vmatpush1.msra.mxu1 %v5953_v53  ;;  %4212 = vmatpush3.msra.mxu0 %v6220_v7  ;;  %v6232_v53 = vld [vmem:[#allocation10 + $0xb8] sm:$0xff] }
 0x2d0   :  { %1777 = vmatprep.subr.mxu1 %v5957_v11  ;;  %4213 = vmatprep.subr.mxu0 %v7510_v49  ;;  %7583 = vst [vmem:[#allocation104_spill] sm:$0xff] %v6232_v53 }
 0x2d1   :  { %1778 = vmatpush1.msra.mxu1 %v5961_v51  ;;  %4214 = vmatpush3.msra.mxu0 %v6226_v48  ;;  %v6238_v51 = vld [vmem:[#allocation10 + $0xa0] sm:$0xff]  ;;  %v7602_v48 = vld [vmem:[#allocation55_spill] sm:$0xff] }
 0x2d2   :  { %1779 = vmatprep.subr.mxu1 %v5965_v54  ;;  %4215 = vmatprep.subr.mxu0 %v7510_v49  ;;  %7584 = vst [vmem:[#allocation105_spill] sm:$0xff] %v6238_v51 }
 0x2d3   :  { %1780 = vmatpush1.msra.mxu1 %v5969_v21  ;;  %4216 = vmatpush3.msra.mxu0 %v6232_v53  ;;  %v6244_v21 = vld [vmem:[#allocation10 + $0x88] sm:$0xff] }
 0x2d4   :  { %1781 = vmatprep.subr.mxu1 %v5973_v20  ;;  %4217 = vmatprep.subr.mxu0 %v7510_v49  ;;  %7585 = vst [vmem:[#allocation106_spill] sm:$0xff] %v6244_v21  ;;  %v7586_v20 = vld [vmem:[#allocation44_spill] sm:$0xff] }
 0x2d5   :  { %1782 = vmatpush1.msra.mxu1 %v5977_v14  ;;  %4218 = vmatpush3.msra.mxu0 %v6238_v51  ;;  %v6250_v14 = vld [vmem:[#allocation10 + $0x70] sm:$0xff]  ;;  %v7588_v51 = vld [vmem:[#allocation45_spill] sm:$0xff] }
 0x2d6   :  { %1783 = vmatprep.subr.mxu1 %v5981_v5  ;;  %4219 = vmatprep.subr.mxu0 %v7510_v49  ;;  %7587 = vst [vmem:[#allocation107_spill] sm:$0xff] %v6250_v14  ;;  %v7589_v5 = vld [vmem:[#allocation47_spill] sm:$0xff] }
 0x2d7   :  { %1784 = vmatpush1.msra.mxu1 %v5985_v46  ;;  %4220 = vmatpush3.msra.mxu0 %v6244_v21  ;;  %v6256_v46 = vld [vmem:[#allocation10 + $0x58] sm:$0xff]  ;;  %v7591_v21 = vld [vmem:[#allocation92_spill] sm:$0xff] }
 0x2d8   :  { %1785 = vmatprep.subr.mxu1 %v5989_v29  ;;  %4221 = vmatprep.subr.mxu0 %v7510_v49  ;;  %7590 = vst [vmem:[#allocation108_spill] sm:$0xff] %v6256_v46  ;;  %v7592_v29 = vld [vmem:[#allocation93_spill] sm:$0xff] }
 0x2d9   :  { %1786 = vmatpush1.msra.mxu1 %v7586_v20  ;;  %4222 = vmatpush3.msra.mxu0 %v6250_v14  ;;  %v6262_v20 = vld [vmem:[#allocation10 + $0x40] sm:$0xff] }
 0x2da   :  { %1787 = vmatprep.subr.mxu1 %v7588_v51  ;;  %4223 = vmatprep.subr.mxu0 %v7510_v49  ;;  %7593 = vst [vmem:[#allocation109_spill] sm:$0xff] %v6262_v20  ;;  %v7594_v14 = vld [vmem:[#allocation42_spill] sm:$0xff] }
 0x2db   :  { %1788 = vmatpush1.msra.mxu1 %v7589_v5  ;;  %4224 = vmatpush3.msra.mxu0 %v6256_v46  ;;  %v7595_v51 = vld [vmem:[#allocation94_spill] sm:$0xff]  ;;  %v6268_v5 = vld [vmem:[#allocation10 + $0x28] sm:$0xff] }
 0x2dc   :  { %1789 = vmatprep.subr.mxu1 %v7591_v21  ;;  %4225 = vmatprep.subr.mxu0 %v7510_v49  ;;  %7596 = vst [vmem:[#allocation110_spill] sm:$0xff] %v6268_v5  ;;  %v7597_v46 = vld [vmem:[#allocation43_spill] sm:$0xff] }
 0x2dd   :  { %1790 = vmatpush1.msra.mxu1 %v7592_v29  ;;  %4226 = vmatpush3.msra.mxu0 %v6262_v20  ;;  %v7598_v21 = vld [vmem:[#allocation95_spill] sm:$0xff]  ;;  %v6275_v29 = vld [vmem:[#allocation10 + $0x10] sm:$0xff] }
 0x2de   :  { %1791 = vmatprep.subr.mxu1 %v7594_v14  ;;  %4227 = vmatprep.subr.mxu0 %v7510_v49  ;;  %7599 = vst [vmem:[#allocation111_spill] sm:$0xff] %v6275_v29 }
 0x2df   :  { %1792 = vmatpush1.msra.mxu1 %v7595_v51  ;;  %4228 = vmatpush3.msra.mxu0 %v6268_v5  ;;  %v7600_v51 = vld [vmem:[#allocation46_spill] sm:$0xff] }
 0x2e0   :  { %1793 = vmatprep.subr.mxu1 %v7597_v46  ;;  %4229 = vmatprep.subr.mxu0 %v7510_v49  ;;  %v7601_v46 = vld [vmem:[#allocation53_spill] sm:$0xff] }
 0x2e1   :  { %1794 = vmatpush1.msra.mxu1 %v7598_v21  ;;  %1827 = vmatprep.mubr.f32.mxu1 %v7510_v49 }
 0x2e2   :  { %4230 = vmatpush3.msra.mxu0 %v6275_v29  ;;  %4231 = vmatprep.mubr.msk.f32.mxu0 %vm5106_vm0, %v7510_v49 }
 0x2e3   :  { %1925 = vmatprep.subr.mxu1 %v7600_v51  ;;  %4234 = vmatprep.subr.mxu0 %v7510_v49 }
 0x360   :  { %v1493_v5 = vpop.f32.mrf.mxu1  ;;  %v1564_v14 = vpop.f32.mrf.mxu0 }
 0x361   :  { %v1568_v20 = vadd.f32 %v1493_v5, %v7601_v46  ;;  %v1582_v51 = vadd.f32 %v7603_v36, %v1564_v14 }
 0x362   :  { %v4163_v53 = vpop.f32.mrf.mxu0  ;;  %v1495_v21 = vpop.f32.mrf.mxu1 }
 0x363   :  { %v3636_v54 = vmul.f32 -1.442695, %v1568_v20  ;;  %v1575_v11 = vadd.f32 %v1495_v21, %v7602_v48 }
 0x365   :  { %4605 = vpow2.f32 %v3636_v54  ;;  %v3637_v7 = vmul.f32 -1.442695, %v1575_v11  ;;  %v7605_v54 = vld [vmem:[#allocation54_spill] sm:$0xff] }
 0x367   :  { %4607 = vpow2.f32 %v3637_v7  ;;  %v7606_v7 = vld [vmem:[#allocation86_spill] sm:$0xff] }
 0x372   :  { %v4606_v43 = vpop.eup %4605 }
 0x373   :  { %v1572_v29 = vadd.f32 1.0, %v4606_v43 }
 0x374   :  { %v4608_v56 = vpop.eup %4607 }
 0x375   :  { %4609 = vrcp.f32 %v1572_v29  ;;  %v1579_v17 = vadd.f32 1.0, %v4608_v56 }
 0x381   :  { %v1655_v9 = vpop.f32.mrf.mxu1  ;;  %v1726_v32 = vpop.f32.mrf.mxu0 }
 0x382   :  { %v4610_v50 = vpop.eup %4609  ;;  %v1730_v25 = vadd.f32 %v1655_v9, %v7604_v42  ;;  %v6306_v9 = vld [vmem:[#allocation12 + $0x148] sm:$0xff] }
 0x383   :  { %v1583_v5 = vmul.f32 %v4610_v50, %v1582_v51  ;;  %v4198_v53 = vpop.f32.mrf.mxu0  ;;  %v1657_v48 = vpop.f32.mrf.mxu1  ;;  %v6300_v50 = vld [vmem:[#allocation12 + $0x160] sm:$0xff] }
 0x384   :  { %v3638_v20 = vmul.f32 -1.442695, %v1730_v25  ;;  %v1737_v43 = vadd.f32 %v1657_v48, %v7606_v7  ;;  %v6313_v53 = vld [vmem:[#allocation12 + $0x130] sm:$0xff]  ;;  %v6326_v7 = vld [vmem:[#allocation12 + $0x100] sm:$0xff] }
 0x385   :  { %v1584_v46 = vadd.f32 %v1583_v5, %v7605_v54  ;;  %v1744_v5 = vadd.f32 %v5836_v18, %v1726_v32  ;;  %v7608_v18 = vld [vmem:[#allocation87_spill] sm:$0xff] }
 0x386   :  { %4611 = vpow2.f32 %v3638_v20  ;;  %v3639_v11 = vmul.f32 -1.442695, %v1737_v43  ;;  %v6332_v43 = vld [vmem:[#allocation12 + $0xe8] sm:$0xff] }
 0x387   :  { %4613 = vtanh.f32 %v1584_v46  ;;  %v6319_v46 = vld [vmem:[#allocation12 + $0x118] sm:$0xff] }
 0x388   :  { %4615 = vrcp.f32 %v1579_v17  ;;  %v6294_v17 = vld [vmem:[#allocation12 + $0x178] sm:$0xff] }
 0x389   :  { %4617 = vpow2.f32 %v3639_v11  ;;  %v6338_v11 = vld [vmem:[#allocation12 + $0xd0] sm:$0xff] }
 0x393   :  { %v4612_v21 = vpop.eup %4611 }
 0x394   :  { %v4614_v36 = vpop.eup %4613  ;;  %v1734_v14 = vadd.f32 1.0, %v4612_v21  ;;  %v6344_v21 = vld [vmem:[#allocation12 + $0xb8] sm:$0xff] }
 0x395   :  { %v1586_v29 = vsub.f32 %v6043_v63, %v4614_v36  ;;  %v4616_v42 = vpop.eup %4615  ;;  %v7628_v63 = vld [vmem:[#allocation35_spill] sm:$0xff] }
 0x396   :  { %4619 = vrcp.f32 %v1734_v14  ;;  %v4618_v56 = vpop.eup %4617  ;;  %v6356_v14 = vld [vmem:[#allocation12 + $0x88] sm:$0xff] }
 0x397   :  { %v1587_v51 = vmul.f32 %v4616_v42, %v1586_v29  ;;  %v1741_v48 = vadd.f32 1.0, %v4618_v56  ;;  %v6362_v29 = vld [vmem:[#allocation12 + $0x70] sm:$0xff]  ;;  %v6368_v42 = vld [vmem:[#allocation12 + $0x58] sm:$0xff]  ;;  %v6374_v56 = vld [vmem:[#allocation12 + $0x40] sm:$0xff] }
 0x399   :  { %v6289_v25 = vadd.f32 %v4614_v36, %v1587_v51  ;;  %v6350_v36 = vld [vmem:[#allocation12 + $0xa0] sm:$0xff] }
 0x39b   :  { %7607 = vst [vmem:[#allocation53_spill] sm:$0xff] %v6289_v25  ;;  %1828 = vmatmul.mubr.f32.vlgmr.msra.gmra.mxu1 %v6289_v25  ;;  %4232 = vmatmul.mubr.f32.vlgmr.msra.gmra.mxu0 %v6289_v25 }
 0x39c   :  { %1926 = vmatpush1.msra.mxu1 %v6047_v35  ;;  %4235 = vmatpush3.msra.mxu0 %v6294_v17 }
 0x39d   :  { %1927 = vmatprep.subr.mxu1 %v6051_v33  ;;  %4236 = vmatprep.subr.mxu0 %v7510_v49 }
 0x39e   :  { %1928 = vmatpush1.msra.mxu1 %v6055_v0  ;;  %4237 = vmatpush3.msra.mxu0 %v6300_v50 }
 0x39f   :  { %1929 = vmatprep.subr.mxu1 %v6059_v55  ;;  %4238 = vmatprep.subr.mxu0 %v7510_v49 }
 0x3a0   :  { %1930 = vmatpush1.msra.mxu1 %v6063_v37  ;;  %4239 = vmatpush3.msra.mxu0 %v6306_v9 }
 0x3a1   :  { %1931 = vmatprep.subr.mxu1 %v6067_v3  ;;  %4240 = vmatprep.subr.mxu0 %v7510_v49 }
 0x3a2   :  { %1932 = vmatpush1.msra.mxu1 %v6072_v27  ;;  %4241 = vmatpush3.msra.mxu0 %v6313_v53 }
 0x3a3   :  { %v4620_v20 = vpop.eup %4619  ;;  %1933 = vmatprep.subr.mxu1 %v6076_v34  ;;  %4242 = vmatprep.subr.mxu0 %v7510_v49 }
 0x3a4   :  { %v1745_v54 = vmul.f32 %v4620_v20, %v1744_v5  ;;  %1934 = vmatpush1.msra.mxu1 %v6080_v2  ;;  %4243 = vmatpush3.msra.mxu0 %v6319_v46 }
 0x3a5   :  { %1935 = vmatprep.subr.mxu1 %v6084_v12  ;;  %4244 = vmatprep.subr.mxu0 %v7510_v49 }
 0x3a6   :  { %v1746_v32 = vadd.f32 %v1745_v54, %v7608_v18  ;;  %1936 = vmatpush1.msra.mxu1 %v6089_v40  ;;  %4245 = vmatpush3.msra.mxu0 %v6326_v7  ;;  %v6381_v54 = vld [vmem:[#allocation12 + $0x28] sm:$0xff] }
 0x3a7   :  { %1937 = vmatprep.subr.mxu1 %v6093_v61  ;;  %4246 = vmatprep.subr.mxu0 %v7510_v49  ;;  %7609 = vst [vmem:[#allocation55_spill] sm:$0xff] %v6381_v54 }
 0x3a8   :  { %4621 = vtanh.f32 %v1746_v32  ;;  %1938 = vmatpush1.msra.mxu1 %v6097_v4  ;;  %4247 = vmatpush3.msra.mxu0 %v6332_v43 }
 0x3a9   :  { %1939 = vmatprep.subr.mxu1 %v6101_v47  ;;  %4248 = vmatprep.subr.mxu0 %v7510_v49  ;;  %4623 = vrcp.f32 %v1741_v48  ;;  %v6390_v48 = vld [vmem:[#allocation12 + $0x10] sm:$0xff] }
 0x3aa   :  { %1940 = vmatpush1.msra.mxu1 %v6105_v6  ;;  %4249 = vmatpush3.msra.mxu0 %v6338_v11  ;;  %7611 = vst [vmem:[#allocation68_spill] sm:$0xff] %v6390_v48 }
 0x3ab   :  { %1941 = vmatprep.subr.mxu1 %v6109_v44  ;;  %4250 = vmatprep.subr.mxu0 %v7510_v49 }
 0x3ac   :  { %1942 = vmatpush1.msra.mxu1 %v6113_v8  ;;  %4251 = vmatpush3.msra.mxu0 %v6344_v21 }
 0x3ad   :  { %1943 = vmatprep.subr.mxu1 %v6117_v1  ;;  %4252 = vmatprep.subr.mxu0 %v7510_v49 }
 0x3ae   :  { %1944 = vmatpush1.msra.mxu1 %v6121_v60  ;;  %4253 = vmatpush3.msra.mxu0 %v6350_v36 }
 0x3af   :  { %1945 = vmatprep.subr.mxu1 %v6125_v10  ;;  %4254 = vmatprep.subr.mxu0 %v7510_v49 }
 0x3b0   :  { %1946 = vmatpush1.msra.mxu1 %v6129_v38  ;;  %4255 = vmatpush3.msra.mxu0 %v6356_v14 }
 0x3b1   :  { %1947 = vmatprep.subr.mxu1 %v6133_v13  ;;  %4256 = vmatprep.subr.mxu0 %v7510_v49 }
 0x3b2   :  { %1948 = vmatpush1.msra.mxu1 %v6137_v31  ;;  %4257 = vmatpush3.msra.mxu0 %v6362_v29 }
 0x3b3   :  { %1949 = vmatprep.subr.mxu1 %v6141_v15  ;;  %4258 = vmatprep.subr.mxu0 %v7510_v49 }
 0x3b4   :  { %1950 = vmatpush1.msra.mxu1 %v6145_v59  ;;  %4259 = vmatpush3.msra.mxu0 %v6368_v42 }
 0x3b5   :  { %v4622_v51 = vpop.eup %4621  ;;  %1951 = vmatprep.subr.mxu1 %v6149_v30  ;;  %4260 = vmatprep.subr.mxu0 %v7510_v49 }
 0x3b6   :  { %1952 = vmatpush1.msra.mxu1 %v6153_v19  ;;  %4261 = vmatpush3.msra.mxu0 %v6374_v56  ;;  %v1748_v5 = vsub.f32 %v6174_v52, %v4622_v51  ;;  %v4624_v20 = vpop.eup %4623  ;;  %v7625_v52 = vld [vmem:[#allocation33_spill] sm:$0xff] }
 0x3b7   :  { %1953 = vmatprep.subr.mxu1 %v6158_v16  ;;  %4262 = vmatprep.subr.mxu0 %v7510_v49 }
 0x3b8   :  { %1954 = vmatpush1.msra.mxu1 %v6162_v22  ;;  %4263 = vmatpush3.msra.mxu0 %v6381_v54  ;;  %v1749_v18 = vmul.f32 %v4624_v20, %v1748_v5  ;;  %v7616_v5 = vld [vmem:[#allocation27_spill] sm:$0xff]  ;;  %v7619_v20 = vld [vmem:[#allocation29_spill] sm:$0xff] }
 0x3b9   :  { %1955 = vmatprep.subr.mxu1 %v6166_v62  ;;  %4264 = vmatprep.subr.mxu0 %v7510_v49  ;;  %v7658_v62 = vld [vmem:[#allocation84_spill] sm:$0xff] }
 0x3ba   :  { %1956 = vmatpush1.msra.mxu1 %v6170_v24  ;;  %1989 = vmatprep.mubr.f32.mxu1 %v7510_v49  ;;  %v6388_v32 = vadd.f32 %v4622_v51, %v1749_v18  ;;  %v7613_v51 = vld [vmem:[#allocation25_spill] sm:$0xff] }
 0x3bb   :  { %4265 = vmatpush3.msra.mxu0 %v6390_v48  ;;  %4266 = vmatprep.mubr.msk.f32.mxu0 %vm5106_vm0, %v7510_v49  ;;  %v7621_v18 = vld [vmem:[#allocation101_spill] sm:$0xff] }
 0x3bc   :  { %7610 = vst [vmem:[#allocation90_spill] sm:$0xff] %v6388_v32  ;;  %1990 = vmatmul.mubr.f32.vlgmr.msra.gmra.mxu1 %v6388_v32  ;;  %4267 = vmatmul.mubr.f32.vlgmr.msra.gmra.mxu0 %v6388_v32 }
 0x3bd   :  { %2097 = vmatprep.subr.mxu1 %v5901_v57  ;;  %4269 = vmatprep.subr.mxu0 %v7510_v49  ;;  %v7612_v57 = vld [vmem:[#allocation98_spill] sm:$0xff] }
 0x3be   :  { %2098 = vmatpush1.msra.mxu1 %v5905_v39  ;;  %4270 = vmatpush3.msra.mxu0 %v6184_v26  ;;  %v7614_v39 = vld [vmem:[#allocation26_spill] sm:$0xff] }
 0x3bf   :  { %2099 = vmatprep.subr.mxu1 %v5909_v23  ;;  %4271 = vmatprep.subr.mxu0 %v7510_v49  ;;  %v7615_v23 = vld [vmem:[#allocation99_spill] sm:$0xff] }
 0x3c0   :  { %2100 = vmatpush1.msra.mxu1 %v5913_v58  ;;  %4272 = vmatpush3.msra.mxu0 %v6190_v28  ;;  %v7617_v58 = vld [vmem:[#allocation28_spill] sm:$0xff] }
 0x3c1   :  { %2101 = vmatprep.subr.mxu1 %v5917_v41  ;;  %4273 = vmatprep.subr.mxu0 %v7510_v49  ;;  %v7618_v41 = vld [vmem:[#allocation100_spill] sm:$0xff] }
 0x3c2   :  { %2102 = vmatpush1.msra.mxu1 %v5921_v45  ;;  %4274 = vmatpush3.msra.mxu0 %v7612_v57  ;;  %v7620_v45 = vld [vmem:[#allocation30_spill] sm:$0xff] }
 0x3c3   :  { %2103 = vmatprep.subr.mxu1 %v7613_v51  ;;  %4275 = vmatprep.subr.mxu0 %v7510_v49  ;;  %v7622_v51 = vld [vmem:[#allocation31_spill] sm:$0xff] }
 0x3c4   :  { %2104 = vmatpush1.msra.mxu1 %v7614_v39  ;;  %4276 = vmatpush3.msra.mxu0 %v7615_v23  ;;  %v7623_v39 = vld [vmem:[#allocation32_spill] sm:$0xff] }
 0x3c5   :  { %2105 = vmatprep.subr.mxu1 %v7616_v5  ;;  %4277 = vmatprep.subr.mxu0 %v7510_v49  ;;  %v7624_v5 = vld [vmem:[#allocation102_spill] sm:$0xff] }
 0x3c6   :  { %2106 = vmatpush1.msra.mxu1 %v7617_v58  ;;  %4278 = vmatpush3.msra.mxu0 %v7618_v41  ;;  %v7626_v58 = vld [vmem:[#allocation34_spill] sm:$0xff] }
 0x3c7   :  { %2107 = vmatprep.subr.mxu1 %v7619_v20  ;;  %4279 = vmatprep.subr.mxu0 %v7510_v49  ;;  %v7627_v20 = vld [vmem:[#allocation103_spill] sm:$0xff] }
 0x3c8   :  { %2108 = vmatpush1.msra.mxu1 %v7620_v45  ;;  %4280 = vmatpush3.msra.mxu0 %v7621_v18  ;;  %v7629_v45 = vld [vmem:[#allocation36_spill] sm:$0xff]  ;;  %v7631_v18 = vld [vmem:[#allocation37_spill] sm:$0xff] }
 0x3c9   :  { %2109 = vmatprep.subr.mxu1 %v7622_v51  ;;  %4281 = vmatprep.subr.mxu0 %v7510_v49  ;;  %v7630_v51 = vld [vmem:[#allocation104_spill] sm:$0xff] }
 0x3ca   :  { %2110 = vmatpush1.msra.mxu1 %v7623_v39  ;;  %4282 = vmatpush3.msra.mxu0 %v7624_v5  ;;  %v7632_v39 = vld [vmem:[#allocation38_spill] sm:$0xff]  ;;  %v7634_v5 = vld [vmem:[#allocation39_spill] sm:$0xff] }
 0x3cb   :  { %2111 = vmatprep.subr.mxu1 %v7625_v52  ;;  %4283 = vmatprep.subr.mxu0 %v7510_v49  ;;  %v7633_v52 = vld [vmem:[#allocation105_spill] sm:$0xff] }
 0x3cc   :  { %2112 = vmatpush1.msra.mxu1 %v7626_v58  ;;  %4284 = vmatpush3.msra.mxu0 %v7627_v20  ;;  %v7635_v58 = vld [vmem:[#allocation40_spill] sm:$0xff]  ;;  %v7637_v20 = vld [vmem:[#allocation41_spill] sm:$0xff] }
 0x3cd   :  { %2113 = vmatprep.subr.mxu1 %v7628_v63  ;;  %4285 = vmatprep.subr.mxu0 %v7510_v49  ;;  %v7636_v63 = vld [vmem:[#allocation106_spill] sm:$0xff] }
 0x3ce   :  { %2114 = vmatpush1.msra.mxu1 %v7629_v45  ;;  %4286 = vmatpush3.msra.mxu0 %v7630_v51  ;;  %v7638_v45 = vld [vmem:[#allocation44_spill] sm:$0xff]  ;;  %v7640_v51 = vld [vmem:[#allocation45_spill] sm:$0xff] }
 0x3cf   :  { %2115 = vmatprep.subr.mxu1 %v7631_v18  ;;  %4287 = vmatprep.subr.mxu0 %v7510_v49  ;;  %v7639_v18 = vld [vmem:[#allocation107_spill] sm:$0xff] }
 0x3d0   :  { %2116 = vmatpush1.msra.mxu1 %v7632_v39  ;;  %4288 = vmatpush3.msra.mxu0 %v7633_v52  ;;  %v7641_v39 = vld [vmem:[#allocation47_spill] sm:$0xff]  ;;  %v7643_v52 = vld [vmem:[#allocation92_spill] sm:$0xff] }
 0x3d1   :  { %2117 = vmatprep.subr.mxu1 %v7634_v5  ;;  %4289 = vmatprep.subr.mxu0 %v7510_v49  ;;  %v7642_v5 = vld [vmem:[#allocation108_spill] sm:$0xff] }
 0x3d2   :  { %2118 = vmatpush1.msra.mxu1 %v7635_v58  ;;  %4290 = vmatpush3.msra.mxu0 %v7636_v63  ;;  %v7644_v58 = vld [vmem:[#allocation93_spill] sm:$0xff]  ;;  %v7646_v63 = vld [vmem:[#allocation42_spill] sm:$0xff] }
 0x3d3   :  { %2119 = vmatprep.subr.mxu1 %v7637_v20  ;;  %4291 = vmatprep.subr.mxu0 %v7510_v49  ;;  %v7645_v20 = vld [vmem:[#allocation109_spill] sm:$0xff] }
 0x3d4   :  { %2120 = vmatpush1.msra.mxu1 %v7638_v45  ;;  %4292 = vmatpush3.msra.mxu0 %v7639_v18  ;;  %v7647_v45 = vld [vmem:[#allocation94_spill] sm:$0xff]  ;;  %v7649_v18 = vld [vmem:[#allocation43_spill] sm:$0xff] }
 0x3d5   :  { %2121 = vmatprep.subr.mxu1 %v7640_v51  ;;  %4293 = vmatprep.subr.mxu0 %v7510_v49  ;;  %v7648_v51 = vld [vmem:[#allocation110_spill] sm:$0xff] }
 0x3d6   :  { %2122 = vmatpush1.msra.mxu1 %v7641_v39  ;;  %4294 = vmatpush3.msra.mxu0 %v7642_v5  ;;  %v7650_v39 = vld [vmem:[#allocation95_spill] sm:$0xff] }
 0x3d7   :  { %2123 = vmatprep.subr.mxu1 %v7643_v52  ;;  %4295 = vmatprep.subr.mxu0 %v7510_v49  ;;  %v7651_v52 = vld [vmem:[#allocation111_spill] sm:$0xff] }
 0x3d8   :  { %2124 = vmatpush1.msra.mxu1 %v7644_v58  ;;  %4296 = vmatpush3.msra.mxu0 %v7645_v20 }
 0x3d9   :  { %2125 = vmatprep.subr.mxu1 %v7646_v63  ;;  %4297 = vmatprep.subr.mxu0 %v7510_v49  ;;  %v7652_v63 = vld [vmem:[#allocation46_spill] sm:$0xff] }
 0x3da   :  { %2126 = vmatpush1.msra.mxu1 %v7647_v45  ;;  %4298 = vmatpush3.msra.mxu0 %v7648_v51  ;;  %v7653_v51 = vld [vmem:[#allocation57_spill] sm:$0xff] }
 0x3db   :  { %2127 = vmatprep.subr.mxu1 %v7649_v18  ;;  %4299 = vmatprep.subr.mxu0 %v7510_v49 }
 0x3dc   :  { %2128 = vmatpush1.msra.mxu1 %v7650_v39  ;;  %2161 = vmatprep.mubr.f32.mxu1 %v7510_v49  ;;  %v7654_v39 = vld [vmem:[#allocation59_spill] sm:$0xff] }
 0x3dd   :  { %4300 = vmatpush3.msra.mxu0 %v7651_v52  ;;  %4301 = vmatprep.mubr.msk.f32.mxu0 %vm5106_vm0, %v7510_v49 }
 0x3de   :  { %2259 = vmatprep.subr.mxu1 %v7652_v63  ;;  %4304 = vmatprep.subr.mxu0 %v7510_v49  ;;  %v6471_v63 = vld [vmem:[%s7261_s5] ss:$0 sm:$0xff] }
 0x3df   :  { %7655 = vst [vmem:[#allocation54_spill] sm:$0xff] %v6471_v63 }
 0x45b   :  { %v1829_v58 = vpop.f32.mrf.mxu1  ;;  %v1900_v45 = vpop.f32.mrf.mxu0 }
 0x45c   :  { %v1904_v20 = vadd.f32 %v1829_v58, %v7653_v51  ;;  %v1918_v48 = vadd.f32 %v6471_v63, %v1900_v45 }
 0x45d   :  { %v4233_v18 = vpop.f32.mrf.mxu0  ;;  %v1831_v41 = vpop.f32.mrf.mxu1 }
 0x45e   :  { %v3640_v5 = vmul.f32 -1.442695, %v1904_v20  ;;  %v1911_v23 = vadd.f32 %v1831_v41, %v7654_v39  ;;  %v7657_v39 = vld [vmem:[#allocation58_spill] sm:$0xff] }
 0x460   :  { %4625 = vpow2.f32 %v3640_v5  ;;  %v3641_v57 = vmul.f32 -1.442695, %v1911_v23  ;;  %v7656_v5 = vld [vmem:[#allocation64_spill] sm:$0xff] }
 0x462   :  { %4627 = vpow2.f32 %v3641_v57 }
 0x46d   :  { %v4626_v28 = vpop.eup %4625 }
 0x46e   :  { %v1908_v52 = vadd.f32 1.0, %v4626_v28 }
 0x46f   :  { %v4628_v26 = vpop.eup %4627 }
 0x470   :  { %4629 = vrcp.f32 %v1908_v52  ;;  %v1915_v57 = vadd.f32 1.0, %v4628_v26  ;;  %v7674_v26 = vld [vmem:[#allocation99_spill] sm:$0xff] }
 0x47c   :  { %v1991_v51 = vpop.f32.mrf.mxu1  ;;  %v2062_v58 = vpop.f32.mrf.mxu0 }
 0x47d   :  { %v4630_v20 = vpop.eup %4629  ;;  %v2066_v18 = vadd.f32 %v1991_v51, %v7656_v5  ;;  %v6603_v5 = vld [vmem:[#allocation10 + $0xf0] sm:$0xff] }
 0x47e   :  { %v1919_v24 = vmul.f32 %v4630_v20, %v1918_v48  ;;  %v4268_v41 = vpop.f32.mrf.mxu0  ;;  %v1993_v52 = vpop.f32.mrf.mxu1  ;;  %7679 = vst [vmem:[#allocation30_spill] sm:$0xff] %v6603_v5 }
 0x47f   :  { %v3642_v23 = vmul.f32 -1.442695, %v2066_v18  ;;  %v2073_v54 = vadd.f32 %v1993_v52, %v7658_v62  ;;  %v7680_v18 = vld [vmem:[#allocation101_spill] sm:$0xff]  ;;  %v6607_v41 = vld [vmem:[#allocation10 + $0xe0] sm:$0xff]  ;;  %v7686_v52 = vld [vmem:[#allocation103_spill] sm:$0xff] }
 0x480   :  { %v1920_v28 = vadd.f32 %v1919_v24, %v7657_v39  ;;  %v6587_v24 = vld [vmem:[#allocation10 + $0x120] sm:$0xff]  ;;  %7681 = vst [vmem:[#allocation31_spill] sm:$0xff] %v6607_v41 }
 0x481   :  { %4631 = vpow2.f32 %v3642_v23  ;;  %v3643_v22 = vmul.f32 -1.442695, %v2073_v54  ;;  %7673 = vst [vmem:[#allocation26_spill] sm:$0xff] %v6587_v24  ;;  %v6591_v54 = vld [vmem:[#allocation10 + $0x110] sm:$0xff]  ;;  %v6611_v23 = vld [vmem:[#allocation10 + $0xd8] sm:$0xff]  ;;  %v7683_v39 = vld [vmem:[#allocation102_spill] sm:$0xff] }
 0x482   :  { %4633 = vtanh.f32 %v1920_v28  ;;  %7675 = vst [vmem:[#allocation27_spill] sm:$0xff] %v6591_v54  ;;  %7682 = vst [vmem:[#allocation32_spill] sm:$0xff] %v6611_v23  ;;  %v6615_v28 = vld [vmem:[#allocation10 + $0xc8] sm:$0xff] }
 0x483   :  { %4635 = vrcp.f32 %v1915_v57  ;;  %7684 = vst [vmem:[#allocation33_spill] sm:$0xff] %v6615_v28  ;;  %v6619_v57 = vld [vmem:[#allocation10 + $0xc0] sm:$0xff] }
 0x484   :  { %4637 = vpow2.f32 %v3643_v22  ;;  %v6583_v22 = vld [vmem:[#allocation10 + $0x128] sm:$0xff]  ;;  %7685 = vst [vmem:[#allocation34_spill] sm:$0xff] %v6619_v57 }
 0x485   :  { %7672 = vst [vmem:[#allocation25_spill] sm:$0xff] %v6583_v22 }
 0x48e   :  { %v4632_v16 = vpop.eup %4631 }
 0x48f   :  { %v4634_v45 = vpop.eup %4633  ;;  %v2070_v63 = vadd.f32 1.0, %v4632_v16 }
 0x490   :  { %v1922_v32 = vsub.f32 %v6289_v25, %v4634_v45  ;;  %v4636_v51 = vpop.eup %4635 }
 0x491   :  { %4639 = vrcp.f32 %v2070_v63  ;;  %v4638_v62 = vpop.eup %4637  ;;  %v7677_v63 = vld [vmem:[#allocation100_spill] sm:$0xff] }
 0x492   :  { %v1923_v48 = vmul.f32 %v4636_v51, %v1922_v32  ;;  %v2077_v16 = vadd.f32 1.0, %v4638_v62  ;;  %v6595_v32 = vld [vmem:[#allocation10 + $0x108] sm:$0xff]  ;;  %v6631_v62 = vld [vmem:[#allocation10 + $0x98] sm:$0xff] }
 0x493   :  { %7676 = vst [vmem:[#allocation28_spill] sm:$0xff] %v6595_v32  ;;  %v6627_v51 = vld [vmem:[#allocation10 + $0xa8] sm:$0xff]  ;;  %7690 = vst [vmem:[#allocation37_spill] sm:$0xff] %v6631_v62 }
 0x494   :  { %v6478_v20 = vadd.f32 %v4634_v45, %v1923_v48  ;;  %v6623_v45 = vld [vmem:[#allocation10 + $0xb0] sm:$0xff]  ;;  %7688 = vst [vmem:[#allocation36_spill] sm:$0xff] %v6627_v51 }
 0x495   :  { %7687 = vst [vmem:[#allocation35_spill] sm:$0xff] %v6623_v45  ;;  %v7689_v48 = vld [vmem:[#allocation104_spill] sm:$0xff] }
 0x496   :  { %7659 = vst [vmem:[#allocation86_spill] sm:$0xff] %v6478_v20  ;;  %2162 = vmatmul.mubr.f32.vlgmr.msra.gmra.mxu1 %v6478_v20  ;;  %4302 = vmatmul.mubr.f32.vlgmr.msra.gmra.mxu0 %v6478_v20 }
 0x497   :  { %2260 = vmatpush1.msra.mxu1 %v6047_v35  ;;  %4305 = vmatpush3.msra.mxu0 %v6294_v17  ;;  %v6497_v35 = vld [vmem:[%s7262_s6] ss:$0 sm:$0xff] }
 0x498   :  { %2261 = vmatprep.subr.mxu1 %v6051_v33  ;;  %4306 = vmatprep.subr.mxu0 %v7510_v49  ;;  %v2080_v33 = vadd.f32 %v6497_v35, %v2062_v58  ;;  %v6599_v58 = vld [vmem:[#allocation10 + $0xf8] sm:$0xff] }
 0x499   :  { %2262 = vmatpush1.msra.mxu1 %v6055_v0  ;;  %4307 = vmatpush3.msra.mxu0 %v6300_v50  ;;  %7678 = vst [vmem:[#allocation29_spill] sm:$0xff] %v6599_v58 }
 0x49a   :  { %2263 = vmatprep.subr.mxu1 %v6059_v55  ;;  %4308 = vmatprep.subr.mxu0 %v7510_v49 }
 0x49b   :  { %2264 = vmatpush1.msra.mxu1 %v6063_v37  ;;  %4309 = vmatpush3.msra.mxu0 %v6306_v9  ;;  %v7660_v37 = vld [vmem:[#allocation85_spill] sm:$0xff] }
 0x49c   :  { %2265 = vmatprep.subr.mxu1 %v6067_v3  ;;  %4310 = vmatprep.subr.mxu0 %v7510_v49 }
 0x49d   :  { %2266 = vmatpush1.msra.mxu1 %v6072_v27  ;;  %4311 = vmatpush3.msra.mxu0 %v6313_v53 }
 0x49e   :  { %v4640_v0 = vpop.eup %4639  ;;  %2267 = vmatprep.subr.mxu1 %v6076_v34  ;;  %4312 = vmatprep.subr.mxu0 %v7510_v49  ;;  %v7661_v34 = vld [vmem:[#allocation90_spill] sm:$0xff] }
 0x49f   :  { %v2081_v55 = vmul.f32 %v4640_v0, %v2080_v33  ;;  %2268 = vmatpush1.msra.mxu1 %v6080_v2  ;;  %4313 = vmatpush3.msra.mxu0 %v6319_v46  ;;  %v6635_v33 = vld [vmem:[#allocation10 + $0x90] sm:$0xff]  ;;  %v7692_v0 = vld [vmem:[#allocation105_spill] sm:$0xff] }
 0x4a0   :  { %2269 = vmatprep.subr.mxu1 %v6084_v12  ;;  %4314 = vmatprep.subr.mxu0 %v7510_v49  ;;  %7691 = vst [vmem:[#allocation38_spill] sm:$0xff] %v6635_v33 }
 0x4a1   :  { %v2082_v3 = vadd.f32 %v2081_v55, %v7660_v37  ;;  %2270 = vmatpush1.msra.mxu1 %v6089_v40  ;;  %4315 = vmatpush3.msra.mxu0 %v6326_v7  ;;  %v7662_v40 = vld [vmem:[#allocation51_spill] sm:$0xff]  ;;  %v6639_v55 = vld [vmem:[#allocation10 + $0x80] sm:$0xff]  ;;  %v6643_v37 = vld [vmem:[#allocation10 + $0x78] sm:$0xff] }
 0x4a2   :  { %2271 = vmatprep.subr.mxu1 %v6093_v61  ;;  %4316 = vmatprep.subr.mxu0 %v7510_v49  ;;  %v7663_v61 = vld [vmem:[#allocation72_spill] sm:$0xff]  ;;  %7693 = vst [vmem:[#allocation39_spill] sm:$0xff] %v6639_v55  ;;  %7694 = vst [vmem:[#allocation40_spill] sm:$0xff] %v6643_v37 }
 0x4a3   :  { %4641 = vtanh.f32 %v2082_v3  ;;  %2272 = vmatpush1.msra.mxu1 %v6097_v4  ;;  %4317 = vmatpush3.msra.mxu0 %v6332_v43  ;;  %v7664_v4 = vld [vmem:[#allocation55_spill] sm:$0xff]  ;;  %v7695_v3 = vld [vmem:[#allocation106_spill] sm:$0xff] }
 0x4a4   :  { %2273 = vmatprep.subr.mxu1 %v6101_v47  ;;  %4318 = vmatprep.subr.mxu0 %v7510_v49  ;;  %4643 = vrcp.f32 %v2077_v16  ;;  %v6647_v16 = vld [vmem:[#allocation10 + $0x68] sm:$0xff] }
 0x4a5   :  { %2274 = vmatpush1.msra.mxu1 %v6105_v6  ;;  %4319 = vmatpush3.msra.mxu0 %v6338_v11  ;;  %v7665_v6 = vld [vmem:[#allocation50_spill] sm:$0xff]  ;;  %7696 = vst [vmem:[#allocation41_spill] sm:$0xff] %v6647_v16 }
 0x4a6   :  { %2275 = vmatprep.subr.mxu1 %v6109_v44  ;;  %4320 = vmatprep.subr.mxu0 %v7510_v49  ;;  %v7666_v44 = vld [vmem:[#allocation88_spill] sm:$0xff] }
 0x4a7   :  { %2276 = vmatpush1.msra.mxu1 %v6113_v8  ;;  %4321 = vmatpush3.msra.mxu0 %v6344_v21 }
 0x4a8   :  { %2277 = vmatprep.subr.mxu1 %v6117_v1  ;;  %4322 = vmatprep.subr.mxu0 %v7510_v49  ;;  %v7668_v1 = vld [vmem:[#allocation68_spill] sm:$0xff] }
 0x4a9   :  { %2278 = vmatpush1.msra.mxu1 %v6121_v60  ;;  %4323 = vmatpush3.msra.mxu0 %v6350_v36  ;;  %v6559_v60 = vld [vmem:[#allocation10 + $0x170] sm:$0xff] }
 0x4aa   :  { %2279 = vmatprep.subr.mxu1 %v6125_v10  ;;  %4324 = vmatprep.subr.mxu0 %v7510_v49  ;;  %v6563_v10 = vld [vmem:[#allocation10 + $0x168] sm:$0xff] }
 0x4ab   :  { %2280 = vmatpush1.msra.mxu1 %v6129_v38  ;;  %4325 = vmatpush3.msra.mxu0 %v6356_v14  ;;  %v7669_v38 = vld [vmem:[#allocation96_spill] sm:$0xff] }
 0x4ac   :  { %2281 = vmatprep.subr.mxu1 %v6133_v13  ;;  %4326 = vmatprep.subr.mxu0 %v7510_v49  ;;  %v6567_v13 = vld [vmem:[#allocation10 + $0x158] sm:$0xff] }
 0x4ad   :  { %2282 = vmatpush1.msra.mxu1 %v6137_v31  ;;  %4327 = vmatpush3.msra.mxu0 %v6362_v29  ;;  %v6571_v31 = vld [vmem:[#allocation10 + $0x150] sm:$0xff] }
 0x4ae   :  { %2283 = vmatprep.subr.mxu1 %v6141_v15  ;;  %4328 = vmatprep.subr.mxu0 %v7510_v49  ;;  %v7670_v15 = vld [vmem:[#allocation97_spill] sm:$0xff] }
 0x4af   :  { %2284 = vmatpush1.msra.mxu1 %v6145_v59  ;;  %4329 = vmatpush3.msra.mxu0 %v6368_v42  ;;  %v6575_v59 = vld [vmem:[#allocation10 + $0x140] sm:$0xff] }
 0x4b0   :  { %v4642_v27 = vpop.eup %4641  ;;  %2285 = vmatprep.subr.mxu1 %v6149_v30  ;;  %4330 = vmatprep.subr.mxu0 %v7510_v49  ;;  %v6579_v30 = vld [vmem:[#allocation10 + $0x138] sm:$0xff] }
 0x4b1   :  { %2286 = vmatpush1.msra.mxu1 %v6153_v19  ;;  %4331 = vmatpush3.msra.mxu0 %v6374_v56  ;;  %v2084_v2 = vsub.f32 %v7661_v34, %v4642_v27  ;;  %v4644_v12 = vpop.eup %4643  ;;  %v7671_v19 = vld [vmem:[#allocation98_spill] sm:$0xff] }
 0x4b2   :  { %2287 = vmatprep.subr.mxu1 %v7662_v40  ;;  %4332 = vmatprep.subr.mxu0 %v7510_v49  ;;  %v6659_v40 = vld [vmem:[#allocation10 + $0x48] sm:$0xff] }
 0x4b3   :  { %2288 = vmatpush1.msra.mxu1 %v7663_v61  ;;  %4333 = vmatpush3.msra.mxu0 %v7664_v4  ;;  %v2085_v47 = vmul.f32 %v4644_v12, %v2084_v2  ;;  %v7698_v2 = vld [vmem:[#allocation107_spill] sm:$0xff]  ;;  %v6655_v12 = vld [vmem:[#allocation10 + $0x50] sm:$0xff]  ;;  %7700 = vst [vmem:[#allocation47_spill] sm:$0xff] %v6659_v40 }
 0x4b4   :  { %2289 = vmatprep.subr.mxu1 %v7665_v6  ;;  %4334 = vmatprep.subr.mxu0 %v7510_v49  ;;  %7699 = vst [vmem:[#allocation45_spill] sm:$0xff] %v6655_v12  ;;  %v7701_v61 = vld [vmem:[#allocation108_spill] sm:$0xff] }
 0x4b5   :  { %2290 = vmatpush1.msra.mxu1 %v7666_v44  ;;  %2323 = vmatprep.mubr.f32.mxu1 %v7510_v49  ;;  %v6552_v8 = vadd.f32 %v4642_v27, %v2085_v47  ;;  %v6651_v27 = vld [vmem:[#allocation10 + $0x60] sm:$0xff]  ;;  %v6663_v47 = vld [vmem:[#allocation10 + $0x38] sm:$0xff]  ;;  %v6667_v6 = vld [vmem:[#allocation10 + $0x30] sm:$0xff] }
 0x4b6   :  { %4335 = vmatpush3.msra.mxu0 %v7668_v1  ;;  %4336 = vmatprep.mubr.msk.f32.mxu0 %vm5106_vm0, %v7510_v49  ;;  %7697 = vst [vmem:[#allocation44_spill] sm:$0xff] %v6651_v27  ;;  %7702 = vst [vmem:[#allocation92_spill] sm:$0xff] %v6663_v47  ;;  %v7704_v44 = vld [vmem:[#allocation109_spill] sm:$0xff] }
 0x4b7   :  { %7667 = vst [vmem:[#allocation87_spill] sm:$0xff] %v6552_v8  ;;  %2324 = vmatmul.mubr.f32.vlgmr.msra.gmra.mxu1 %v6552_v8  ;;  %4337 = vmatmul.mubr.f32.vlgmr.msra.gmra.mxu0 %v6552_v8  ;;  %7703 = vst [vmem:[#allocation93_spill] sm:$0xff] %v6667_v6 }
 0x4b8   :  { %2429 = vmatprep.subr.mxu1 %v6559_v60  ;;  %4339 = vmatprep.subr.mxu0 %v7510_v49 }
 0x4b9   :  { %2430 = vmatpush1.msra.mxu1 %v6563_v10  ;;  %4340 = vmatpush3.msra.mxu0 %v7669_v38  ;;  %v6671_v38 = vld [vmem:[#allocation10 + $0x20] sm:$0xff] }
 0x4ba   :  { %2431 = vmatprep.subr.mxu1 %v6567_v13  ;;  %4341 = vmatprep.subr.mxu0 %v7510_v49  ;;  %7705 = vst [vmem:[#allocation42_spill] sm:$0xff] %v6671_v38 }
 0x4bb   :  { %2432 = vmatpush1.msra.mxu1 %v6571_v31  ;;  %4342 = vmatpush3.msra.mxu0 %v7670_v15  ;;  %v6675_v15 = vld [vmem:[#allocation10 + $0x18] sm:$0xff] }
 0x4bc   :  { %2433 = vmatprep.subr.mxu1 %v6575_v59  ;;  %4343 = vmatprep.subr.mxu0 %v7510_v49  ;;  %7706 = vst [vmem:[#allocation94_spill] sm:$0xff] %v6675_v15 }
 0x4bd   :  { %2434 = vmatpush1.msra.mxu1 %v6579_v30  ;;  %4344 = vmatpush3.msra.mxu0 %v7671_v19  ;;  %v7707_v19 = vld [vmem:[#allocation110_spill] sm:$0xff] }
 0x4be   :  { %2435 = vmatprep.subr.mxu1 %v6583_v22  ;;  %4345 = vmatprep.subr.mxu0 %v7510_v49 }
 0x4bf   :  { %2436 = vmatpush1.msra.mxu1 %v6587_v24  ;;  %4346 = vmatpush3.msra.mxu0 %v7674_v26  ;;  %v6679_v26 = vld [vmem:[#allocation10 + $0x8] sm:$0xff] }
 0x4c0   :  { %2437 = vmatprep.subr.mxu1 %v6591_v54  ;;  %4347 = vmatprep.subr.mxu0 %v7510_v49  ;;  %7708 = vst [vmem:[#allocation43_spill] sm:$0xff] %v6679_v26 }
 0x4c1   :  { %2438 = vmatpush1.msra.mxu1 %v6595_v32  ;;  %4348 = vmatpush3.msra.mxu0 %v7677_v63  ;;  %v6683_v63 = vld [vmem:[#allocation10] sm:$0xff] }
 0x4c2   :  { %2439 = vmatprep.subr.mxu1 %v6599_v58  ;;  %4349 = vmatprep.subr.mxu0 %v7510_v49  ;;  %7709 = vst [vmem:[#allocation95_spill] sm:$0xff] %v6683_v63 }
 0x4c3   :  { %2440 = vmatpush1.msra.mxu1 %v6603_v5  ;;  %4350 = vmatpush3.msra.mxu0 %v7680_v18  ;;  %v7710_v18 = vld [vmem:[#allocation111_spill] sm:$0xff] }
 0x4c4   :  { %2441 = vmatprep.subr.mxu1 %v6607_v41  ;;  %4351 = vmatprep.subr.mxu0 %v7510_v49 }
 0x4c5   :  { %2442 = vmatpush1.msra.mxu1 %v6611_v23  ;;  %4352 = vmatpush3.msra.mxu0 %v7683_v39  ;;  %v6690_v39 = vld [vmem:[#allocation12 + $0x170] sm:$0xff] }
 0x4c6   :  { %2443 = vmatprep.subr.mxu1 %v6615_v28  ;;  %4353 = vmatprep.subr.mxu0 %v7510_v49  ;;  %7711 = vst [vmem:[#allocation46_spill] sm:$0xff] %v6690_v39 }
 0x4c7   :  { %2444 = vmatpush1.msra.mxu1 %v6619_v57  ;;  %4354 = vmatpush3.msra.mxu0 %v7686_v52 }
 0x4c8   :  { %2445 = vmatprep.subr.mxu1 %v6623_v45  ;;  %4355 = vmatprep.subr.mxu0 %v7510_v49 }
 0x4c9   :  { %2446 = vmatpush1.msra.mxu1 %v6627_v51  ;;  %4356 = vmatpush3.msra.mxu0 %v7689_v48 }
 0x4ca   :  { %2447 = vmatprep.subr.mxu1 %v6631_v62  ;;  %4357 = vmatprep.subr.mxu0 %v7510_v49 }
 0x4cb   :  { %2448 = vmatpush1.msra.mxu1 %v6635_v33  ;;  %4358 = vmatpush3.msra.mxu0 %v7692_v0  ;;  %v7712_v0 = vld [vmem:[#allocation61_spill] sm:$0xff] }
 0x4cc   :  { %2449 = vmatprep.subr.mxu1 %v6639_v55  ;;  %4359 = vmatprep.subr.mxu0 %v7510_v49 }
 0x4cd   :  { %2450 = vmatpush1.msra.mxu1 %v6643_v37  ;;  %4360 = vmatpush3.msra.mxu0 %v7695_v3 }
 0x4ce   :  { %2451 = vmatprep.subr.mxu1 %v6647_v16  ;;  %4361 = vmatprep.subr.mxu0 %v7510_v49 }
 0x4cf   :  { %2452 = vmatpush1.msra.mxu1 %v6651_v27  ;;  %4362 = vmatpush3.msra.mxu0 %v7698_v2 }
 0x4d0   :  { %2453 = vmatprep.subr.mxu1 %v6655_v12  ;;  %4363 = vmatprep.subr.mxu0 %v7510_v49 }
 0x4d1   :  { %2454 = vmatpush1.msra.mxu1 %v6659_v40  ;;  %4364 = vmatpush3.msra.mxu0 %v7701_v61  ;;  %v7715_v40 = vld [vmem:[#allocation60_spill] sm:$0xff] }
 0x4d2   :  { %2455 = vmatprep.subr.mxu1 %v6663_v47  ;;  %4365 = vmatprep.subr.mxu0 %v7510_v49 }
 0x4d3   :  { %2456 = vmatpush1.msra.mxu1 %v6667_v6  ;;  %4366 = vmatpush3.msra.mxu0 %v7704_v44 }
 0x4d4   :  { %2457 = vmatprep.subr.mxu1 %v6671_v38  ;;  %4367 = vmatprep.subr.mxu0 %v7510_v49 }
 0x4d5   :  { %2458 = vmatpush1.msra.mxu1 %v6675_v15  ;;  %4368 = vmatpush3.msra.mxu0 %v7707_v19  ;;  %v7713_v19 = vld [vmem:[#allocation63_spill] sm:$0xff]  ;;  %v7714_v15 = vld [vmem:[#allocation54_spill] sm:$0xff] }
 0x4d6   :  { %2459 = vmatprep.subr.mxu1 %v6679_v26  ;;  %4369 = vmatprep.subr.mxu0 %v7510_v49 }
 0x4d7   :  { %2460 = vmatpush1.msra.mxu1 %v6683_v63  ;;  %2493 = vmatprep.mubr.f32.mxu1 %v7510_v49 }
 0x4d8   :  { %4370 = vmatpush3.msra.mxu0 %v7710_v18  ;;  %4371 = vmatprep.mubr.msk.f32.mxu0 %vm5106_vm0, %v7510_v49 }
 0x4d9   :  { %2591 = vmatprep.subr.mxu1 %v6690_v39  ;;  %4374 = vmatprep.subr.mxu0 %v7510_v49 }
 0x556   :  { %v2163_v52 = vpop.f32.mrf.mxu1  ;;  %v2234_v48 = vpop.f32.mrf.mxu0 }
 0x557   :  { %v2238_v3 = vadd.f32 %v2163_v52, %v7712_v0  ;;  %v2252_v39 = vadd.f32 %v7714_v15, %v2234_v48 }
 0x558   :  { %v4303_v2 = vpop.f32.mrf.mxu0  ;;  %v2165_v44 = vpop.f32.mrf.mxu1 }
 0x559   :  { %v3644_v61 = vmul.f32 -1.442695, %v2238_v3  ;;  %v2245_v34 = vadd.f32 %v2165_v44, %v7713_v19  ;;  %v7716_v2 = vld [vmem:[#allocation62_spill] sm:$0xff] }
 0x55b   :  { %4645 = vpow2.f32 %v3644_v61  ;;  %v3645_v18 = vmul.f32 -1.442695, %v2245_v34  ;;  %v7717_v34 = vld [vmem:[#allocation82_spill] sm:$0xff] }
 0x55d   :  { %4647 = vpow2.f32 %v3645_v18 }
 0x568   :  { %v4646_v25 = vpop.eup %4645 }
 0x569   :  { %v2242_v63 = vadd.f32 1.0, %v4646_v25 }
 0x56a   :  { %v4648_v26 = vpop.eup %4647 }
 0x56b   :  { %4649 = vrcp.f32 %v2242_v63  ;;  %v2249_v27 = vadd.f32 1.0, %v4648_v26  ;;  %v6713_v26 = vld [vmem:[#allocation12 + $0x150] sm:$0xff] }
 0x577   :  { %v2325_v38 = vpop.f32.mrf.mxu1  ;;  %v2396_v6 = vpop.f32.mrf.mxu0 }
 0x578   :  { %v4650_v47 = vpop.eup %4649  ;;  %v2400_v12 = vadd.f32 %v2325_v38, %v7715_v40  ;;  %v6709_v38 = vld [vmem:[#allocation12 + $0x158] sm:$0xff] }
 0x579   :  { %v2253_v52 = vmul.f32 %v4650_v47, %v2252_v39  ;;  %v4338_v0 = vpop.f32.mrf.mxu0  ;;  %v2327_v25 = vpop.f32.mrf.mxu1  ;;  %v6721_v39 = vld [vmem:[#allocation12 + $0x138] sm:$0xff] }
 0x57a   :  { %v3646_v3 = vmul.f32 -1.442695, %v2400_v12  ;;  %v2407_v63 = vadd.f32 %v2327_v25, %v7717_v34  ;;  %v6730_v0 = vld [vmem:[#allocation12 + $0x120] sm:$0xff] }
 0x57b   :  { %v2254_v61 = vadd.f32 %v2253_v52, %v7716_v2  ;;  %v6734_v2 = vld [vmem:[#allocation12 + $0x110] sm:$0xff] }
 0x57c   :  { %4651 = vpow2.f32 %v3646_v3  ;;  %v3647_v44 = vmul.f32 -1.442695, %v2407_v63  ;;  %v6747_v63 = vld [vmem:[#allocation12 + $0xf0] sm:$0xff] }
 0x57d   :  { %4653 = vtanh.f32 %v2254_v61  ;;  %v6738_v61 = vld [vmem:[#allocation12 + $0x108] sm:$0xff] }
 0x57e   :  { %4655 = vrcp.f32 %v2249_v27  ;;  %v6705_v27 = vld [vmem:[#allocation12 + $0x168] sm:$0xff] }
 0x57f   :  { %4657 = vpow2.f32 %v3647_v44  ;;  %v6751_v44 = vld [vmem:[#allocation12 + $0xe0] sm:$0xff] }
 0x589   :  { %v4652_v19 = vpop.eup %4651 }
 0x58a   :  { %v4654_v48 = vpop.eup %4653  ;;  %v2404_v18 = vadd.f32 1.0, %v4652_v19  ;;  %v6759_v19 = vld [vmem:[#allocation12 + $0xc8] sm:$0xff] }
 0x58b   :  { %v2256_v15 = vsub.f32 %v6478_v20, %v4654_v48  ;;  %v4656_v40 = vpop.eup %4655  ;;  %v6824_v20 = vld [vmem:[#allocation12 + $0x8] sm:$0xff] }
 0x58c   :  { %4659 = vrcp.f32 %v2404_v18  ;;  %v4658_v52 = vpop.eup %4657  ;;  %v6775_v18 = vld [vmem:[#allocation12 + $0x98] sm:$0xff]  ;;  %7722 = vst [vmem:[#allocation58_spill] sm:$0xff] %v6824_v20 }
 0x58d   :  { %v2257_v47 = vmul.f32 %v4656_v40, %v2256_v15  ;;  %v6717_v15 = vld [vmem:[#allocation12 + $0x140] sm:$0xff]  ;;  %v2411_v34 = vadd.f32 1.0, %v4658_v52  ;;  %v6779_v40 = vld [vmem:[#allocation12 + $0x90] sm:$0xff] }
 0x58e   :  { %v6795_v52 = vld [vmem:[#allocation12 + $0x60] sm:$0xff] }
 0x58f   :  { %v6701_v12 = vadd.f32 %v4654_v48, %v2257_v47  ;;  %v6767_v48 = vld [vmem:[#allocation12 + $0xb0] sm:$0xff]  ;;  %v6787_v47 = vld [vmem:[#allocation12 + $0x78] sm:$0xff] }
 0x591   :  { %7718 = vst [vmem:[#allocation57_spill] sm:$0xff] %v6701_v12  ;;  %2494 = vmatmul.mubr.f32.vlgmr.msra.gmra.mxu1 %v6701_v12  ;;  %4372 = vmatmul.mubr.f32.vlgmr.msra.gmra.mxu0 %v6701_v12 }
 0x592   :  { %2592 = vmatpush1.msra.mxu1 %v6705_v27  ;;  %4375 = vmatpush3.msra.mxu0 %v6294_v17  ;;  %v6725_v17 = vld [vmem:[#allocation12 + $0x128] sm:$0xff] }
 0x593   :  { %2593 = vmatprep.subr.mxu1 %v6709_v38  ;;  %4376 = vmatprep.subr.mxu0 %v7510_v49 }
 0x594   :  { %2594 = vmatpush1.msra.mxu1 %v6713_v26  ;;  %4377 = vmatpush3.msra.mxu0 %v6300_v50  ;;  %v2414_v50 = vadd.f32 %v6497_v35, %v2396_v6  ;;  %v6742_v6 = vld [vmem:[#allocation12 + $0xf8] sm:$0xff] }
 0x595   :  { %2595 = vmatprep.subr.mxu1 %v6717_v15  ;;  %4378 = vmatprep.subr.mxu0 %v7510_v49 }
 0x596   :  { %2596 = vmatpush1.msra.mxu1 %v6721_v39  ;;  %4379 = vmatpush3.msra.mxu0 %v6306_v9 }
 0x597   :  { %2597 = vmatprep.subr.mxu1 %v6725_v17  ;;  %4380 = vmatprep.subr.mxu0 %v7510_v49 }
 0x598   :  { %2598 = vmatpush1.msra.mxu1 %v6730_v0  ;;  %4381 = vmatpush3.msra.mxu0 %v6313_v53  ;;  %v7719_v53 = vld [vmem:[#allocation83_spill] sm:$0xff] }
 0x599   :  { %v4660_v3 = vpop.eup %4659  ;;  %2599 = vmatprep.subr.mxu1 %v6734_v2  ;;  %4382 = vmatprep.subr.mxu0 %v7510_v49 }
 0x59a   :  { %v2415_v9 = vmul.f32 %v4660_v3, %v2414_v50  ;;  %2600 = vmatpush1.msra.mxu1 %v6738_v61  ;;  %4383 = vmatpush3.msra.mxu0 %v6319_v46  ;;  %v6755_v46 = vld [vmem:[#allocation12 + $0xd8] sm:$0xff]  ;;  %v6803_v50 = vld [vmem:[#allocation12 + $0x48] sm:$0xff] }
 0x59b   :  { %2601 = vmatprep.subr.mxu1 %v6742_v6  ;;  %4384 = vmatprep.subr.mxu0 %v7510_v49  ;;  %v6807_v3 = vld [vmem:[#allocation12 + $0x38] sm:$0xff] }
 0x59c   :  { %v2416_v25 = vadd.f32 %v2415_v9, %v7719_v53  ;;  %2602 = vmatpush1.msra.mxu1 %v6747_v63  ;;  %4385 = vmatpush3.msra.mxu0 %v6326_v7  ;;  %v6763_v7 = vld [vmem:[#allocation12 + $0xc0] sm:$0xff] }
 0x59d   :  { %2603 = vmatprep.subr.mxu1 %v6751_v44  ;;  %4386 = vmatprep.subr.mxu0 %v7510_v49 }
 0x59e   :  { %4661 = vtanh.f32 %v2416_v25  ;;  %2604 = vmatpush1.msra.mxu1 %v6755_v46  ;;  %4387 = vmatpush3.msra.mxu0 %v6332_v43  ;;  %v6771_v43 = vld [vmem:[#allocation12 + $0xa8] sm:$0xff]  ;;  %v6816_v25 = vld [vmem:[#allocation12 + $0x20] sm:$0xff] }
 0x59f   :  { %2605 = vmatprep.subr.mxu1 %v6759_v19  ;;  %4388 = vmatprep.subr.mxu0 %v7510_v49  ;;  %4663 = vrcp.f32 %v2411_v34  ;;  %7720 = vst [vmem:[#allocation59_spill] sm:$0xff] %v6816_v25 }
 0x5a0   :  { %2606 = vmatpush1.msra.mxu1 %v6763_v7  ;;  %4389 = vmatpush3.msra.mxu0 %v6338_v11  ;;  %v6783_v11 = vld [vmem:[#allocation12 + $0x80] sm:$0xff] }
 0x5a1   :  { %2607 = vmatprep.subr.mxu1 %v6767_v48  ;;  %4390 = vmatprep.subr.mxu0 %v7510_v49 }
 0x5a2   :  { %2608 = vmatpush1.msra.mxu1 %v6771_v43  ;;  %4391 = vmatpush3.msra.mxu0 %v6344_v21  ;;  %v6791_v21 = vld [vmem:[#allocation12 + $0x68] sm:$0xff] }
 0x5a3   :  { %2609 = vmatprep.subr.mxu1 %v6775_v18  ;;  %4392 = vmatprep.subr.mxu0 %v7510_v49 }
 0x5a4   :  { %2610 = vmatpush1.msra.mxu1 %v6779_v40  ;;  %4393 = vmatpush3.msra.mxu0 %v6350_v36  ;;  %v6799_v36 = vld [vmem:[#allocation12 + $0x50] sm:$0xff] }
 0x5a5   :  { %2611 = vmatprep.subr.mxu1 %v6783_v11  ;;  %4394 = vmatprep.subr.mxu0 %v7510_v49 }
 0x5a6   :  { %2612 = vmatpush1.msra.mxu1 %v6787_v47  ;;  %4395 = vmatpush3.msra.mxu0 %v6356_v14 }
 0x5a7   :  { %2613 = vmatprep.subr.mxu1 %v6791_v21  ;;  %4396 = vmatprep.subr.mxu0 %v7510_v49 }
 0x5a8   :  { %2614 = vmatpush1.msra.mxu1 %v6795_v52  ;;  %4397 = vmatpush3.msra.mxu0 %v6362_v29  ;;  %v6811_v29 = vld [vmem:[#allocation12 + $0x30] sm:$0xff] }
 0x5a9   :  { %2615 = vmatprep.subr.mxu1 %v6799_v36  ;;  %4398 = vmatprep.subr.mxu0 %v7510_v49 }
 0x5aa   :  { %2616 = vmatpush1.msra.mxu1 %v6803_v50  ;;  %4399 = vmatpush3.msra.mxu0 %v6368_v42  ;;  %v6820_v42 = vld [vmem:[#allocation12 + $0x18] sm:$0xff] }
 0x5ab   :  { %v4662_v14 = vpop.eup %4661  ;;  %2617 = vmatprep.subr.mxu1 %v6807_v3  ;;  %4400 = vmatprep.subr.mxu0 %v7510_v49  ;;  %7721 = vst [vmem:[#allocation64_spill] sm:$0xff] %v6820_v42 }
 0x5ac   :  { %2618 = vmatpush1.msra.mxu1 %v6811_v29  ;;  %4401 = vmatpush3.msra.mxu0 %v6374_v56  ;;  %v2418_v9 = vsub.f32 %v6552_v8, %v4662_v14  ;;  %v4664_v53 = vpop.eup %4663  ;;  %v6828_v56 = vld [vmem:[#allocation12] sm:$0xff] }
 0x5ad   :  { %2619 = vmatprep.subr.mxu1 %v6816_v25  ;;  %4402 = vmatprep.subr.mxu0 %v7510_v49  ;;  %7723 = vst [vmem:[#allocation84_spill] sm:$0xff] %v6828_v56 }
 0x5ae   :  { %2620 = vmatpush1.msra.mxu1 %v6820_v42  ;;  %4403 = vmatpush3.msra.mxu0 %v7664_v4  ;;  %v2419_v34 = vmul.f32 %v4664_v53, %v2418_v9  ;;  %v6842_v4 = vld [vmem:[#allocation10 + $0x178] sm:$0xff]  ;;  %v6860_v9 = vld [vmem:[#allocation10 + $0x130] sm:$0xff] }
 0x5af   :  { %2621 = vmatprep.subr.mxu1 %v6824_v20  ;;  %4404 = vmatprep.subr.mxu0 %v7510_v49  ;;  %7726 = vst [vmem:[#allocation72_spill] sm:$0xff] %v6860_v9  ;;  %v6866_v53 = vld [vmem:[#allocation10 + $0x118] sm:$0xff] }
 0x5b0   :  { %2622 = vmatpush1.msra.mxu1 %v6828_v56  ;;  %2655 = vmatprep.mubr.f32.mxu1 %v7510_v49  ;;  %v6832_v8 = vadd.f32 %v4662_v14, %v2419_v34  ;;  %v6854_v14 = vld [vmem:[#allocation10 + $0x148] sm:$0xff]  ;;  %7727 = vst [vmem:[#allocation55_spill] sm:$0xff] %v6866_v53  ;;  %v6872_v34 = vld [vmem:[#allocation10 + $0x100] sm:$0xff] }
 0x5b1   :  { %4405 = vmatpush3.msra.mxu0 %v7668_v1  ;;  %4406 = vmatprep.mubr.msk.f32.mxu0 %vm5106_vm0, %v7510_v49  ;;  %v6848_v1 = vld [vmem:[#allocation10 + $0x160] sm:$0xff]  ;;  %7725 = vst [vmem:[#allocation51_spill] sm:$0xff] %v6854_v14  ;;  %7728 = vst [vmem:[#allocation50_spill] sm:$0xff] %v6872_v34 }
 0x5b2   :  { %7724 = vst [vmem:[#allocation85_spill] sm:$0xff] %v6832_v8  ;;  %2656 = vmatmul.mubr.f32.vlgmr.msra.gmra.mxu1 %v6832_v8  ;;  %4407 = vmatmul.mubr.f32.vlgmr.msra.gmra.mxu0 %v6832_v8 }
 0x5b3   :  { %2761 = vmatprep.subr.mxu1 %v6559_v60  ;;  %4409 = vmatprep.subr.mxu0 %v7510_v49 }
 0x5b4   :  { %2762 = vmatpush1.msra.mxu1 %v6563_v10  ;;  %4410 = vmatpush3.msra.mxu0 %v6842_v4 }
 0x5b5   :  { %2763 = vmatprep.subr.mxu1 %v6567_v13  ;;  %4411 = vmatprep.subr.mxu0 %v7510_v49 }
 0x5b6   :  { %2764 = vmatpush1.msra.mxu1 %v6571_v31  ;;  %4412 = vmatpush3.msra.mxu0 %v6848_v1 }
 0x5b7   :  { %2765 = vmatprep.subr.mxu1 %v6575_v59  ;;  %4413 = vmatprep.subr.mxu0 %v7510_v49 }
 0x5b8   :  { %2766 = vmatpush1.msra.mxu1 %v6579_v30  ;;  %4414 = vmatpush3.msra.mxu0 %v6854_v14 }
 0x5b9   :  { %2767 = vmatprep.subr.mxu1 %v6583_v22  ;;  %4415 = vmatprep.subr.mxu0 %v7510_v49 }
 0x5ba   :  { %2768 = vmatpush1.msra.mxu1 %v6587_v24  ;;  %4416 = vmatpush3.msra.mxu0 %v6860_v9  ;;  %v7752_v24 = vld [vmem:[#allocation56_spill] sm:$0xff] }
 0x5bb   :  { %2769 = vmatprep.subr.mxu1 %v6591_v54  ;;  %4417 = vmatprep.subr.mxu0 %v7510_v49 }
 0x5bc   :  { %2770 = vmatpush1.msra.mxu1 %v6595_v32  ;;  %4418 = vmatpush3.msra.mxu0 %v6866_v53  ;;  %v6878_v32 = vld [vmem:[#allocation10 + $0xe8] sm:$0xff] }
 0x5bd   :  { %2771 = vmatprep.subr.mxu1 %v6599_v58  ;;  %4419 = vmatprep.subr.mxu0 %v7510_v49  ;;  %7729 = vst [vmem:[#allocation88_spill] sm:$0xff] %v6878_v32  ;;  %v7751_v58 = vld [vmem:[#allocation54_spill] sm:$0xff] }
 0x5be   :  { %2772 = vmatpush1.msra.mxu1 %v6603_v5  ;;  %4420 = vmatpush3.msra.mxu0 %v6872_v34  ;;  %v6884_v5 = vld [vmem:[#allocation10 + $0xd0] sm:$0xff] }
 0x5bf   :  { %2773 = vmatprep.subr.mxu1 %v6607_v41  ;;  %4421 = vmatprep.subr.mxu0 %v7510_v49  ;;  %7730 = vst [vmem:[#allocation68_spill] sm:$0xff] %v6884_v5 }
 0x5c0   :  { %2774 = vmatpush1.msra.mxu1 %v6611_v23  ;;  %4422 = vmatpush3.msra.mxu0 %v6878_v32  ;;  %v6890_v23 = vld [vmem:[#allocation10 + $0xb8] sm:$0xff] }
 0x5c1   :  { %2775 = vmatprep.subr.mxu1 %v6615_v28  ;;  %4423 = vmatprep.subr.mxu0 %v7510_v49  ;;  %7731 = vst [vmem:[#allocation96_spill] sm:$0xff] %v6890_v23 }
 0x5c2   :  { %2776 = vmatpush1.msra.mxu1 %v6619_v57  ;;  %4424 = vmatpush3.msra.mxu0 %v6884_v5  ;;  %v6896_v57 = vld [vmem:[#allocation10 + $0xa0] sm:$0xff]  ;;  %v7750_v5 = vld [vmem:[#allocation67_spill] sm:$0xff] }
 0x5c3   :  { %2777 = vmatprep.subr.mxu1 %v6623_v45  ;;  %4425 = vmatprep.subr.mxu0 %v7510_v49  ;;  %7732 = vst [vmem:[#allocation97_spill] sm:$0xff] %v6896_v57 }
 0x5c4   :  { %2778 = vmatpush1.msra.mxu1 %v6627_v51  ;;  %4426 = vmatpush3.msra.mxu0 %v6890_v23  ;;  %v6902_v51 = vld [vmem:[#allocation10 + $0x88] sm:$0xff] }
 0x5c5   :  { %2779 = vmatprep.subr.mxu1 %v6631_v62  ;;  %4427 = vmatprep.subr.mxu0 %v7510_v49  ;;  %7733 = vst [vmem:[#allocation98_spill] sm:$0xff] %v6902_v51  ;;  %v7734_v62 = vld [vmem:[#allocation44_spill] sm:$0xff] }
 0x5c6   :  { %2780 = vmatpush1.msra.mxu1 %v6635_v33  ;;  %4428 = vmatpush3.msra.mxu0 %v6896_v57  ;;  %v6908_v33 = vld [vmem:[#allocation10 + $0x70] sm:$0xff]  ;;  %v7736_v57 = vld [vmem:[#allocation45_spill] sm:$0xff] }
 0x5c7   :  { %2781 = vmatprep.subr.mxu1 %v6639_v55  ;;  %4429 = vmatprep.subr.mxu0 %v7510_v49  ;;  %7735 = vst [vmem:[#allocation99_spill] sm:$0xff] %v6908_v33  ;;  %v7737_v55 = vld [vmem:[#allocation47_spill] sm:$0xff] }
 0x5c8   :  { %2782 = vmatpush1.msra.mxu1 %v6643_v37  ;;  %4430 = vmatpush3.msra.mxu0 %v6902_v51  ;;  %v6914_v37 = vld [vmem:[#allocation10 + $0x58] sm:$0xff]  ;;  %v7739_v51 = vld [vmem:[#allocation92_spill] sm:$0xff] }
 0x5c9   :  { %2783 = vmatprep.subr.mxu1 %v6647_v16  ;;  %4431 = vmatprep.subr.mxu0 %v7510_v49  ;;  %7738 = vst [vmem:[#allocation100_spill] sm:$0xff] %v6914_v37  ;;  %v7740_v16 = vld [vmem:[#allocation93_spill] sm:$0xff] }
 0x5ca   :  { %2784 = vmatpush1.msra.mxu1 %v7734_v62  ;;  %4432 = vmatpush3.msra.mxu0 %v6908_v33  ;;  %v6920_v62 = vld [vmem:[#allocation10 + $0x40] sm:$0xff] }
 0x5cb   :  { %2785 = vmatprep.subr.mxu1 %v7736_v57  ;;  %4433 = vmatprep.subr.mxu0 %v7510_v49  ;;  %7741 = vst [vmem:[#allocation101_spill] sm:$0xff] %v6920_v62  ;;  %v7742_v33 = vld [vmem:[#allocation42_spill] sm:$0xff] }
 0x5cc   :  { %2786 = vmatpush1.msra.mxu1 %v7737_v55  ;;  %4434 = vmatpush3.msra.mxu0 %v6914_v37  ;;  %v7743_v57 = vld [vmem:[#allocation94_spill] sm:$0xff]  ;;  %v6926_v55 = vld [vmem:[#allocation10 + $0x28] sm:$0xff] }
 0x5cd   :  { %2787 = vmatprep.subr.mxu1 %v7739_v51  ;;  %4435 = vmatprep.subr.mxu0 %v7510_v49  ;;  %7744 = vst [vmem:[#allocation102_spill] sm:$0xff] %v6926_v55  ;;  %v7745_v37 = vld [vmem:[#allocation43_spill] sm:$0xff] }
 0x5ce   :  { %2788 = vmatpush1.msra.mxu1 %v7740_v16  ;;  %4436 = vmatpush3.msra.mxu0 %v6920_v62  ;;  %v7746_v51 = vld [vmem:[#allocation95_spill] sm:$0xff]  ;;  %v6933_v16 = vld [vmem:[#allocation10 + $0x10] sm:$0xff] }
 0x5cf   :  { %2789 = vmatprep.subr.mxu1 %v7742_v33  ;;  %4437 = vmatprep.subr.mxu0 %v7510_v49  ;;  %7747 = vst [vmem:[#allocation103_spill] sm:$0xff] %v6933_v16 }
 0x5d0   :  { %2790 = vmatpush1.msra.mxu1 %v7743_v57  ;;  %4438 = vmatpush3.msra.mxu0 %v6926_v55  ;;  %v7748_v57 = vld [vmem:[#allocation46_spill] sm:$0xff] }
 0x5d1   :  { %2791 = vmatprep.subr.mxu1 %v7745_v37  ;;  %4439 = vmatprep.subr.mxu0 %v7510_v49  ;;  %v7749_v37 = vld [vmem:[#allocation65_spill] sm:$0xff] }
 0x5d2   :  { %2792 = vmatpush1.msra.mxu1 %v7746_v51  ;;  %2825 = vmatprep.mubr.f32.mxu1 %v7510_v49 }
 0x5d3   :  { %4440 = vmatpush3.msra.mxu0 %v6933_v16  ;;  %4441 = vmatprep.mubr.msk.f32.mxu0 %vm5106_vm0, %v7510_v49 }
 0x5d4   :  { %2923 = vmatprep.subr.mxu1 %v7748_v57  ;;  %4444 = vmatprep.subr.mxu0 %v7510_v49 }
 0x651   :  { %v2495_v55 = vpop.f32.mrf.mxu1  ;;  %v2566_v33 = vpop.f32.mrf.mxu0 }
 0x652   :  { %v2570_v62 = vadd.f32 %v2495_v55, %v7749_v37  ;;  %v2584_v57 = vadd.f32 %v7751_v58, %v2566_v33 }
 0x653   :  { %v4373_v23 = vpop.f32.mrf.mxu0  ;;  %v2497_v51 = vpop.f32.mrf.mxu1 }
 0x654   :  { %v3648_v45 = vmul.f32 -1.442695, %v2570_v62  ;;  %v2577_v28 = vadd.f32 %v2497_v51, %v7750_v5 }
 0x656   :  { %4665 = vpow2.f32 %v3648_v45  ;;  %v3649_v32 = vmul.f32 -1.442695, %v2577_v28  ;;  %v7753_v45 = vld [vmem:[#allocation66_spill] sm:$0xff] }
 0x658   :  { %4667 = vpow2.f32 %v3649_v32  ;;  %v7754_v32 = vld [vmem:[#allocation80_spill] sm:$0xff] }
 0x663   :  { %v4666_v41 = vpop.eup %4665 }
 0x664   :  { %v2574_v16 = vadd.f32 1.0, %v4666_v41 }
 0x665   :  { %v4668_v34 = vpop.eup %4667 }
 0x666   :  { %4669 = vrcp.f32 %v2574_v16  ;;  %v2581_v14 = vadd.f32 1.0, %v4668_v34 }
 0x672   :  { %v2657_v53 = vpop.f32.mrf.mxu1  ;;  %v2728_v54 = vpop.f32.mrf.mxu0 }
 0x673   :  { %v4670_v9 = vpop.eup %4669  ;;  %v2732_v22 = vadd.f32 %v2657_v53, %v7752_v24  ;;  %v6964_v53 = vld [vmem:[#allocation12 + $0x148] sm:$0xff] }
 0x674   :  { %v2585_v55 = vmul.f32 %v4670_v9, %v2584_v57  ;;  %v4408_v23 = vpop.f32.mrf.mxu0  ;;  %v2659_v5 = vpop.f32.mrf.mxu1  ;;  %v6958_v9 = vld [vmem:[#allocation12 + $0x160] sm:$0xff] }
 0x675   :  { %v3650_v62 = vmul.f32 -1.442695, %v2732_v22  ;;  %v2739_v41 = vadd.f32 %v2659_v5, %v7754_v32  ;;  %v6971_v23 = vld [vmem:[#allocation12 + $0x130] sm:$0xff]  ;;  %v6984_v32 = vld [vmem:[#allocation12 + $0x100] sm:$0xff] }
 0x676   :  { %v2586_v37 = vadd.f32 %v2585_v55, %v7753_v45  ;;  %v2746_v55 = vadd.f32 %v6497_v35, %v2728_v54  ;;  %v7755_v35 = vld [vmem:[#allocation81_spill] sm:$0xff] }
 0x677   :  { %4671 = vpow2.f32 %v3650_v62  ;;  %v3651_v28 = vmul.f32 -1.442695, %v2739_v41  ;;  %v6990_v41 = vld [vmem:[#allocation12 + $0xe8] sm:$0xff] }
 0x678   :  { %4673 = vtanh.f32 %v2586_v37  ;;  %v6977_v37 = vld [vmem:[#allocation12 + $0x118] sm:$0xff] }
 0x679   :  { %4675 = vrcp.f32 %v2581_v14  ;;  %v6952_v14 = vld [vmem:[#allocation12 + $0x178] sm:$0xff] }
 0x67a   :  { %4677 = vpow2.f32 %v3651_v28  ;;  %v6996_v28 = vld [vmem:[#allocation12 + $0xd0] sm:$0xff] }
 0x684   :  { %v4672_v51 = vpop.eup %4671 }
 0x685   :  { %v4674_v58 = vpop.eup %4673  ;;  %v2736_v33 = vadd.f32 1.0, %v4672_v51  ;;  %v7002_v51 = vld [vmem:[#allocation12 + $0xb8] sm:$0xff] }
 0x686   :  { %v2588_v16 = vsub.f32 %v6701_v12, %v4674_v58  ;;  %v4676_v24 = vpop.eup %4675 }
 0x687   :  { %4679 = vrcp.f32 %v2736_v33  ;;  %v4678_v34 = vpop.eup %4677  ;;  %v7014_v33 = vld [vmem:[#allocation12 + $0x88] sm:$0xff] }
 0x688   :  { %v2589_v57 = vmul.f32 %v4676_v24, %v2588_v16  ;;  %v2743_v5 = vadd.f32 1.0, %v4678_v34  ;;  %v7020_v16 = vld [vmem:[#allocation12 + $0x70] sm:$0xff]  ;;  %v7026_v24 = vld [vmem:[#allocation12 + $0x58] sm:$0xff]  ;;  %v7032_v34 = vld [vmem:[#allocation12 + $0x40] sm:$0xff] }
 0x68a   :  { %v6947_v22 = vadd.f32 %v4674_v58, %v2589_v57  ;;  %v7008_v58 = vld [vmem:[#allocation12 + $0xa0] sm:$0xff] }
 0x68c   :  { %2826 = vmatmul.mubr.f32.vlgmr.msra.gmra.mxu1 %v6947_v22  ;;  %4442 = vmatmul.mubr.f32.vlgmr.msra.gmra.mxu0 %v6947_v22 }
 0x68d   :  { %2924 = vmatpush1.msra.mxu1 %v6705_v27  ;;  %4445 = vmatpush3.msra.mxu0 %v6952_v14 }
 0x68e   :  { %2925 = vmatprep.subr.mxu1 %v6709_v38  ;;  %4446 = vmatprep.subr.mxu0 %v7510_v49 }
 0x68f   :  { %2926 = vmatpush1.msra.mxu1 %v6713_v26  ;;  %4447 = vmatpush3.msra.mxu0 %v6958_v9 }
 0x690   :  { %2927 = vmatprep.subr.mxu1 %v6717_v15  ;;  %4448 = vmatprep.subr.mxu0 %v7510_v49 }
 0x691   :  { %2928 = vmatpush1.msra.mxu1 %v6721_v39  ;;  %4449 = vmatpush3.msra.mxu0 %v6964_v53 }
 0x692   :  { %2929 = vmatprep.subr.mxu1 %v6725_v17  ;;  %4450 = vmatprep.subr.mxu0 %v7510_v49 }
 0x693   :  { %2930 = vmatpush1.msra.mxu1 %v6730_v0  ;;  %4451 = vmatpush3.msra.mxu0 %v6971_v23 }
 0x694   :  { %v4680_v62 = vpop.eup %4679  ;;  %2931 = vmatprep.subr.mxu1 %v6734_v2  ;;  %4452 = vmatprep.subr.mxu0 %v7510_v49 }
 0x695   :  { %v2747_v45 = vmul.f32 %v4680_v62, %v2746_v55  ;;  %2932 = vmatpush1.msra.mxu1 %v6738_v61  ;;  %4453 = vmatpush3.msra.mxu0 %v6977_v37 }
 0x696   :  { %2933 = vmatprep.subr.mxu1 %v6742_v6  ;;  %4454 = vmatprep.subr.mxu0 %v7510_v49 }
 0x697   :  { %v2748_v54 = vadd.f32 %v2747_v45, %v7755_v35  ;;  %2934 = vmatpush1.msra.mxu1 %v6747_v63  ;;  %4455 = vmatpush3.msra.mxu0 %v6984_v32  ;;  %v7039_v45 = vld [vmem:[#allocation12 + $0x28] sm:$0xff] }
 0x698   :  { %2935 = vmatprep.subr.mxu1 %v6751_v44  ;;  %4456 = vmatprep.subr.mxu0 %v7510_v49  ;;  %7756 = vst [vmem:[#allocation104_spill] sm:$0xff] %v7039_v45 }
 0x699   :  { %4681 = vtanh.f32 %v2748_v54  ;;  %2936 = vmatpush1.msra.mxu1 %v6755_v46  ;;  %4457 = vmatpush3.msra.mxu0 %v6990_v41 }
 0x69a   :  { %2937 = vmatprep.subr.mxu1 %v6759_v19  ;;  %4458 = vmatprep.subr.mxu0 %v7510_v49  ;;  %4683 = vrcp.f32 %v2743_v5  ;;  %v7048_v5 = vld [vmem:[#allocation12 + $0x10] sm:$0xff] }
 0x69b   :  { %2938 = vmatpush1.msra.mxu1 %v6763_v7  ;;  %4459 = vmatpush3.msra.mxu0 %v6996_v28  ;;  %7758 = vst [vmem:[#allocation106_spill] sm:$0xff] %v7048_v5 }
 0x69c   :  { %2939 = vmatprep.subr.mxu1 %v6767_v48  ;;  %4460 = vmatprep.subr.mxu0 %v7510_v49 }
 0x69d   :  { %2940 = vmatpush1.msra.mxu1 %v6771_v43  ;;  %4461 = vmatpush3.msra.mxu0 %v7002_v51 }
 0x69e   :  { %2941 = vmatprep.subr.mxu1 %v6775_v18  ;;  %4462 = vmatprep.subr.mxu0 %v7510_v49 }
 0x69f   :  { %2942 = vmatpush1.msra.mxu1 %v6779_v40  ;;  %4463 = vmatpush3.msra.mxu0 %v7008_v58 }
 0x6a0   :  { %2943 = vmatprep.subr.mxu1 %v6783_v11  ;;  %4464 = vmatprep.subr.mxu0 %v7510_v49 }
 0x6a1   :  { %2944 = vmatpush1.msra.mxu1 %v6787_v47  ;;  %4465 = vmatpush3.msra.mxu0 %v7014_v33 }
 0x6a2   :  { %2945 = vmatprep.subr.mxu1 %v6791_v21  ;;  %4466 = vmatprep.subr.mxu0 %v7510_v49 }
 0x6a3   :  { %2946 = vmatpush1.msra.mxu1 %v6795_v52  ;;  %4467 = vmatpush3.msra.mxu0 %v7020_v16 }
 0x6a4   :  { %2947 = vmatprep.subr.mxu1 %v6799_v36  ;;  %4468 = vmatprep.subr.mxu0 %v7510_v49 }
 0x6a5   :  { %2948 = vmatpush1.msra.mxu1 %v6803_v50  ;;  %4469 = vmatpush3.msra.mxu0 %v7026_v24 }
 0x6a6   :  { %v4682_v57 = vpop.eup %4681  ;;  %2949 = vmatprep.subr.mxu1 %v6807_v3  ;;  %4470 = vmatprep.subr.mxu0 %v7510_v49 }
 0x6a7   :  { %2950 = vmatpush1.msra.mxu1 %v6811_v29  ;;  %4471 = vmatpush3.msra.mxu0 %v7032_v34  ;;  %v2750_v55 = vsub.f32 %v6832_v8, %v4682_v57  ;;  %v4684_v62 = vpop.eup %4683 }
 0x6a8   :  { %2951 = vmatprep.subr.mxu1 %v6816_v25  ;;  %4472 = vmatprep.subr.mxu0 %v7510_v49 }
 0x6a9   :  { %2952 = vmatpush1.msra.mxu1 %v6820_v42  ;;  %4473 = vmatpush3.msra.mxu0 %v7039_v45  ;;  %v2751_v35 = vmul.f32 %v4684_v62, %v2750_v55  ;;  %v7768_v55 = vld [vmem:[#allocation50_spill] sm:$0xff]  ;;  %v7769_v62 = vld [vmem:[#allocation31_spill] sm:$0xff] }
 0x6aa   :  { %2953 = vmatprep.subr.mxu1 %v6824_v20  ;;  %4474 = vmatprep.subr.mxu0 %v7510_v49  ;;  %v7805_v20 = vld [vmem:[#allocation78_spill] sm:$0xff] }
 0x6ab   :  { %2954 = vmatpush1.msra.mxu1 %v6828_v56  ;;  %2987 = vmatprep.mubr.f32.mxu1 %v7510_v49  ;;  %v7046_v54 = vadd.f32 %v4682_v57, %v2751_v35  ;;  %v7760_v57 = vld [vmem:[#allocation25_spill] sm:$0xff]  ;;  %v7770_v35 = vld [vmem:[#allocation32_spill] sm:$0xff] }
 0x6ac   :  { %4475 = vmatpush3.msra.mxu0 %v7048_v5  ;;  %4476 = vmatprep.mubr.msk.f32.mxu0 %vm5106_vm0, %v7510_v49 }
 0x6ad   :  { %7757 = vst [vmem:[#allocation105_spill] sm:$0xff] %v7046_v54  ;;  %2988 = vmatmul.mubr.f32.vlgmr.msra.gmra.mxu1 %v7046_v54  ;;  %4477 = vmatmul.mubr.f32.vlgmr.msra.gmra.mxu0 %v7046_v54 }
 0x6ae   :  { %3093 = vmatprep.subr.mxu1 %v6559_v60  ;;  %4479 = vmatprep.subr.mxu0 %v7510_v49  ;;  %v7759_v60 = vld [vmem:[#allocation51_spill] sm:$0xff] }
 0x6af   :  { %3094 = vmatpush1.msra.mxu1 %v6563_v10  ;;  %4480 = vmatpush3.msra.mxu0 %v6842_v4  ;;  %v7761_v10 = vld [vmem:[#allocation26_spill] sm:$0xff]  ;;  %v7763_v4 = vld [vmem:[#allocation27_spill] sm:$0xff] }
 0x6b0   :  { %3095 = vmatprep.subr.mxu1 %v6567_v13  ;;  %4481 = vmatprep.subr.mxu0 %v7510_v49  ;;  %v7762_v13 = vld [vmem:[#allocation72_spill] sm:$0xff] }
 0x6b1   :  { %3096 = vmatpush1.msra.mxu1 %v6571_v31  ;;  %4482 = vmatpush3.msra.mxu0 %v6848_v1  ;;  %v7764_v31 = vld [vmem:[#allocation28_spill] sm:$0xff]  ;;  %v7766_v1 = vld [vmem:[#allocation29_spill] sm:$0xff] }
 0x6b2   :  { %3097 = vmatprep.subr.mxu1 %v6575_v59  ;;  %4483 = vmatprep.subr.mxu0 %v7510_v49  ;;  %v7765_v59 = vld [vmem:[#allocation55_spill] sm:$0xff] }
 0x6b3   :  { %3098 = vmatpush1.msra.mxu1 %v6579_v30  ;;  %4484 = vmatpush3.msra.mxu0 %v7759_v60  ;;  %v7767_v30 = vld [vmem:[#allocation30_spill] sm:$0xff]  ;;  %v7771_v60 = vld [vmem:[#allocation88_spill] sm:$0xff] }
 0x6b4   :  { %3099 = vmatprep.subr.mxu1 %v7760_v57  ;;  %4485 = vmatprep.subr.mxu0 %v7510_v49  ;;  %v7772_v57 = vld [vmem:[#allocation33_spill] sm:$0xff] }
 0x6b5   :  { %3100 = vmatpush1.msra.mxu1 %v7761_v10  ;;  %4486 = vmatpush3.msra.mxu0 %v7762_v13  ;;  %v7773_v10 = vld [vmem:[#allocation34_spill] sm:$0xff]  ;;  %v7774_v13 = vld [vmem:[#allocation68_spill] sm:$0xff] }
 0x6b6   :  { %3101 = vmatprep.subr.mxu1 %v7763_v4  ;;  %4487 = vmatprep.subr.mxu0 %v7510_v49  ;;  %v7775_v4 = vld [vmem:[#allocation35_spill] sm:$0xff] }
 0x6b7   :  { %3102 = vmatpush1.msra.mxu1 %v7764_v31  ;;  %4488 = vmatpush3.msra.mxu0 %v7765_v59  ;;  %v7776_v31 = vld [vmem:[#allocation36_spill] sm:$0xff] }
 0x6b8   :  { %3103 = vmatprep.subr.mxu1 %v7766_v1  ;;  %4489 = vmatprep.subr.mxu0 %v7510_v49  ;;  %v7777_v59 = vld [vmem:[#allocation96_spill] sm:$0xff]  ;;  %v7778_v1 = vld [vmem:[#allocation37_spill] sm:$0xff] }
 0x6b9   :  { %3104 = vmatpush1.msra.mxu1 %v7767_v30  ;;  %4490 = vmatpush3.msra.mxu0 %v7768_v55  ;;  %v7779_v30 = vld [vmem:[#allocation38_spill] sm:$0xff]  ;;  %v7780_v55 = vld [vmem:[#allocation97_spill] sm:$0xff] }
 0x6ba   :  { %3105 = vmatprep.subr.mxu1 %v7769_v62  ;;  %4491 = vmatprep.subr.mxu0 %v7510_v49  ;;  %v7781_v62 = vld [vmem:[#allocation39_spill] sm:$0xff] }
 0x6bb   :  { %3106 = vmatpush1.msra.mxu1 %v7770_v35  ;;  %4492 = vmatpush3.msra.mxu0 %v7771_v60  ;;  %v7782_v35 = vld [vmem:[#allocation40_spill] sm:$0xff]  ;;  %v7783_v60 = vld [vmem:[#allocation98_spill] sm:$0xff] }
 0x6bc   :  { %3107 = vmatprep.subr.mxu1 %v7772_v57  ;;  %4493 = vmatprep.subr.mxu0 %v7510_v49  ;;  %v7784_v57 = vld [vmem:[#allocation41_spill] sm:$0xff] }
 0x6bd   :  { %3108 = vmatpush1.msra.mxu1 %v7773_v10  ;;  %4494 = vmatpush3.msra.mxu0 %v7774_v13  ;;  %v7785_v10 = vld [vmem:[#allocation44_spill] sm:$0xff]  ;;  %v7786_v13 = vld [vmem:[#allocation99_spill] sm:$0xff] }
 0x6be   :  { %3109 = vmatprep.subr.mxu1 %v7775_v4  ;;  %4495 = vmatprep.subr.mxu0 %v7510_v49  ;;  %v7787_v4 = vld [vmem:[#allocation45_spill] sm:$0xff] }
 0x6bf   :  { %3110 = vmatpush1.msra.mxu1 %v7776_v31  ;;  %4496 = vmatpush3.msra.mxu0 %v7777_v59  ;;  %v7788_v31 = vld [vmem:[#allocation47_spill] sm:$0xff]  ;;  %v7789_v59 = vld [vmem:[#allocation100_spill] sm:$0xff] }
 0x6c0   :  { %3111 = vmatprep.subr.mxu1 %v7778_v1  ;;  %4497 = vmatprep.subr.mxu0 %v7510_v49  ;;  %v7790_v1 = vld [vmem:[#allocation92_spill] sm:$0xff] }
 0x6c1   :  { %3112 = vmatpush1.msra.mxu1 %v7779_v30  ;;  %4498 = vmatpush3.msra.mxu0 %v7780_v55  ;;  %v7791_v30 = vld [vmem:[#allocation93_spill] sm:$0xff] }
 0x6c2   :  { %3113 = vmatprep.subr.mxu1 %v7781_v62  ;;  %4499 = vmatprep.subr.mxu0 %v7510_v49  ;;  %v7792_v55 = vld [vmem:[#allocation101_spill] sm:$0xff]  ;;  %v7793_v62 = vld [vmem:[#allocation42_spill] sm:$0xff] }
 0x6c3   :  { %3114 = vmatpush1.msra.mxu1 %v7782_v35  ;;  %4500 = vmatpush3.msra.mxu0 %v7783_v60  ;;  %v7794_v35 = vld [vmem:[#allocation94_spill] sm:$0xff] }
 0x6c4   :  { %3115 = vmatprep.subr.mxu1 %v7784_v57  ;;  %4501 = vmatprep.subr.mxu0 %v7510_v49  ;;  %v7795_v60 = vld [vmem:[#allocation102_spill] sm:$0xff]  ;;  %v7796_v57 = vld [vmem:[#allocation43_spill] sm:$0xff] }
 0x6c5   :  { %3116 = vmatpush1.msra.mxu1 %v7785_v10  ;;  %4502 = vmatpush3.msra.mxu0 %v7786_v13  ;;  %v7797_v10 = vld [vmem:[#allocation95_spill] sm:$0xff] }
 0x6c6   :  { %3117 = vmatprep.subr.mxu1 %v7787_v4  ;;  %4503 = vmatprep.subr.mxu0 %v7510_v49  ;;  %v7798_v13 = vld [vmem:[#allocation103_spill] sm:$0xff]  ;;  %v7799_v4 = vld [vmem:[#allocation46_spill] sm:$0xff] }
 0x6c7   :  { %3118 = vmatpush1.msra.mxu1 %v7788_v31  ;;  %4504 = vmatpush3.msra.mxu0 %v7789_v59 }
 0x6c8   :  { %3119 = vmatprep.subr.mxu1 %v7790_v1  ;;  %4505 = vmatprep.subr.mxu0 %v7510_v49  ;;  %v7800_v1 = vld [vmem:[#allocation69_spill] sm:$0xff] }
 0x6c9   :  { %3120 = vmatpush1.msra.mxu1 %v7791_v30  ;;  %4506 = vmatpush3.msra.mxu0 %v7792_v55 }
 0x6ca   :  { %3121 = vmatprep.subr.mxu1 %v7793_v62  ;;  %4507 = vmatprep.subr.mxu0 %v7510_v49 }
 0x6cb   :  { %3122 = vmatpush1.msra.mxu1 %v7794_v35  ;;  %4508 = vmatpush3.msra.mxu0 %v7795_v60  ;;  %v7801_v60 = vld [vmem:[#allocation71_spill] sm:$0xff] }
 0x6cc   :  { %3123 = vmatprep.subr.mxu1 %v7796_v57  ;;  %4509 = vmatprep.subr.mxu0 %v7510_v49 }
 0x6cd   :  { %3124 = vmatpush1.msra.mxu1 %v7797_v10  ;;  %3157 = vmatprep.mubr.f32.mxu1 %v7510_v49 }
 0x6ce   :  { %4510 = vmatpush3.msra.mxu0 %v7798_v13  ;;  %4511 = vmatprep.mubr.msk.f32.mxu0 %vm5106_vm0, %v7510_v49 }
 0x6cf   :  { %3255 = vmatprep.subr.mxu1 %v7799_v4  ;;  %4514 = vmatprep.subr.mxu0 %v7510_v49  ;;  %v7129_v4 = vld [vmem:[%s7261_s5] ss:$0 sm:$0xff] }
 0x6d0   :  { %7802 = vst [vmem:[#allocation107_spill] sm:$0xff] %v7129_v4 }
 0x74c   :  { %v2827_v31 = vpop.f32.mrf.mxu1  ;;  %v2898_v59 = vpop.f32.mrf.mxu0 }
 0x74d   :  { %v2902_v30 = vadd.f32 %v2827_v31, %v7800_v1  ;;  %v2916_v5 = vadd.f32 %v7129_v4, %v2898_v59 }
 0x74e   :  { %v4443_v55 = vpop.f32.mrf.mxu0  ;;  %v2829_v35 = vpop.f32.mrf.mxu1 }
 0x74f   :  { %v3652_v62 = vmul.f32 -1.442695, %v2902_v30  ;;  %v2909_v57 = vadd.f32 %v2829_v35, %v7801_v60  ;;  %v7803_v55 = vld [vmem:[#allocation52_spill] sm:$0xff] }
 0x751   :  { %4685 = vpow2.f32 %v3652_v62  ;;  %v3653_v10 = vmul.f32 -1.442695, %v2909_v57  ;;  %v7804_v57 = vld [vmem:[#allocation70_spill] sm:$0xff] }
 0x753   :  { %4687 = vpow2.f32 %v3653_v10 }
 0x75e   :  { %v4686_v12 = vpop.eup %4685 }
 0x75f   :  { %v2906_v13 = vadd.f32 1.0, %v4686_v12 }
 0x760   :  { %v4688_v8 = vpop.eup %4687 }
 0x761   :  { %4689 = vrcp.f32 %v2906_v13  ;;  %v2913_v10 = vadd.f32 1.0, %v4688_v8  ;;  %v7155_v8 = vld [vmem:[%s7262_s6] ss:$0 sm:$0xff]  ;;  %s5107_s6 = smov [#allocation16]  }
 0x762   :  { %s3607_s14 = sshll.u32 %s5107_s6, 4  ;;  %s3608_s14 = int_to_ptr.vmem [resolvable:$true] %s3607_s14 }
 0x763   :  { %s5041_s15 = scalar_lea.vmem %s3608_s14, 256  ;;  %p5046_p3 = scmp.lt.s32.totalorder %s3608_s14, %s3608_s14 }
 0x764   :  { %p5042_p2 = scmp.ne.s32.totalorder %s3608_s14, %s5041_s15  ;;  %p5047_p4 = scmp.lt.s32.totalorder %s5041_s15, %s5041_s15 }
 0x766   :  { %p5048_p5 = por %p5047_p4, %p5046_p3 }
 0x768   :  { %p5049_p6 = pnand %p5048_p5, %p5042_p2 }
 0x76d   :  { %v2989_v31 = vpop.f32.mrf.mxu1  ;;  %v3060_v1 = vpop.f32.mrf.mxu0 }
 0x76e   :  { %v4690_v30 = vpop.eup %4689  ;;  %v3064_v62 = vadd.f32 %v2989_v31, %v7803_v55  ;;  %v3438_v55 = vld [vmem:[#allocation13] sm:$0xff] }
 0x76f   :  { %v2917_v56 = vmul.f32 %v4690_v30, %v2916_v5  ;;  %v4478_v35 = vpop.f32.mrf.mxu0  ;;  %v2991_v13 = vpop.f32.mrf.mxu1 }
 0x770   :  { %v3654_v60 = vmul.f32 -1.442695, %v3064_v62  ;;  %v3071_v45 = vadd.f32 %v2991_v13, %v7805_v20 }
 0x771   :  { %v2918_v12 = vadd.f32 %v2917_v56, %v7804_v57  ;;  %v3463_v56 = vld [vmem:[#allocation13 + $0xc8] sm:$0xff] }
 0x772   :  { %4691 = vpow2.f32 %v3654_v60  ;;  %v3655_v42 = vmul.f32 -1.442695, %v3071_v45  ;;  %v3440_v45 = vld [vmem:[#allocation13 + $0x10] sm:$0xff]  ;;  %v7814_v60 = vld [vmem:[#allocation73_spill] sm:$0xff] }
 0x773   :  { %4693 = vtanh.f32 %v2918_v12 }
 0x774   :  { %4695 = vrcp.f32 %v2913_v10 }
 0x775   :  { %4697 = vpow2.f32 %v3655_v42  ;;  %v3448_v42 = vld [vmem:[#allocation13 + $0x50] sm:$0xff] }
 0x77f   :  { %v4692_v25 = vpop.eup %4691 }
 0x780   :  { %v4694_v59 = vpop.eup %4693  ;;  %v3068_v4 = vadd.f32 1.0, %v4692_v25  ;;  %v3464_v25 = vld [vmem:[#allocation13 + $0xd0] sm:$0xff] }
 0x781   :  { %v2920_v54 = vsub.f32 %v6947_v22, %v4694_v59  ;;  %v4696_v31 = vpop.eup %4695 }
 0x782   :  { %4699 = vrcp.f32 %v3068_v4  ;;  %v4698_v20 = vpop.eup %4697  ;;  %v3439_v4 = vld [vmem:[#allocation13 + $0x8] sm:$0xff] }
 0x783   :  { %v2921_v5 = vmul.f32 %v4696_v31, %v2920_v54  ;;  %v3455_v54 = vld [vmem:[#allocation13 + $0x88] sm:$0xff] }
 0x785   :  { %v7136_v30 = vadd.f32 %v4694_v59, %v2921_v5  ;;  %v7815_v59 = vld [vmem:[#allocation75_spill] sm:$0xff] }
 0x787   :  { %3158 = vmatmul.mubr.f32.vlgmr.msra.gmra.mxu1 %v7136_v30  ;;  %4512 = vmatmul.mubr.f32.vlgmr.msra.gmra.mxu0 %v7136_v30 }
 0x788   :  { %3256 = vmatpush1.msra.mxu1 %v6705_v27  ;;  %4515 = vmatpush3.msra.mxu0 %v6952_v14  ;;  %v3078_v27 = vadd.f32 %v7155_v8, %v3060_v1  ;;  %v3447_v14 = vld [vmem:[#allocation13 + $0x48] sm:$0xff]  ;;  %v3454_v1 = vld [vmem:[#allocation13 + $0x80] sm:$0xff] }
 0x789   :  { %3257 = vmatprep.subr.mxu1 %v6709_v38  ;;  %4516 = vmatprep.subr.mxu0 %v7510_v49 }
 0x78a   :  { %3258 = vmatpush1.msra.mxu1 %v6713_v26  ;;  %4517 = vmatpush3.msra.mxu0 %v6958_v9  ;;  %v3462_v9 = vld [vmem:[#allocation13 + $0xc0] sm:$0xff] }
 0x78b   :  { %3259 = vmatprep.subr.mxu1 %v6717_v15  ;;  %4518 = vmatprep.subr.mxu0 %v7510_v49  ;;  %v7806_v15 = vld [vmem:[#allocation79_spill] sm:$0xff] }
 0x78c   :  { %3260 = vmatpush1.msra.mxu1 %v6721_v39  ;;  %4519 = vmatpush3.msra.mxu0 %v6964_v53  ;;  %v3446_v53 = vld [vmem:[#allocation13 + $0x40] sm:$0xff] }
 0x78d   :  { %3261 = vmatprep.subr.mxu1 %v6725_v17  ;;  %4520 = vmatprep.subr.mxu0 %v7510_v49  ;;  %v3075_v17 = vadd.f32 1.0, %v4698_v20 }
 0x78e   :  { %3262 = vmatpush1.msra.mxu1 %v6730_v0  ;;  %4521 = vmatpush3.msra.mxu0 %v6971_v23  ;;  %v3461_v23 = vld [vmem:[#allocation13 + $0xb8] sm:$0xff] }
 0x78f   :  { %v4700_v38 = vpop.eup %4699  ;;  %3263 = vmatprep.subr.mxu1 %v6734_v2  ;;  %4522 = vmatprep.subr.mxu0 %v7510_v49  ;;  %v7807_v2 = vld [vmem:[#allocation105_spill] sm:$0xff] }
 0x790   :  { %v3079_v26 = vmul.f32 %v4700_v38, %v3078_v27  ;;  %3264 = vmatpush1.msra.mxu1 %v6738_v61  ;;  %4523 = vmatpush3.msra.mxu0 %v6977_v37  ;;  %v3445_v37 = vld [vmem:[#allocation13 + $0x38] sm:$0xff] }
 0x791   :  { %3265 = vmatprep.subr.mxu1 %v6742_v6  ;;  %4524 = vmatprep.subr.mxu0 %v7510_v49 }
 0x792   :  { %v3080_v39 = vadd.f32 %v3079_v26, %v7806_v15  ;;  %3266 = vmatpush1.msra.mxu1 %v6747_v63  ;;  %4525 = vmatpush3.msra.mxu0 %v6984_v32  ;;  %v7808_v63 = vld [vmem:[#allocation59_spill] sm:$0xff]  ;;  %v3460_v32 = vld [vmem:[#allocation13 + $0xb0] sm:$0xff] }
 0x793   :  { %3267 = vmatprep.subr.mxu1 %v6751_v44  ;;  %4526 = vmatprep.subr.mxu0 %v7510_v49  ;;  %v7809_v44 = vld [vmem:[#allocation64_spill] sm:$0xff]  ;;  %v7816_v26 = vld [vmem:[#allocation107_spill] sm:$0xff] }
 0x794   :  { %4701 = vtanh.f32 %v3080_v39  ;;  %3268 = vmatpush1.msra.mxu1 %v6755_v46  ;;  %4527 = vmatpush3.msra.mxu0 %v6990_v41  ;;  %v7810_v46 = vld [vmem:[#allocation104_spill] sm:$0xff] }
 0x795   :  { %3269 = vmatprep.subr.mxu1 %v6759_v19  ;;  %4528 = vmatprep.subr.mxu0 %v7510_v49  ;;  %4703 = vrcp.f32 %v3075_v17  ;;  %v3444_v41 = vld [vmem:[#allocation13 + $0x30] sm:$0xff] }
 0x796   :  { %3270 = vmatpush1.msra.mxu1 %v6763_v7  ;;  %4529 = vmatpush3.msra.mxu0 %v6996_v28  ;;  %v7811_v7 = vld [vmem:[#allocation58_spill] sm:$0xff]  ;;  %v3459_v28 = vld [vmem:[#allocation13 + $0xa8] sm:$0xff] }
 0x797   :  { %3271 = vmatprep.subr.mxu1 %v6767_v48  ;;  %4530 = vmatprep.subr.mxu0 %v7510_v49  ;;  %v7812_v48 = vld [vmem:[#allocation84_spill] sm:$0xff] }
 0x798   :  { %3272 = vmatpush1.msra.mxu1 %v6771_v43  ;;  %4531 = vmatpush3.msra.mxu0 %v7002_v51  ;;  %v3443_v51 = vld [vmem:[#allocation13 + $0x28] sm:$0xff] }
 0x799   :  { %3273 = vmatprep.subr.mxu1 %v6775_v18  ;;  %4532 = vmatprep.subr.mxu0 %v7510_v49  ;;  %v7813_v18 = vld [vmem:[#allocation106_spill] sm:$0xff] }
 0x79a   :  { %3274 = vmatpush1.msra.mxu1 %v6779_v40  ;;  %4533 = vmatpush3.msra.mxu0 %v7008_v58  ;;  %v3469_v40 = vld [vmem:[#allocation13 + $0xf8] sm:$0xff]  ;;  %v3458_v58 = vld [vmem:[#allocation13 + $0xa0] sm:$0xff] }
 0x79b   :  { %3275 = vmatprep.subr.mxu1 %v6783_v11  ;;  %4534 = vmatprep.subr.mxu0 %v7510_v49  ;;  %v3453_v11 = vld [vmem:[#allocation13 + $0x78] sm:$0xff] }
 0x79c   :  { %3276 = vmatpush1.msra.mxu1 %v6787_v47  ;;  %4535 = vmatpush3.msra.mxu0 %v7014_v33  ;;  %v3468_v47 = vld [vmem:[#allocation13 + $0xf0] sm:$0xff]  ;;  %v3442_v33 = vld [vmem:[#allocation13 + $0x20] sm:$0xff] }
 0x79d   :  { %3277 = vmatprep.subr.mxu1 %v6791_v21  ;;  %4536 = vmatprep.subr.mxu0 %v7510_v49  ;;  %v3452_v21 = vld [vmem:[#allocation13 + $0x70] sm:$0xff] }
 0x79e   :  { %3278 = vmatpush1.msra.mxu1 %v6795_v52  ;;  %4537 = vmatpush3.msra.mxu0 %v7020_v16  ;;  %v3467_v52 = vld [vmem:[#allocation13 + $0xe8] sm:$0xff]  ;;  %v3457_v16 = vld [vmem:[#allocation13 + $0x98] sm:$0xff] }
 0x79f   :  { %3279 = vmatprep.subr.mxu1 %v6799_v36  ;;  %4538 = vmatprep.subr.mxu0 %v7510_v49  ;;  %v3451_v36 = vld [vmem:[#allocation13 + $0x68] sm:$0xff] }
 0x7a0   :  { %3280 = vmatpush1.msra.mxu1 %v6803_v50  ;;  %4539 = vmatpush3.msra.mxu0 %v7026_v24  ;;  %v3466_v50 = vld [vmem:[#allocation13 + $0xe0] sm:$0xff]  ;;  %v3441_v24 = vld [vmem:[#allocation13 + $0x18] sm:$0xff] }
 0x7a1   :  { %v4702_v0 = vpop.eup %4701  ;;  %3281 = vmatprep.subr.mxu1 %v6807_v3  ;;  %4540 = vmatprep.subr.mxu0 %v7510_v49  ;;  %v3450_v3 = vld [vmem:[#allocation13 + $0x60] sm:$0xff] }
 0x7a2   :  { %3282 = vmatpush1.msra.mxu1 %v6811_v29  ;;  %4541 = vmatpush3.msra.mxu0 %v7032_v34  ;;  %v3082_v61 = vsub.f32 %v7807_v2, %v4702_v0  ;;  %v4704_v6 = vpop.eup %4703  ;;  %v3449_v29 = vld [vmem:[#allocation13 + $0x58] sm:$0xff]  ;;  %v3456_v34 = vld [vmem:[#allocation13 + $0x90] sm:$0xff] }
 0x7a3   :  { %3283 = vmatprep.subr.mxu1 %v7808_v63  ;;  %4542 = vmatprep.subr.mxu0 %v7510_v49 }
 0x7a4   :  { %3284 = vmatpush1.msra.mxu1 %v7809_v44  ;;  %4543 = vmatpush3.msra.mxu0 %v7810_v46  ;;  %v3083_v19 = vmul.f32 %v4704_v6, %v3082_v61  ;;  %v7817_v61 = vld [vmem:[#allocation48_spill] sm:$0xff] }
 0x7a5   :  { %3285 = vmatprep.subr.mxu1 %v7811_v7  ;;  %4544 = vmatprep.subr.mxu0 %v7510_v49 }
 0x7a6   :  { %3286 = vmatpush1.msra.mxu1 %v7812_v48  ;;  %3319 = vmatprep.mubr.f32.mxu1 %v7510_v49  ;;  %v7210_v43 = vadd.f32 %v4702_v0, %v3083_v19  ;;  %v7818_v19 = vld [vmem:[#allocation74_spill] sm:$0xff] }
 0x7a7   :  { %4545 = vmatpush3.msra.mxu0 %v7813_v18  ;;  %4546 = vmatprep.mubr.msk.f32.mxu0 %vm5106_vm0, %v7510_v49  ;;  %v3465_v49 = vld [vmem:[#allocation13 + $0xd8] sm:$0xff] }
 0x7a8   :  { %3320 = vmatmul.mubr.f32.vlgmr.msra.gmra.mxu1 %v7210_v43  ;;  %4547 = vmatmul.mubr.f32.vlgmr.msra.gmra.mxu0 %v7210_v43 }
 0x7a9   :  { %3933 = vmatprep.subr.mxu1 %v3469_v40  ;;  %v7819_v40 = vld [vmem:[#allocation76_spill] sm:$0xff] }
 0x7aa   :  { %3934 = vmatpush3.msra.mxu1 %v3453_v11 }
 0x7ab   :  { %3935 = vmatprep.subr.mxu1 %v3468_v47 }
 0x7ac   :  { %3936 = vmatpush3.msra.mxu1 %v3452_v21 }
 0x7ad   :  { %3937 = vmatprep.subr.mxu1 %v3467_v52 }
 0x7ae   :  { %3938 = vmatpush3.msra.mxu1 %v3451_v36 }
 0x7af   :  { %3939 = vmatprep.subr.mxu1 %v3466_v50 }
 0x7b0   :  { %3940 = vmatpush3.msra.mxu1 %v3450_v3 }
 0x7b1   :  { %3941 = vmatprep.subr.mxu1 %v3465_v49 }
 0x7b2   :  { %3942 = vmatpush3.msra.mxu1 %v3449_v29 }
 0x7b3   :  { %3943 = vmatprep.subr.mxu1 %v3464_v25 }
 0x7b4   :  { %3944 = vmatpush3.msra.mxu1 %v3448_v42 }
 0x7b5   :  { %3945 = vmatprep.subr.mxu1 %v3463_v56 }
 0x7b6   :  { %3946 = vmatpush3.msra.mxu1 %v3447_v14 }
 0x7b7   :  { %3947 = vmatprep.subr.mxu1 %v3462_v9  ;;  %v7820_v9 = vld [vmem:[#allocation77_spill] sm:$0xff] }
 0x7b8   :  { %3948 = vmatpush3.msra.mxu1 %v3446_v53 }
 0x7b9   :  { %3949 = vmatprep.subr.mxu1 %v3461_v23 }
 0x7ba   :  { %3950 = vmatpush3.msra.mxu1 %v3445_v37 }
 0x7bb   :  { %3951 = vmatprep.subr.mxu1 %v3460_v32 }
 0x7bc   :  { %3952 = vmatpush3.msra.mxu1 %v3444_v41 }
 0x7bd   :  { %3953 = vmatprep.subr.mxu1 %v3459_v28 }
 0x7be   :  { %3954 = vmatpush3.msra.mxu1 %v3443_v51 }
 0x7bf   :  { %3955 = vmatprep.subr.mxu1 %v3458_v58  ;;  %v7821_v58 = vld [vmem:[#allocation91_spill] sm:$0xff] }
 0x7c0   :  { %3956 = vmatpush3.msra.mxu1 %v3442_v33  ;;  %v7823_v33 = vld [vmem:[#allocation53_spill] sm:$0xff] }
 0x7c1   :  { %3957 = vmatprep.subr.mxu1 %v3457_v16  ;;  %v7824_v16 = vld [vmem:[#allocation85_spill] sm:$0xff] }
 0x7c2   :  { %3958 = vmatpush3.msra.mxu1 %v3441_v24  ;;  %v7825_v24 = vld [vmem:[#allocation86_spill] sm:$0xff] }
 0x7c3   :  { %3959 = vmatprep.subr.mxu1 %v3456_v34  ;;  %v7826_v34 = vld [vmem:[#allocation87_spill] sm:$0xff] }
 0x7c4   :  { %3960 = vmatpush3.msra.mxu1 %v3440_v45  ;;  %v7827_v45 = vld [vmem:[#allocation57_spill] sm:$0xff] }
 0x7c5   :  { %3961 = vmatprep.subr.mxu1 %v3455_v54  ;;  %v7828_v54 = vld [vmem:[#allocation90_spill] sm:$0xff] }
 0x7c6   :  { %3962 = vmatpush3.msra.mxu1 %v3439_v4  ;;  %v7829_v4 = vld [vmem:[#allocation89_spill] sm:$0xff] }
 0x7c7   :  { %3963 = vmatprep.subr.mxu1 %v3454_v1 }
 0x7c8   :  { %3964 = vmatpush3.msra.mxu1 %v3438_v55 }
 0x847   :  { %v3159_v62 = vpop.f32.mrf.mxu1  ;;  %v3230_v35 = vpop.f32.mrf.mxu0 }
 0x848   :  { %v3234_v57 = vadd.f32 %v3159_v62, %v7814_v60  ;;  %v3248_v15 = vadd.f32 %v7816_v26, %v3230_v35 }
 0x849   :  { %v4513_v12 = vpop.f32.mrf.mxu0  ;;  %v3161_v13 = vpop.f32.mrf.mxu1 }
 0x84a   :  { %v3656_v10 = vmul.f32 -1.442695, %v3234_v57  ;;  %v3241_v31 = vadd.f32 %v3161_v13, %v7815_v59 }
 0x84c   :  { %4705 = vpow2.f32 %v3656_v10  ;;  %v3657_v5 = vmul.f32 -1.442695, %v3241_v31 }
 0x84e   :  { %4707 = vpow2.f32 %v3657_v5 }
 0x859   :  { %v4706_v20 = vpop.eup %4705 }
 0x85a   :  { %v3238_v27 = vadd.f32 1.0, %v4706_v20 }
 0x85b   :  { %v4708_v38 = vpop.eup %4707 }
 0x85c   :  { %4709 = vrcp.f32 %v3238_v27  ;;  %v3245_v48 = vadd.f32 1.0, %v4708_v38 }
 0x868   :  { %v3321_v39 = vpop.f32.mrf.mxu1  ;;  %v3392_v17 = vpop.f32.mrf.mxu0 }
 0x869   :  { %v4710_v0 = vpop.eup %4709  ;;  %v3396_v6 = vadd.f32 %v3321_v39, %v7817_v61  ;;  %v3410_v42 = vadd.f32 %v7155_v8, %v3392_v17  ;;  %v7822_v8 = vld [vmem:[#allocation49_spill] sm:$0xff] }
 0x86a   :  { %v3249_v63 = vmul.f32 %v4710_v0, %v3248_v15  ;;  %v4548_v44 = vpop.f32.mrf.mxu0  ;;  %v3323_v18 = vpop.f32.mrf.mxu1 }
 0x86b   :  { %v3658_v46 = vmul.f32 -1.442695, %v3396_v6  ;;  %v3403_v11 = vadd.f32 %v3323_v18, %v7819_v40 }
 0x86c   :  { %v3250_v7 = vadd.f32 %v3249_v63, %v7818_v19 }
 0x86d   :  { %4711 = vpow2.f32 %v3658_v46  ;;  %v3659_v47 = vmul.f32 -1.442695, %v3403_v11 }
 0x86e   :  { %4713 = vtanh.f32 %v3250_v7 }
 0x86f   :  { %4715 = vrcp.f32 %v3245_v48 }
 0x870   :  { %4717 = vpow2.f32 %v3659_v47 }
 0x87a   :  { %v4712_v21 = vpop.eup %4711 }
 0x87b   :  { %v4714_v52 = vpop.eup %4713  ;;  %v3400_v36 = vadd.f32 1.0, %v4712_v21 }
 0x87c   :  { %v3252_v50 = vsub.f32 %v7136_v30, %v4714_v52  ;;  %v4716_v3 = vpop.eup %4715 }
 0x87d   :  { %4719 = vrcp.f32 %v3400_v36  ;;  %v4718_v25 = vpop.eup %4717 }
 0x87e   :  { %v3253_v49 = vmul.f32 %v4716_v3, %v3252_v50  ;;  %v3407_v23 = vadd.f32 1.0, %v4718_v25 }
 0x880   :  { %v3254_v29 = vadd.f32 %v4714_v52, %v3253_v49 }
 0x882   :  { %3419 = vst [vmem:[#allocation16] sm:$0xff] %v3254_v29 }
 0x88a   :  { %v4720_v56 = vpop.eup %4719 }
 0x88b   :  { %v3411_v14 = vmul.f32 %v4720_v56, %v3410_v42 }
 0x88d   :  { %v3412_v53 = vadd.f32 %v3411_v14, %v7820_v9 }
 0x88f   :  { %4721 = vtanh.f32 %v3412_v53 }
 0x890   :  { %4723 = vrcp.f32 %v3407_v23 }
 0x89c   :  { %v4722_v37 = vpop.eup %4721 }
 0x89d   :  { %v3414_v32 = vsub.f32 %v7210_v43, %v4722_v37  ;;  %v4724_v41 = vpop.eup %4723 }
 0x89f   :  { %v3415_v28 = vmul.f32 %v4724_v41, %v3414_v32 }
 0x8a1   :  { %v3416_v51 = vadd.f32 %v4722_v37, %v3415_v28 }
 0x8a3   :  { %3541 = vmatprep.mubr.f32.mxu1 %v3416_v51  ;;  %3421 = vst [vmem:[#allocation16 + $0x8] sm:$0xff] %v3416_v51 }
 0x8a4   :  { %3542 = vmatmul.mubr.f32.vlgmr.msra.gmra.mxu1 %v7821_v58 }
 0x8a5   :  { %3546 = vmatprep.mubr.f32.mxu1 %v7210_v43  ;;  %v7830_v43 = vld [vmem:[#allocation24_spill] sm:$0xff] }
 0x8a8   :  { %3547 = vmatmul.mubr.f32.gmra.mxu1 %v7822_v8 }
 0x8a9   :  { %3551 = vmatprep.mubr.f32.mxu1 %v7807_v2 }
 0x8ac   :  { %3552 = vmatmul.mubr.f32.gmra.mxu1 %v7823_v33 }
 0x8ad   :  { %3556 = vmatprep.mubr.f32.mxu1 %v7824_v16 }
 0x8b0   :  { %3557 = vmatmul.mubr.f32.gmra.mxu1 %v7825_v24 }
 0x8b1   :  { %3561 = vmatprep.mubr.f32.mxu1 %v7826_v34 }
 0x8b4   :  { %3562 = vmatmul.mubr.f32.gmra.mxu1 %v7827_v45 }
 0x8b5   :  { %3566 = vmatprep.mubr.f32.mxu1 %v7828_v54 }
 0x8b8   :  { %3567 = vmatmul.mubr.f32.gmra.mxu1 %v6947_v22 }
 0x8b9   :  { %3571 = vmatprep.mubr.f32.mxu1 %v7829_v4 }
 0x8bc   :  { %3572 = vmatmul.mubr.f32.gmra.mxu1 %v7136_v30 }
 0x8bd   :  { %3576 = vmatprep.mubr.f32.mxu1 %v7830_v43 }
 0x8c0   :  { %3577 = vmatmul.mubr.f32.gmra.mxu1 %v3254_v29 }
 0x8c1   :  { %5052 = shalt.err (!%p5049_p6)
}
 0x8c2   :  { %3613 = dma.vmem_to_hbm [thread:$0]  %s3608_s14, 256, %s7266_s10, [#allocation17], %s5100_s29, %s5100_s29, %s5101_s30  }
 0x8c3   :  { %v3660_v30 = vld [vmem:[%s7264_s8] ss:$0 sm:$0xff]  ;;  %s5108_s8 = smov [#allocation15]  }
 0x8c4   :  { %s3595_s10 = sshll.u32 %s5108_s8, 4  ;;  %s3596_s10 = int_to_ptr.vmem [resolvable:$true] %s3595_s10 }
 0x8c5   :  { %s5061_s0 = scalar_lea.vmem %s3596_s10, 1024  ;;  %p5066_p8 = scmp.lt.s32.totalorder %s3596_s10, %s3596_s10 }
 0x8c6   :  { %p5062_p7 = scmp.ne.s32.totalorder %s3596_s10, %s5061_s0  ;;  %p5067_p9 = scmp.lt.s32.totalorder %s5061_s0, %s5061_s0 }
 0x8c8   :  { %p5068_p10 = por %p5067_p9, %p5066_p8 }
 0x8ca   :  { %p5069_p11 = pnand %p5068_p10, %p5062_p7 }
 0x964   :  { %v3965_v22 = vpop.f32.mrf.mxu1 }
 0x966   :  { %v3966_v2 = vpop.f32.mrf.mxu1 }
 0x967   :  { %v3967_v1 = vadd.f32 %v3966_v2, %v3965_v22 }
 0x968   :  { %v3968_v55 = vpop.f32.mrf.mxu1 }
 0x969   :  { %v3544_v62 = vadd.f32 %v3967_v1, %v3660_v30 }
 0x96a   :  { %v3969_v35 = vpop.f32.mrf.mxu1 }
 0x96b   :  { %3582 = vst [vmem:[#allocation15] sm:$0xff] %v3544_v62  ;;  %v3970_v60 = vadd.f32 %v3969_v35, %v3968_v55 }
 0x96c   :  { %v3971_v57 = vpop.f32.mrf.mxu1 }
 0x96d   :  { %v3549_v12 = vadd.f32 %v3970_v60, %v3660_v30 }
 0x96e   :  { %v3972_v10 = vpop.f32.mrf.mxu1 }
 0x96f   :  { %3583 = vst [vmem:[#allocation15 + $0x8] sm:$0xff] %v3549_v12  ;;  %v3973_v13 = vadd.f32 %v3972_v10, %v3971_v57 }
 0x970   :  { %v3974_v59 = vpop.f32.mrf.mxu1 }
 0x971   :  { %v3554_v31 = vadd.f32 %v3973_v13, %v3660_v30 }
 0x972   :  { %v3975_v5 = vpop.f32.mrf.mxu1 }
 0x973   :  { %3584 = vst [vmem:[#allocation15 + $0x10] sm:$0xff] %v3554_v31  ;;  %v3976_v20 = vadd.f32 %v3975_v5, %v3974_v59 }
 0x974   :  { %v3977_v27 = vpop.f32.mrf.mxu1 }
 0x975   :  { %v3559_v38 = vadd.f32 %v3976_v20, %v3660_v30 }
 0x976   :  { %v3978_v26 = vpop.f32.mrf.mxu1 }
 0x977   :  { %3585 = vst [vmem:[#allocation15 + $0x18] sm:$0xff] %v3559_v38  ;;  %v3979_v15 = vadd.f32 %v3978_v26, %v3977_v27 }
 0x978   :  { %v3980_v39 = vpop.f32.mrf.mxu1 }
 0x979   :  { %v3564_v17 = vadd.f32 %v3979_v15, %v3660_v30 }
 0x97a   :  { %v3981_v0 = vpop.f32.mrf.mxu1 }
 0x97b   :  { %3586 = vst [vmem:[#allocation15 + $0x20] sm:$0xff] %v3564_v17  ;;  %v3982_v61 = vadd.f32 %v3981_v0, %v3980_v39 }
 0x97c   :  { %v3983_v6 = vpop.f32.mrf.mxu1 }
 0x97d   :  { %v3569_v63 = vadd.f32 %v3982_v61, %v3660_v30 }
 0x97e   :  { %v3984_v44 = vpop.f32.mrf.mxu1 }
 0x97f   :  { %3587 = vst [vmem:[#allocation15 + $0x28] sm:$0xff] %v3569_v63  ;;  %v3985_v46 = vadd.f32 %v3984_v44, %v3983_v6 }
 0x980   :  { %v3986_v19 = vpop.f32.mrf.mxu1 }
 0x981   :  { %v3574_v7 = vadd.f32 %v3985_v46, %v3660_v30 }
 0x982   :  { %v3987_v48 = vpop.f32.mrf.mxu1 }
 0x983   :  { %3588 = vst [vmem:[#allocation15 + $0x30] sm:$0xff] %v3574_v7  ;;  %v3988_v18 = vadd.f32 %v3987_v48, %v3986_v19 }
 0x985   :  { %v3579_v40 = vadd.f32 %v3988_v18, %v3660_v30 }
 0x987   :  { %3589 = vst [vmem:[#allocation15 + $0x38] sm:$0xff] %v3579_v40 }
 0x988   :  { %5072 = shalt.err (!%p5069_p11)
}
 0x989   :  { %3601 = dma.vmem_to_hbm [thread:$0]  %s3596_s10, 1024, %s7265_s9, [#allocation6], %s5100_s29, %s5100_s29, %s5101_s30  }
 0x98a   :  { %5089 = dma.done.wait [#allocation6], 1024  }
 0x98b   :  { %5090 = vsyncadd [#allocation6], 4294966272 }
 0x98c   :  { %5091 = dma.done.wait [#allocation17], 256  }
 0x98d   :  { %5092 = vsyncadd [#allocation17], 4294967040 }
 0x98e   :  { %3620 = vsyncpa [#allocation5], 1 }
 0x98f   :  { %3621 = vsyncpa [#allocation8], 1 }
 0x990   :  { %3622 = vsyncpa [#allocation11], 1 }
 0x991   :  { %3623 = vsyncpa [#allocation14], 1 }
 0x992   :  { %3624 = vsyncpa [#allocation6], 1 }
 0x993   :  { %3625 = vsyncpa [#allocation17], 1 }

</bundles_post_ra>
